<compile_context>
chip_gen: v7x
topology: tpu7x:2x2x1
jax: 0.10.0
libtpu: 0.0.40
codegen_flags: <defaults>
</compile_context>

<pallas_src>
import functools

import numpy as np

import jax
import jax.numpy as jnp
from jax.experimental import pallas as pl
from jax.experimental.pallas import tpu as pltpu

# Fixed LeNet / CIFAR-10 geometry implied by hidden = 768 (= 12 * 8 * 8).
K = 5              # conv kernel size
PAD = 2            # conv padding (5 // 2)
C_MID = 12         # channels of conv1/2/3 outputs
CP = 16            # channel padding of stored conv outputs (12 -> 16 lanes)
CP_IN = 4          # channel padding of the network input (3 -> 4 lanes)
NUM_CLASSES = 10
NP_CLASSES = 128   # class padding so the final store is lane-dense

# Stored (guarded) per-image row counts.
H0_STORE = 40      # conv1 input: 4 residue-mod-4 blocks of 8 rows + guards + tail pad

# Static slice starts of the 5 vertical taps (dy = 0..4), per layer.
# conv1 input row order per image: [h%4==0 (8 rows), Z, h%4==1, Z, h%4==2, Z, h%4==3, 0-pad]
CONV1_EVEN_STARTS = (17, 26, 0, 9, 18)   # produce output rows 0,2,...,14
CONV1_ODD_STARTS = (0, 9, 18, 27, 1)     # produce output rows 1,3,...,15
# conv2 input (conv1 output) stored [Z, even rows(8), Z, odd rows(8)]
CONV2_STARTS = (0, 9, 1, 10, 2)
# conv3 input stored [Z, Z, rows 0..7, Z, Z]
CONV3_STARTS = (0, 1, 2, 3, 4)


# ----------------------------------------------------------------------------
# Parameters (deterministic init, same layout as the nn.Module)
# ----------------------------------------------------------------------------
def init_params(key, channel=3, hidden=768, num_classes=10):
    ks = jax.random.split(key, 8)
    scale = 0.1
    return {
        "conv1_w": scale * jax.random.normal(ks[0], (12, channel, 5, 5), jnp.float32),
        "conv1_b": scale * jax.random.normal(ks[1], (12,), jnp.float32),
        "conv2_w": scale * jax.random.normal(ks[2], (12, 12, 5, 5), jnp.float32),
        "conv2_b": scale * jax.random.normal(ks[3], (12,), jnp.float32),
        "conv3_w": scale * jax.random.normal(ks[4], (12, 12, 5, 5), jnp.float32),
        "conv3_b": scale * jax.random.normal(ks[5], (12,), jnp.float32),
        "fc_w": scale * jax.random.normal(ks[6], (num_classes, hidden), jnp.float32),
        "fc_b": scale * jax.random.normal(ks[7], (num_classes,), jnp.float32),
    }


# ----------------------------------------------------------------------------
# One-time construction of the folded weight matrices (batch independent).
# Horizontal taps, stride/padding along W, channel contraction, channel/class
# padding and the PyTorch NCHW flatten order are all baked in here.
# ----------------------------------------------------------------------------
def prepare_constants(params):
    w1 = np.asarray(params["conv1_w"], np.float32)   # (12, 3, 5, 5)
    w2 = np.asarray(params["conv2_w"], np.float32)   # (12, 12, 5, 5)
    w3 = np.asarray(params["conv3_w"], np.float32)   # (12, 12, 5, 5)
    fw = np.asarray(params["fc_w"], np.float32)      # (10, 768)

    # conv1: rows = (dy, wi, ci<4), cols = (wo, co<16)           (640, 256)
    r1 = np.zeros((K * 32 * CP_IN, 16 * CP), np.float32)
    for dy in range(K):
        for wo in range(16):
            for dx in range(K):
                wi = 2 * wo + dx - PAD
                if 0 <= wi < 32:
                    r1[dy * 128 + wi * CP_IN: dy * 128 + wi * CP_IN + 3,
                       wo * CP: wo * CP + C_MID] = w1[:, :, dy, dx].T

    # conv2: rows = (dy, wi, ci<16), cols = (wo, co<16)          (1280, 128)
    r2 = np.zeros((K * 16 * CP, 8 * CP), np.float32)
    for dy in range(K):
        for wo in range(8):
            for dx in range(K):
                wi = 2 * wo + dx - PAD
                if 0 <= wi < 16:
                    r2[dy * 256 + wi * CP: dy * 256 + wi * CP + C_MID,
                       wo * CP: wo * CP + C_MID] = w2[:, :, dy, dx].T

    # conv3: stride 1                                            (640, 128)
    r3 = np.zeros((K * 8 * CP, 8 * CP), np.float32)
    for dy in range(K):
        for wo in range(8):
            for dx in range(K):
                wi = wo + dx - PAD
                if 0 <= wi < 8:
                    r3[dy * 128 + wi * CP: dy * 128 + wi * CP + C_MID,
                       wo * CP: wo * CP + C_MID] = w3[:, :, dy, dx].T

    # fc: rows = (h, w, c<16), cols = class (10 -> 128)          (1024, 128)
    rf = np.zeros((8 * 8 * CP, NP_CLASSES), np.float32)
    for h in range(8):
        for w in range(8):
            for c in range(C_MID):
                rf[h * 128 + w * CP + c, :NUM_CLASSES] = fw[:, c * 64 + h * 8 + w]

    # All bias rows in one small slab (row 0..3 = conv1, conv2, conv3, fc).
    bias = np.zeros((8, 16 * CP), np.float32)
    for wo in range(16):
        bias[0, wo * CP: wo * CP + C_MID] = np.asarray(params["conv1_b"])
    for wo in range(8):
        bias[1, wo * CP: wo * CP + C_MID] = np.asarray(params["conv2_b"])
        bias[2, wo * CP: wo * CP + C_MID] = np.asarray(params["conv3_b"])
    bias[3, :NUM_CLASSES] = np.asarray(params["fc_b"])

    bf16 = lambda a: jnp.asarray(a, jnp.bfloat16)
    return dict(r1=bf16(r1), r2=bf16(r2), r3=bf16(r3), rf=bf16(rf),
                bias=jnp.asarray(bias, jnp.float32))


# ----------------------------------------------------------------------------
# The fused Pallas kernel: one batch tile, whole LeNet forward, 4 MXU matmuls.
# ----------------------------------------------------------------------------
def _lenet_kernel(x_ref, r1_ref, r2_ref, r3_ref, rf_ref, b_ref, out_ref):
    tb = x_ref.shape[0]
    f32, bf16 = jnp.float32, jnp.bfloat16

    def sigmoid(z):  # tanh identity: one EUP op per element
        return 0.5 * jnp.tanh(0.5 * z) + 0.5

    # ---- conv1 + sigmoid: (TB*16, 640) @ (640, 256) ------------------------
    x = x_ref[...]                                                 # (TB, 40, 128) bf16
    im_e = jnp.concatenate([x[:, s:s + 8, :] for s in CONV1_EVEN_STARTS], axis=-1)
    im_o = jnp.concatenate([x[:, s:s + 8, :] for s in CONV1_ODD_STARTS], axis=-1)
    im1 = jnp.concatenate([im_e, im_o], axis=1)                    # (TB, 16, 640)
    y1 = jnp.dot(im1.reshape(tb * 16, 5 * 128), r1_ref[...],
                 preferred_element_type=f32)
    y1 = sigmoid(y1 + b_ref[0:1, :]).astype(bf16).reshape(tb, 16, 256)

    # ---- conv2 + sigmoid: guards [Z, evens, Z, odds], one matmul -----------
    z1 = jnp.zeros((tb, 1, 256), bf16)
    y1g = jnp.concatenate([z1, y1[:, 0:8, :], z1, y1[:, 8:16, :]], axis=1)  # (TB,18,256)
    im2 = jnp.concatenate([y1g[:, s:s + 8, :] for s in CONV2_STARTS], axis=-1)
    y2 = jnp.dot(im2.reshape(tb * 8, 5 * 256), r2_ref[...],
                 preferred_element_type=f32)
    y2 = sigmoid(y2 + b_ref[1:2, :128]).astype(bf16).reshape(tb, 8, 128)

    # ---- conv3 + sigmoid (stride 1): guards [Z,Z, rows, Z,Z] ---------------
    z2 = jnp.zeros((tb, 2, 128), bf16)
    y2g = jnp.concatenate([z2, y2, z2], axis=1)                    # (TB, 12, 128)
    im3 = jnp.concatenate([y2g[:, s:s + 8, :] for s in CONV3_STARTS], axis=-1)
    y3 = jnp.dot(im3.reshape(tb * 8, 5 * 128), r3_ref[...],
                 preferred_element_type=f32)
    y3 = sigmoid(y3 + b_ref[2:3, :128]).astype(bf16).reshape(tb, 8, 128)

    # ---- fc: flatten spatial rows into lanes, one matmul -------------------
    yf = jnp.concatenate([y3[:, h, :] for h in range(8)], axis=-1)  # (TB, 1024)
    logits = jnp.dot(yf, rf_ref[...], preferred_element_type=f32)
    out_ref[...] = logits + b_ref[3:4, :128]


# ----------------------------------------------------------------------------
# Wrapper: lane-dense, residue-ordered input layout + batch-tiled pallas_call.
# ----------------------------------------------------------------------------
def _prep_input(x, batch_tile):
    b = x.shape[0]
    b_pad = ((b + batch_tile - 1) // batch_tile) * batch_tile
    x = jnp.pad(x, ((0, b_pad - b), (0, 0), (0, 0), (0, 0)))
    x = jnp.transpose(x, (0, 2, 3, 1))                              # (B, 32, 32, 3)
    x = jnp.pad(x, ((0, 0), (0, 0), (0, 0), (0, CP_IN - 3)))        # cin 3 -> 4
    x = x.reshape(b_pad, 32, 32 * CP_IN)                            # lanes = (w, cin)
    z = jnp.zeros((b_pad, 1, 32 * CP_IN), x.dtype)
    tail = jnp.zeros((b_pad, H0_STORE - 35, 32 * CP_IN), x.dtype)
    # Residue-mod-4 row order + zero guard rows: every conv1 vertical tap is a
    # contiguous 8-row slice (see CONV1_*_STARTS).
    xg = jnp.concatenate(
        [x[:, 0::4], z, x[:, 1::4], z, x[:, 2::4], z, x[:, 3::4], tail], axis=1)
    return xg.astype(jnp.bfloat16), b_pad


def lenet_forward(consts, x, *, batch_tile=8):
    """x: (B, 3, 32, 32) float32 -> (B, num_classes) float32."""
    b = x.shape[0]
    xg, b_pad = _prep_input(x, batch_tile)
    nb = b_pad // batch_tile

    out = pl.pallas_call(
        _lenet_kernel,
        out_shape=jax.ShapeDtypeStruct((b_pad, NP_CLASSES), jnp.float32),
        grid=(nb,),
        in_specs=[
            pl.BlockSpec((batch_tile, H0_STORE, 32 * CP_IN), lambda i: (i, 0, 0)),
            pl.BlockSpec(consts["r1"].shape, lambda i: (0, 0)),
            pl.BlockSpec(consts["r2"].shape, lambda i: (0, 0)),
            pl.BlockSpec(consts["r3"].shape, lambda i: (0, 0)),
            pl.BlockSpec(consts["rf"].shape, lambda i: (0, 0)),
            pl.BlockSpec(consts["bias"].shape, lambda i: (0, 0)),
        ],
        out_specs=pl.BlockSpec((batch_tile, NP_CLASSES), lambda i: (i, 0)),
        compiler_params=pltpu.CompilerParams(
            dimension_semantics=("parallel",)),
    )(xg, consts["r1"], consts["r2"], consts["r3"], consts["rf"], consts["bias"])
    return out[:b, :NUM_CLASSES]


# ----------------------------------------------------------------------------
# Pure-JAX reference (PyTorch semantics) for the correctness check.
# ----------------------------------------------------------------------------
def _reference_forward(params, x):
    def conv(z, w, bias, stride):
        y = jax.lax.conv_general_dilated(
            z, w, window_strides=(stride, stride),
            padding=[(PAD, PAD), (PAD, PAD)],
            dimension_numbers=("NCHW", "OIHW", "NCHW"))
        return jax.nn.sigmoid(y + bias[None, :, None, None])

    y = conv(x, params["conv1_w"], params["conv1_b"], 2)
    y = conv(y, params["conv2_w"], params["conv2_b"], 2)
    y = conv(y, params["conv3_w"], params["conv3_b"], 1)
    flat = y.reshape(y.shape[0], -1)
    return flat @ params["fc_w"].T + params["fc_b"]


if __name__ == "__main__":
    key = jax.random.PRNGKey(0)
    pkey, xkey = jax.random.split(key)
    params = init_params(pkey, channel=3, hidden=768, num_classes=10)

    # CIFAR-10-shaped input (hidden=768 implies 3x32x32); 2 batch tiles of 8.
    x = jax.random.normal(xkey, (16, 3, 32, 32), jnp.float32)

    consts = prepare_constants(params)
    fwd = jax.jit(functools.partial(lenet_forward, batch_tile=8))
    out = jax.block_until_ready(fwd(consts, x))

    assert out.shape == (16, NUM_CLASSES) and out.dtype == jnp.float32
    ref = np.asarray(_reference_forward(params, x))
    err = float(np.max(np.abs(np.asarray(out) - ref)))
    # bf16 weights/activations on the MXU; sigmoid itself is exact (tanh form).
    assert err < 5e-2, f"max abs err {err}"
    print("KERNEL_OK")
</pallas_src>

<mosaic_0001>
module attributes {stable_mosaic.version = 11 : i64} {
  func.func @_lenet_kernel(%arg0: i32, %arg1: memref<8x40x128xbf16, #tpu.memory_space<vmem>>, %arg2: memref<640x256xbf16, #tpu.memory_space<vmem>>, %arg3: memref<1280x128xbf16, #tpu.memory_space<vmem>>, %arg4: memref<640x128xbf16, #tpu.memory_space<vmem>>, %arg5: memref<1024x128xbf16, #tpu.memory_space<vmem>>, %arg6: memref<8x256xf32, #tpu.memory_space<vmem>>, %arg7: memref<8x128xf32, #tpu.memory_space<vmem>>) attributes {dimension_semantics = [#tpu.dimension_semantics<parallel>], iteration_bounds = array<i64: 2>, scalar_prefetch = 0 : i64, scratch_operands = 0 : i64, tpu.core_type = #tpu.core_type<tc>, window_params = [{transform_indices = @transform_0, window_bounds = array<i64: 8, 40, 128>}, {pipeline_mode = #tpu.pipeline_mode<synchronous>, transform_indices = @transform_1, window_bounds = array<i64: 640, 256>}, {pipeline_mode = #tpu.pipeline_mode<synchronous>, transform_indices = @transform_2, window_bounds = array<i64: 1280, 128>}, {pipeline_mode = #tpu.pipeline_mode<synchronous>, transform_indices = @transform_3, window_bounds = array<i64: 640, 128>}, {pipeline_mode = #tpu.pipeline_mode<synchronous>, transform_indices = @transform_4, window_bounds = array<i64: 1024, 128>}, {pipeline_mode = #tpu.pipeline_mode<synchronous>, transform_indices = @transform_5, window_bounds = array<i64: 8, 256>}, {transform_indices = @transform_6, window_bounds = array<i64: 8, 128>}]} {
    %c0 = arith.constant 0 : index
    %c0_0 = arith.constant 0 : index
    %c0_1 = arith.constant 0 : index
    %0 = vector.load %arg1[%c0, %c0_0, %c0_1] : memref<8x40x128xbf16, #tpu.memory_space<vmem>>, vector<8x40x128xbf16>
    %1 = vector.extract_strided_slice %0 {offsets = [0, 17, 0], sizes = [8, 8, 128], strides = [1, 1, 1]} : vector<8x40x128xbf16> to vector<8x8x128xbf16>
    %2 = vector.extract_strided_slice %0 {offsets = [0, 26, 0], sizes = [8, 8, 128], strides = [1, 1, 1]} : vector<8x40x128xbf16> to vector<8x8x128xbf16>
    %3 = vector.extract_strided_slice %0 {offsets = [0, 0, 0], sizes = [8, 8, 128], strides = [1, 1, 1]} : vector<8x40x128xbf16> to vector<8x8x128xbf16>
    %4 = vector.extract_strided_slice %0 {offsets = [0, 9, 0], sizes = [8, 8, 128], strides = [1, 1, 1]} : vector<8x40x128xbf16> to vector<8x8x128xbf16>
    %5 = vector.extract_strided_slice %0 {offsets = [0, 18, 0], sizes = [8, 8, 128], strides = [1, 1, 1]} : vector<8x40x128xbf16> to vector<8x8x128xbf16>
    %6 = tpu.concatenate %1, %2, %3, %4, %5 in 2 : vector<8x8x128xbf16>, vector<8x8x128xbf16>, vector<8x8x128xbf16>, vector<8x8x128xbf16>, vector<8x8x128xbf16> -> vector<8x8x640xbf16>
    %7 = vector.extract_strided_slice %0 {offsets = [0, 0, 0], sizes = [8, 8, 128], strides = [1, 1, 1]} : vector<8x40x128xbf16> to vector<8x8x128xbf16>
    %8 = vector.extract_strided_slice %0 {offsets = [0, 9, 0], sizes = [8, 8, 128], strides = [1, 1, 1]} : vector<8x40x128xbf16> to vector<8x8x128xbf16>
    %9 = vector.extract_strided_slice %0 {offsets = [0, 18, 0], sizes = [8, 8, 128], strides = [1, 1, 1]} : vector<8x40x128xbf16> to vector<8x8x128xbf16>
    %10 = vector.extract_strided_slice %0 {offsets = [0, 27, 0], sizes = [8, 8, 128], strides = [1, 1, 1]} : vector<8x40x128xbf16> to vector<8x8x128xbf16>
    %11 = vector.extract_strided_slice %0 {offsets = [0, 1, 0], sizes = [8, 8, 128], strides = [1, 1, 1]} : vector<8x40x128xbf16> to vector<8x8x128xbf16>
    %12 = tpu.concatenate %7, %8, %9, %10, %11 in 2 : vector<8x8x128xbf16>, vector<8x8x128xbf16>, vector<8x8x128xbf16>, vector<8x8x128xbf16>, vector<8x8x128xbf16> -> vector<8x8x640xbf16>
    %13 = tpu.concatenate %6, %12 in 1 : vector<8x8x640xbf16>, vector<8x8x640xbf16> -> vector<8x16x640xbf16>
    %14 = vector.shape_cast %13 : vector<8x16x640xbf16> to vector<128x640xbf16>
    %c0_2 = arith.constant 0 : index
    %c0_3 = arith.constant 0 : index
    %15 = vector.load %arg2[%c0_2, %c0_3] : memref<640x256xbf16, #tpu.memory_space<vmem>>, vector<640x256xbf16>
    %cst = arith.constant dense<0.000000e+00> : vector<128x256xf32>
    %16 = tpu.matmul %14, %15, %cst {dimension_numbers = #tpu.dot_dimension_numbers<[1], [0], [0], [1], [0, 0, 1, 1], [], []>} : vector<128x640xbf16>, vector<640x256xbf16>, vector<128x256xf32> -> vector<128x256xf32>
    %c0_4 = arith.constant 0 : index
    %c0_5 = arith.constant 0 : index
    %17 = vector.load %arg6[%c0_4, %c0_5] : memref<8x256xf32, #tpu.memory_space<vmem>>, vector<1x256xf32>
    %18 = vector.broadcast %17 : vector<1x256xf32> to vector<128x256xf32>
    %19 = arith.addf %16, %18 : vector<128x256xf32>
    %cst_6 = arith.constant 5.000000e-01 : f32
    %20 = vector.broadcast %cst_6 : f32 to vector<128x256xf32>
    %21 = arith.mulf %20, %19 : vector<128x256xf32>
    %22 = math.tanh %21 : vector<128x256xf32>
    %cst_7 = arith.constant 5.000000e-01 : f32
    %23 = vector.broadcast %cst_7 : f32 to vector<128x256xf32>
    %24 = arith.mulf %23, %22 : vector<128x256xf32>
    %cst_8 = arith.constant 5.000000e-01 : f32
    %25 = vector.broadcast %cst_8 : f32 to vector<128x256xf32>
    %26 = arith.addf %24, %25 : vector<128x256xf32>
    %27 = arith.truncf %26 : vector<128x256xf32> to vector<128x256xbf16>
    %28 = vector.shape_cast %27 : vector<128x256xbf16> to vector<8x16x256xbf16>
    %cst_9 = arith.constant 0.000000e+00 : bf16
    %29 = vector.broadcast %cst_9 : bf16 to vector<8x1x256xbf16>
    %30 = vector.extract_strided_slice %28 {offsets = [0, 0, 0], sizes = [8, 8, 256], strides = [1, 1, 1]} : vector<8x16x256xbf16> to vector<8x8x256xbf16>
    %31 = vector.extract_strided_slice %28 {offsets = [0, 8, 0], sizes = [8, 8, 256], strides = [1, 1, 1]} : vector<8x16x256xbf16> to vector<8x8x256xbf16>
    %32 = tpu.concatenate %29, %30, %29, %31 in 1 : vector<8x1x256xbf16>, vector<8x8x256xbf16>, vector<8x1x256xbf16>, vector<8x8x256xbf16> -> vector<8x18x256xbf16>
    %33 = vector.extract_strided_slice %32 {offsets = [0, 0, 0], sizes = [8, 8, 256], strides = [1, 1, 1]} : vector<8x18x256xbf16> to vector<8x8x256xbf16>
    %34 = vector.extract_strided_slice %32 {offsets = [0, 9, 0], sizes = [8, 8, 256], strides = [1, 1, 1]} : vector<8x18x256xbf16> to vector<8x8x256xbf16>
    %35 = vector.extract_strided_slice %32 {offsets = [0, 1, 0], sizes = [8, 8, 256], strides = [1, 1, 1]} : vector<8x18x256xbf16> to vector<8x8x256xbf16>
    %36 = vector.extract_strided_slice %32 {offsets = [0, 10, 0], sizes = [8, 8, 256], strides = [1, 1, 1]} : vector<8x18x256xbf16> to vector<8x8x256xbf16>
    %37 = vector.extract_strided_slice %32 {offsets = [0, 2, 0], sizes = [8, 8, 256], strides = [1, 1, 1]} : vector<8x18x256xbf16> to vector<8x8x256xbf16>
    %38 = tpu.concatenate %33, %34, %35, %36, %37 in 2 : vector<8x8x256xbf16>, vector<8x8x256xbf16>, vector<8x8x256xbf16>, vector<8x8x256xbf16>, vector<8x8x256xbf16> -> vector<8x8x1280xbf16>
    %39 = vector.shape_cast %38 : vector<8x8x1280xbf16> to vector<64x1280xbf16>
    %c0_10 = arith.constant 0 : index
    %c0_11 = arith.constant 0 : index
    %40 = vector.load %arg3[%c0_10, %c0_11] : memref<1280x128xbf16, #tpu.memory_space<vmem>>, vector<1280x128xbf16>
    %cst_12 = arith.constant dense<0.000000e+00> : vector<64x128xf32>
    %41 = tpu.matmul %39, %40, %cst_12 {dimension_numbers = #tpu.dot_dimension_numbers<[1], [0], [0], [1], [0, 0, 1, 1], [], []>} : vector<64x1280xbf16>, vector<1280x128xbf16>, vector<64x128xf32> -> vector<64x128xf32>
    %c1 = arith.constant 1 : index
    %c0_13 = arith.constant 0 : index
    %42 = vector.load %arg6[%c1, %c0_13] : memref<8x256xf32, #tpu.memory_space<vmem>>, vector<1x128xf32>
    %43 = vector.broadcast %42 : vector<1x128xf32> to vector<64x128xf32>
    %44 = arith.addf %41, %43 : vector<64x128xf32>
    %cst_14 = arith.constant 5.000000e-01 : f32
    %45 = vector.broadcast %cst_14 : f32 to vector<64x128xf32>
    %46 = arith.mulf %45, %44 : vector<64x128xf32>
    %47 = math.tanh %46 : vector<64x128xf32>
    %cst_15 = arith.constant 5.000000e-01 : f32
    %48 = vector.broadcast %cst_15 : f32 to vector<64x128xf32>
    %49 = arith.mulf %48, %47 : vector<64x128xf32>
    %cst_16 = arith.constant 5.000000e-01 : f32
    %50 = vector.broadcast %cst_16 : f32 to vector<64x128xf32>
    %51 = arith.addf %49, %50 : vector<64x128xf32>
    %52 = arith.truncf %51 : vector<64x128xf32> to vector<64x128xbf16>
    %53 = vector.shape_cast %52 : vector<64x128xbf16> to vector<8x8x128xbf16>
    %cst_17 = arith.constant 0.000000e+00 : bf16
    %54 = vector.broadcast %cst_17 : bf16 to vector<8x2x128xbf16>
    %55 = tpu.concatenate %54, %53, %54 in 1 : vector<8x2x128xbf16>, vector<8x8x128xbf16>, vector<8x2x128xbf16> -> vector<8x12x128xbf16>
    %56 = vector.extract_strided_slice %55 {offsets = [0, 0, 0], sizes = [8, 8, 128], strides = [1, 1, 1]} : vector<8x12x128xbf16> to vector<8x8x128xbf16>
    %57 = vector.extract_strided_slice %55 {offsets = [0, 1, 0], sizes = [8, 8, 128], strides = [1, 1, 1]} : vector<8x12x128xbf16> to vector<8x8x128xbf16>
    %58 = vector.extract_strided_slice %55 {offsets = [0, 2, 0], sizes = [8, 8, 128], strides = [1, 1, 1]} : vector<8x12x128xbf16> to vector<8x8x128xbf16>
    %59 = vector.extract_strided_slice %55 {offsets = [0, 3, 0], sizes = [8, 8, 128], strides = [1, 1, 1]} : vector<8x12x128xbf16> to vector<8x8x128xbf16>
    %60 = vector.extract_strided_slice %55 {offsets = [0, 4, 0], sizes = [8, 8, 128], strides = [1, 1, 1]} : vector<8x12x128xbf16> to vector<8x8x128xbf16>
    %61 = tpu.concatenate %56, %57, %58, %59, %60 in 2 : vector<8x8x128xbf16>, vector<8x8x128xbf16>, vector<8x8x128xbf16>, vector<8x8x128xbf16>, vector<8x8x128xbf16> -> vector<8x8x640xbf16>
    %62 = vector.shape_cast %61 : vector<8x8x640xbf16> to vector<64x640xbf16>
    %c0_18 = arith.constant 0 : index
    %c0_19 = arith.constant 0 : index
    %63 = vector.load %arg4[%c0_18, %c0_19] : memref<640x128xbf16, #tpu.memory_space<vmem>>, vector<640x128xbf16>
    %cst_20 = arith.constant dense<0.000000e+00> : vector<64x128xf32>
    %64 = tpu.matmul %62, %63, %cst_20 {dimension_numbers = #tpu.dot_dimension_numbers<[1], [0], [0], [1], [0, 0, 1, 1], [], []>} : vector<64x640xbf16>, vector<640x128xbf16>, vector<64x128xf32> -> vector<64x128xf32>
    %c2 = arith.constant 2 : index
    %c0_21 = arith.constant 0 : index
    %65 = vector.load %arg6[%c2, %c0_21] : memref<8x256xf32, #tpu.memory_space<vmem>>, vector<1x128xf32>
    %66 = vector.broadcast %65 : vector<1x128xf32> to vector<64x128xf32>
    %67 = arith.addf %64, %66 : vector<64x128xf32>
    %cst_22 = arith.constant 5.000000e-01 : f32
    %68 = vector.broadcast %cst_22 : f32 to vector<64x128xf32>
    %69 = arith.mulf %68, %67 : vector<64x128xf32>
    %70 = math.tanh %69 : vector<64x128xf32>
    %cst_23 = arith.constant 5.000000e-01 : f32
    %71 = vector.broadcast %cst_23 : f32 to vector<64x128xf32>
    %72 = arith.mulf %71, %70 : vector<64x128xf32>
    %cst_24 = arith.constant 5.000000e-01 : f32
    %73 = vector.broadcast %cst_24 : f32 to vector<64x128xf32>
    %74 = arith.addf %72, %73 : vector<64x128xf32>
    %75 = arith.truncf %74 : vector<64x128xf32> to vector<64x128xbf16>
    %76 = vector.shape_cast %75 : vector<64x128xbf16> to vector<8x8x128xbf16>
    %77 = vector.extract_strided_slice %76 {offsets = [0, 0, 0], sizes = [8, 1, 128], strides = [1, 1, 1]} : vector<8x8x128xbf16> to vector<8x1x128xbf16>
    %78 = vector.shape_cast %77 : vector<8x1x128xbf16> to vector<8x128xbf16>
    %79 = vector.extract_strided_slice %76 {offsets = [0, 1, 0], sizes = [8, 1, 128], strides = [1, 1, 1]} : vector<8x8x128xbf16> to vector<8x1x128xbf16>
    %80 = vector.shape_cast %79 : vector<8x1x128xbf16> to vector<8x128xbf16>
    %81 = vector.extract_strided_slice %76 {offsets = [0, 2, 0], sizes = [8, 1, 128], strides = [1, 1, 1]} : vector<8x8x128xbf16> to vector<8x1x128xbf16>
    %82 = vector.shape_cast %81 : vector<8x1x128xbf16> to vector<8x128xbf16>
    %83 = vector.extract_strided_slice %76 {offsets = [0, 3, 0], sizes = [8, 1, 128], strides = [1, 1, 1]} : vector<8x8x128xbf16> to vector<8x1x128xbf16>
    %84 = vector.shape_cast %83 : vector<8x1x128xbf16> to vector<8x128xbf16>
    %85 = vector.extract_strided_slice %76 {offsets = [0, 4, 0], sizes = [8, 1, 128], strides = [1, 1, 1]} : vector<8x8x128xbf16> to vector<8x1x128xbf16>
    %86 = vector.shape_cast %85 : vector<8x1x128xbf16> to vector<8x128xbf16>
    %87 = vector.extract_strided_slice %76 {offsets = [0, 5, 0], sizes = [8, 1, 128], strides = [1, 1, 1]} : vector<8x8x128xbf16> to vector<8x1x128xbf16>
    %88 = vector.shape_cast %87 : vector<8x1x128xbf16> to vector<8x128xbf16>
    %89 = vector.extract_strided_slice %76 {offsets = [0, 6, 0], sizes = [8, 1, 128], strides = [1, 1, 1]} : vector<8x8x128xbf16> to vector<8x1x128xbf16>
    %90 = vector.shape_cast %89 : vector<8x1x128xbf16> to vector<8x128xbf16>
    %91 = vector.extract_strided_slice %76 {offsets = [0, 7, 0], sizes = [8, 1, 128], strides = [1, 1, 1]} : vector<8x8x128xbf16> to vector<8x1x128xbf16>
    %92 = vector.shape_cast %91 : vector<8x1x128xbf16> to vector<8x128xbf16>
    %93 = tpu.concatenate %78, %80, %82, %84, %86, %88, %90, %92 in 1 : vector<8x128xbf16>, vector<8x128xbf16>, vector<8x128xbf16>, vector<8x128xbf16>, vector<8x128xbf16>, vector<8x128xbf16>, vector<8x128xbf16>, vector<8x128xbf16> -> vector<8x1024xbf16>
    %c0_25 = arith.constant 0 : index
    %c0_26 = arith.constant 0 : index
    %94 = vector.load %arg5[%c0_25, %c0_26] : memref<1024x128xbf16, #tpu.memory_space<vmem>>, vector<1024x128xbf16>
    %cst_27 = arith.constant dense<0.000000e+00> : vector<8x128xf32>
    %95 = tpu.matmul %93, %94, %cst_27 {dimension_numbers = #tpu.dot_dimension_numbers<[1], [0], [0], [1], [0, 0, 1, 1], [], []>} : vector<8x1024xbf16>, vector<1024x128xbf16>, vector<8x128xf32> -> vector<8x128xf32>
    %c3 = arith.constant 3 : index
    %c0_28 = arith.constant 0 : index
    %96 = vector.load %arg6[%c3, %c0_28] : memref<8x256xf32, #tpu.memory_space<vmem>>, vector<1x128xf32>
    %97 = vector.broadcast %96 : vector<1x128xf32> to vector<8x128xf32>
    %98 = arith.addf %95, %97 : vector<8x128xf32>
    %c0_29 = arith.constant 0 : index
    %c0_30 = arith.constant 0 : index
    %99 = vector.load %arg7[%c0_29, %c0_30] : memref<8x128xf32, #tpu.memory_space<vmem>>, vector<8x128xf32>
    tpu.vector_store %arg7[%c0_29, %c0_30], %98 {strides = array<i32>} : memref<8x128xf32, #tpu.memory_space<vmem>>, vector<8x128xf32>,
    return
  }
  func.func @transform_0(%arg0: i32) -> (i32, i32, i32) {
    %c0_i32 = arith.constant 0 : i32
    %c0_i32_0 = arith.constant 0 : i32
    %c0_i32_1 = arith.constant 0 : i32
    return %arg0, %c0_i32, %c0_i32_0 : i32, i32, i32
  }
  func.func @transform_1(%arg0: i32) -> (i32, i32) {
    %c0_i32 = arith.constant 0 : i32
    %c0_i32_0 = arith.constant 0 : i32
    %c0_i32_1 = arith.constant 0 : i32
    return %c0_i32, %c0_i32_0 : i32, i32
  }
  func.func @transform_2(%arg0: i32) -> (i32, i32) {
    %c0_i32 = arith.constant 0 : i32
    %c0_i32_0 = arith.constant 0 : i32
    %c0_i32_1 = arith.constant 0 : i32
    return %c0_i32, %c0_i32_0 : i32, i32
  }
  func.func @transform_3(%arg0: i32) -> (i32, i32) {
    %c0_i32 = arith.constant 0 : i32
    %c0_i32_0 = arith.constant 0 : i32
    %c0_i32_1 = arith.constant 0 : i32
    return %c0_i32, %c0_i32_0 : i32, i32
  }
  func.func @transform_4(%arg0: i32) -> (i32, i32) {
    %c0_i32 = arith.constant 0 : i32
    %c0_i32_0 = arith.constant 0 : i32
    %c0_i32_1 = arith.constant 0 : i32
    return %c0_i32, %c0_i32_0 : i32, i32
  }
  func.func @transform_5(%arg0: i32) -> (i32, i32) {
    %c0_i32 = arith.constant 0 : i32
    %c0_i32_0 = arith.constant 0 : i32
    %c0_i32_1 = arith.constant 0 : i32
    return %c0_i32, %c0_i32_0 : i32, i32
  }
  func.func @transform_6(%arg0: i32) -> (i32, i32) {
    %c0_i32 = arith.constant 0 : i32
    %c0_i32_0 = arith.constant 0 : i32
    return %arg0, %c0_i32 : i32, i32
  }
}

</mosaic_0001>

<bundles_post_ra>
// kernel: lenet_forward.1
= control target key start
LH: loop header
LB: loop body
LE: loop exit
PB: predicated region body
PF: predicated region fallthrough
CT: control target
= control target key end

     0   :  { %11 = vsyncpa [#allocation3], 0  ;;  %s9390_s0 = inlined_call_operand.vmem [shape: bf16[16,40,128], index: 0, kind: input, shape index: {}]   ;;  %s9391_s1 = inlined_call_operand.vmem [shape: bf16[640,256], index: 1, kind: input, shape index: {}]   ;;  %s9392_s2 = inlined_call_operand.vmem [shape: bf16[1280,128], index: 2, kind: input, shape index: {}]   ;;  %s9393_s3 = inlined_call_operand.vmem [shape: bf16[640,128], index: 3, kind: input, shape index: {}]   ;;  %s9394_s4 = inlined_call_operand.vmem [shape: bf16[1024,128], index: 4, kind: input, shape index: {}]   ;;  %s9395_s5 = inlined_call_operand.vmem [shape: f32[8,256], index: 5, kind: input, shape index: {}]   ;;  %s9396_s6 = inlined_call_operand.hbm [shape: f32[16,128], index: 6, kind: output, shape index: {}]  }
   0x1   :  { %13 = vsyncpa [#allocation3 + $0x1], 0  ;;  %s6952_s21 = smov 0   ;;  %s6954_s22 = smov 0  }
   0x2   :  { %s6956_s23 = smov 0   ;;  %s6958_s24 = smov 0  }
   0x3 LB: > { %s6973_s25 = sadd.s32 4294967295, %s6913_s24   ;;  %s5455_s26 = sadd.s32 4294967294, %s6913_s24   ;;  %s6913_s24 = sphi %s6958_s24, %s9561_s24   ;;  %s6909_s23 = sphi %s6956_s23, %s9560_s23   ;;  %s6905_s22 = sphi %s6954_s22, %s9559_s22   ;;  %s6901_s21 = sphi %s6952_s21, %s9558_s21  }
   0x4   : > { %s6977_s27 = sadd.s32 1, %s6913_s24   ;;  %s157_s28 = sadd.s32 1, %s6909_s23 }
   0x5   : > { %s154_s29 = ssub.s32 %s6913_s24, %s6977_s27  ;;  %p167_p0 = scmp.ne.s32.totalorder %s6909_s23, %s6905_s22 }
   0x6   : > { %p155_p1 = scmp.eq.s32.totalorder %s154_s29, 0  ;;  %p168_p2 = scmp.eq.s32.totalorder %s6973_s25, 1 }
   0x7   : > { %p173_p3 = scmp.ne.s32.totalorder %s6905_s22, %s6901_s21  ;;  %p174_p4 = scmp.eq.s32.totalorder %s5455_s26, 1 }
   0x8   : > { %s6988_s30 = scalar_select %p155_p1, %s6909_s23, %s157_s28  }
   0x9   : > { %p6990_p5 = por %p168_p2, %p167_p0  ;;  %p6994_p6 = por %p174_p4, %p173_p3 }
   0xa   : > { %p5458_p7 = scmp.ge.s32.totalorder %s6913_s24, 1  ;;  %p217_p8 = scmp.lt.s32.totalorder %s6913_s24, 3 }
   0xc   : > { %p218_p9 = pnand %p5458_p7, %p217_p8 }
   0xe   : > { %221 = sbr.rel (%p218_p9) target bundleno = 1456 (0x5b0), region = 44 }
  0x15   : > { %v6411_v0 = vld [vmem:[%s9391_s1 + $0x4] ss:$8 sps:$4 sm:$0xff]   ;;  %v6413_v1 = vld [vmem:[%s9391_s1] ss:$8 sps:$4 sm:$0xff]   ;;  %v6414_v2 = vld [vmem:[%s9391_s1 + $0x14] ss:$8 sps:$4 sm:$0xff]  }
  0x16   : > { %1581 = vmatprep.subr.bf16.mxu0 %v6411_v0  ;;  %v6416_v3 = vld [vmem:[%s9391_s1 + $0x10] ss:$8 sps:$4 sm:$0xff]   ;;  %v6417_v4 = vld [vmem:[%s9391_s1 + $0x24] ss:$8 sps:$4 sm:$0xff]   ;;  %s5460_s19 = sshll.u32 %s6973_s25, 3  ;;  %vm936_vm0 = vcmask 1043456  }
  0x17   : > { %1582 = vmatpush1.bf16.msra.mxu0 %v6413_v1  ;;  %v6419_v5 = vld [vmem:[%s9391_s1 + $0x20] ss:$8 sps:$4 sm:$0xff]   ;;  %p249_p10 = scmp.lt.s32.totalorder %s5460_s19, 15  ;;  %v6420_v6 = vld [vmem:[%s9391_s1 + $0x34] ss:$8 sps:$4 sm:$0xff]   ;;  %vm2224_vm1 = vcmask 1040384  }
  0x18   : > { %1583 = vmatprep.subr.bf16.mxu0 %v6414_v2  ;;  %v6422_v7 = vld [vmem:[%s9391_s1 + $0x30] ss:$8 sps:$4 sm:$0xff]   ;;  %v6423_v8 = vld [vmem:[%s9391_s1 + $0x44] ss:$8 sps:$4 sm:$0xff]   ;;  %v6425_v9 = vld [vmem:[%s9391_s1 + $0x40] ss:$8 sps:$4 sm:$0xff]  }
  0x19   : > { %s9563_s19 = smov (!%p249_p10, %s5460_s19), 15  ;;  %v6426_v10 = vld [vmem:[%s9391_s1 + $0x54] ss:$8 sps:$4 sm:$0xff]   ;;  %v6428_v11 = vld [vmem:[%s9391_s1 + $0x50] ss:$8 sps:$4 sm:$0xff]   ;;  %vm2243_vm4 = vcmask 1044480  }
  0x1a   : > { %s6370_s15 = smul.u32 20, %s9563_s19  ;;  %v6429_v12 = vld [vmem:[%s9391_s1 + $0x64] ss:$8 sps:$4 sm:$0xff]   ;;  %v6431_v19 = vld [vmem:[%s9391_s1 + $0x60] ss:$8 sps:$4 sm:$0xff]   ;;  %vm2536_vm8 = vcmask 1042432  }
  0x1b   : > { %1584 = vmatpush1.bf16.msra.mxu0 %v6416_v3  ;;  %v6432_v23 = vld [vmem:[%s9391_s1 + $0x74] ss:$8 sps:$4 sm:$0xff]   ;;  %v6434_v28 = vld [vmem:[%s9391_s1 + $0x70] ss:$8 sps:$4 sm:$0xff]   ;;  %v6435_v31 = vld [vmem:[%s9391_s1 + $0x84] ss:$8 sps:$4 sm:$0xff]  }
  0x1c   : > { %1585 = vmatprep.subr.bf16.mxu0 %v6417_v4  ;;  %s7040_s29 = scalar_lea.vmem %s9390_s0, %s6370_s15  ;;  %v6437_v44 = vld [vmem:[%s9391_s1 + $0x80] ss:$8 sps:$4 sm:$0xff]   ;;  %v6438_v48 = vld [vmem:[%s9391_s1 + $0x94] ss:$8 sps:$4 sm:$0xff]   ;;  %v6440_v53 = vld [vmem:[%s9391_s1 + $0x90] ss:$8 sps:$4 sm:$0xff]  }
  0x1d   : > { %v257_v13 = vld [vmem:[%s7040_s29 + $0x4] sm:$0xf]  ;;  %v258_v14 = vld [vmem:[%s7040_s29 + $0x8] sm:$0xf]  ;;  %v259_v15 = vld [vmem:[%s7040_s29 + $0xc] sm:$0xf] }
  0x1e   : > { %v260_v16 = vld [vmem:[%s7040_s29 + $0x10] sm:$0xf]  ;;  %v5486_v17 = vcombine.low %v257_v13, %v258_v14  ;;  %v7050_v18 = vld [vmem:[%s7040_s29] sm:$0xf]  ;;  %v7055_v20 = vcombine.low %v258_v14, %v259_v15  ;;  %v7078_v34 = vld [vmem:[%s7040_s29 + $0x18] sm:$0xf] }
  0x1f   : > { %1586 = vmatpush1.bf16.msra.mxu0 %v6419_v5  ;;  %v7057_v21 = vcombine.low %v259_v15, %v260_v16  ;;  %v7060_v22 = vcombine.low %v7050_v18, %v257_v13  ;;  %9460 = vst [vmem:[#allocation5_spill] sm:$0xff] %v7078_v34  ;;  %v7082_v35 = vcombine.low %v7050_v18, %v7050_v18  ;;  %v263_v37 = vld [vmem:[%s7040_s29 + $0x1c] sm:$0xf]  ;;  %v264_v38 = vld [vmem:[%s7040_s29 + $0x20] sm:$0xf]  ;;  %v896_v51 = vrot.slane %v7050_v18, 4 }
  0x20   : > { %1587 = vmatprep.subr.bf16.mxu0 %v6420_v6  ;;  %v579_v24 = vshll.u32 %v5486_v17, 16  ;;  %v577_v27 = vshrl.u32 %v5486_v17, 16  ;;  %v523_v30 = vshll.u32 %v7055_v20, 16  ;;  %v521_v33 = vshrl.u32 %v7055_v20, 16  ;;  %v265_v41 = vld [vmem:[%s7040_s29 + $0x24] sm:$0xf] }
  0x21   : > { %v9406_v25 = vshrl.u32 %v7057_v21, 16  ;;  %v9405_v26 = vshll.u32 %v7057_v21, 16  ;;  %v5487_v42 = vcombine.low %v7078_v34, %v263_v37  ;;  %v7092_v43 = vcombine.low %v264_v38, %v265_v41  ;;  %v7113_v58 = vld [vmem:[%s7040_s29 + $0x2c] sm:$0xf]  ;;  %v268_v62 = vld [vmem:[%s7040_s29 + $0x30] sm:$0xf] }
  0x22   : > { %v581_v29 = vrot.slane %v579_v24, 1  ;;  %v525_v36 = vrot.slane %v523_v30, 1  ;;  %v441_v49 = vshrl.u32 %v7082_v35, 16  ;;  %v7104_v52 = vcombine.low %v263_v37, %v264_v38  ;;  %9462 = vst [vmem:[#allocation7_spill] sm:$0xff] %v7113_v58  ;;  %v269_v1 = vld [vmem:[%s7040_s29 + $0x34] sm:$0xf] }
  0x23   : > { %1588 = vmatpush1.bf16.msra.mxu0 %v6422_v7  ;;  %v365_v32 = vrot.slane %v9405_v26, 1  ;;  %v586_v47 = vshll.u32 %v5487_v42, 16  ;;  %v9404_v56 = vshrl.u32 %v7092_v43, 16  ;;  %v9402_v57 = vshll.u32 %v7092_v43, 16  ;;  %v270_v2 = vld [vmem:[%s7040_s29 + $0x38] sm:$0xf] }
  0x24   : > { %1589 = vmatprep.subr.bf16.mxu0 %v6423_v8  ;;  %v7088_v40 = vor.u32 %v581_v29, %v577_v27  ;;  %v7101_v50 = vor.u32 %v525_v36, %v521_v33  ;;  %v584_v60 = vshrl.u32 %v5487_v42, 16  ;;  %v7122_v3 = vcombine.low %v7113_v58, %v268_v62  ;;  %v6441_v4 = vld [vmem:[%s9391_s1 + $0xa4] ss:$8 sps:$4 sm:$0xff]   ;;  %v6444_v14 = vld [vmem:[%s9391_s1 + $0xb4] ss:$8 sps:$4 sm:$0xff]   ;;  %s245_s13 = sand.u32 1, %s6905_s22  }
  0x25   : > { %v366_v39 = vor.u32 %v365_v32, %v9406_v25  ;;  %v588_v61 = vrot.slane %v586_v47, 1  ;;  %v372_v0 = vrot.slane %v9402_v57, 1  ;;  %v444_v5 = vshll.u32 %v7082_v35, 16  ;;  %v7147_v17 = vld [vmem:[%s7040_s29 + $0x14] sm:$0xf]  ;;  %s5459_s14 = sshll.u32 %s245_s13, 3 }
  0x26   : > { %9461 = vst [vmem:[#allocation6_spill] sm:$0xff] %v7101_v50  ;;  %v897_v55 = vrot.slane %v7088_v40, 4  ;;  %v745_v59 = vshll.u32 %v7101_v50, 16  ;;  %v7129_v7 = vcombine.low %v269_v1, %v270_v2  ;;  %v7131_v8 = vcombine.low %v268_v62, %v269_v1  ;;  %9463 = vst [vmem:[#allocation8_spill] sm:$0xff] %v7147_v17  ;;  %v7156_v29 = vld [vmem:[%s7040_s29 + $0x40] sm:$0xf] }
  0x27   : > { %1590 = vmatpush1.bf16.msra.mxu0 %v6425_v9  ;;  %v729_v45 = vshrl.u32 %v366_v39, 16  ;;  %v731_v46 = vshll.u32 %v366_v39, 16  ;;  %v6443_v9 = vld [vmem:[%s9391_s1 + $0xa0] ss:$8 sps:$4 sm:$0xff]   ;;  %v530_v13 = vshll.u32 %v7104_v52, 16  ;;  %v7144_v16 = vor.u32 %v588_v61, %v584_v60  ;;  %9465 = vst [vmem:[#allocation10_spill] sm:$0xff] %v7156_v29 }
  0x28   : > { %1591 = vmatprep.subr.bf16.mxu0 %v6426_v10  ;;  %v7151_v24 = vrot.slane %v745_v59, 1  ;;  %v528_v27 = vshrl.u32 %v7104_v52, 16  ;;  %v537_v32 = vshll.u32 %v7131_v8, 16  ;;  %v273_v33 = vld [vmem:[%s7040_s29 + $0x44] sm:$0xf]  ;;  %v901_v37 = vrot.slane %v7147_v17, 4 }
  0x29   : > { %v733_v54 = vrot.slane %v731_v46, 1  ;;  %v6446_v35 = vld [vmem:[%s9391_s1 + $0xb0] ss:$8 sps:$4 sm:$0xff]   ;;  %v532_v36 = vrot.slane %v530_v13, 1  ;;  %v274_v38 = vld [vmem:[%s7040_s29 + $0x48] sm:$0xf]  ;;  %v5489_v41 = vcombine.low %v7156_v29, %v273_v33 }
  0x2a   : > { %9464 = vst [vmem:[#allocation9_spill] sm:$0xff] %v7151_v24  ;;  %v275_v39 = vld [vmem:[%s7040_s29 + $0x4c] sm:$0xf]  ;;  %v591_v46 = vshrl.u32 %v7122_v3, 16  ;;  %v539_v61 = vrot.slane %v537_v32, 1  ;;  %vm4574_vm9 = vcmask 1041409  }
  0x2b   : > { %1592 = vmatpush1.bf16.msra.mxu0 %v6428_v11  ;;  %v734_v63 = vor.u32 %v733_v54, %v729_v45  ;;  %v443_v11 = vrot.slane %v441_v49, 7  ;;  %v6447_v42 = vld [vmem:[%s9391_s1 + $0xc4] ss:$8 sps:$4 sm:$0xff]   ;;  %v7178_v47 = vcombine.low %v274_v38, %v275_v39  ;;  %v7181_v49 = vld [vmem:[%s7040_s29 + $0x28] sm:$0xf]  ;;  %v600_v54 = vshll.u32 %v5489_v41, 16 }
  0x2c   : > { %1593 = vmatprep.subr.bf16.mxu0 %v6429_v12  ;;  %v373_v12 = vor.u32 %v372_v0, %v9404_v56  ;;  %9466 = vst [vmem:[#allocation11_spill] sm:$0xff] %v7181_v49  ;;  %v598_v62 = vshrl.u32 %v5489_v41, 16  ;;  %v279_v13 = vld [vmem:[%s7040_s29 + $0x5c] sm:$0xf]  ;;  %v7213_v18 = vcombine.low %v7181_v49, %v7181_v49  ;;  %v6455_v15 = vld [vmem:[%s9391_s1 + $0xe0] ss:$8 sps:$4 sm:$0xff]  }
  0x2d   : > { %v942_v10 = vsel %vm936_vm0, %v734_v63, %v897_v55  ;;  %v7184_v55 = vcombine.low %v273_v33, %v274_v38  ;;  %v6449_v63 = vld [vmem:[%s9391_s1 + $0xc0] ss:$8 sps:$4 sm:$0xff]   ;;  %v9399_v1 = vshrl.u32 %v7178_v47, 16  ;;  %v9398_v2 = vshll.u32 %v7178_v47, 16  ;;  %v7292_v57 = vld [vmem:[%s7040_s29 + $0x50] sm:$0xf] }
  0x2e   : > { %1613 = vmatprep.mubr.bf16.mxu0 %v942_v10  ;;  %v752_v30 = vshll.u32 %v373_v12, 16  ;;  %v7203_v10 = vld [vmem:[%s7040_s29 + $0x54] sm:$0xf]  ;;  %9473 = vst [vmem:[#allocation18_spill] sm:$0xff] %v7292_v57  ;;  %v916_v26 = vrot.slane %v7292_v57, 4  ;;  %vm4577_vm10 = vcmask 1042434  }
  0x2f   : > { %1594 = vmatpush1.bf16.msra.mxu0 %v6431_v19  ;;  %v9401_v19 = vshrl.u32 %v7129_v7, 16  ;;  %9467 = vst [vmem:[#allocation12_spill] sm:$0xff] %v7203_v10  ;;  %v288_v25 = vld [vmem:[%s7040_s29 + $0x80] sm:$0xf]  ;;  %v294_v58 = vld [vmem:[%s7040_s29 + $0x98] sm:$0xf] }
  0x30   : > { %1595 = vmatprep.subr.bf16.mxu0 %v6432_v23  ;;  %v9400_v23 = vshll.u32 %v7129_v7, 16  ;;  %v754_v59 = vrot.slane %v752_v30, 1  ;;  %v544_v30 = vshll.u32 %v7184_v55, 16  ;;  %v295_v24 = vld [vmem:[%s7040_s29 + $0x9c] sm:$0xf]  ;;  %vm4580_vm11 = vcmask 1043459  }
  0x31   : > { %vm2225_vm2 = vsmask.f32 256  ;;  %vm2244_vm5 = vsmask.f32 4352  ;;  %vm2311_vm7 = vsmask.f32 3328 }
  0x32   : > { %vm7936_vm3 = vmand %vm2224_vm1, %vm2225_vm2  ;;  %vm4583_vm12 = vcmask 1044484   ;;  %vm4586_vm13 = vcmask 1045509   ;;  %vm4589_vm14 = vcmask 1046534   ;;  %vm4592_vm15 = vcmask 1047559   ;;  %s5851_s15 = sshll.u32 %s6973_s25, 7  ;;  %s247_s16 = scalar_lea.vmem [#allocation2], %s5459_s14 }
  0x33   : > { %1596 = vmatpush1.bf16.msra.mxu0 %v6434_v28  ;;  %v593_v28 = vshll.u32 %v7122_v3, 16  ;;  %v602_v3 = vrot.slane %v600_v54, 1  ;;  %v7246_v54 = vld [vmem:[%s7040_s29 + $0x3c] sm:$0xf]  ;;  %vm7970_vm6 = vmand %vm2243_vm4, %vm2244_vm5  ;;  %s5396_s17 = sshll.u32 %s247_s16, 4  ;;  %s9348_s26 = scalar_lea.hbm %s9396_s6, %s5851_s15  ;;  %s9350_s17 = int_to_ptr.vmem [resolvable:$true] %s5396_s17 }
  0x34   : > { %1597 = vmatprep.subr.bf16.mxu0 %v6435_v31  ;;  %v379_v31 = vrot.slane %v9400_v23, 1  ;;  %9470 = vst [vmem:[#allocation15_spill] sm:$0xff] %v7246_v54  ;;  %s5383_s28 = scalar_lea.sflag [#allocation3], %s245_s13  ;;  %s6916_s25 = smov [#allocation2]  }
  0x35   : > { %v595_v60 = vrot.slane %v593_v28, 1  ;;  %v7209_v28 = vor.u32 %v532_v36, %v528_v27  ;;  %v906_v27 = vrot.slane %v7181_v49, 4  ;;  %s6855_s19 = sshll.u32 %s6916_s25, 4  ;;  %s6856_s19 = int_to_ptr.vmem [resolvable:$false] %s6855_s19 }
  0x36   : > { %v7175_v45 = vor.u32 %v379_v31, %v9401_v19  ;;  %v280_v31 = vld [vmem:[%s7040_s29 + $0x60] sm:$0xf]  ;;  %s6857_s9 = scalar_lea.vmem %s6856_s19, 256  ;;  %p6858_p0 = scmp.lt.s32.totalorder %s9350_s17, %s6856_s19 }
  0x37   : > { %1598 = vmatpush1.bf16.msra.mxu0 %v6437_v44  ;;  %v902_v44 = vrot.slane %v7144_v16, 4  ;;  %9468 = vst [vmem:[#allocation13_spill] sm:$0xff] %v7209_v28  ;;  %v7222_v32 = vor.u32 %v595_v60, %v591_v46  ;;  %v7225_v33 = vcombine.low %v279_v13, %v280_v31  ;;  %v542_v60 = vshrl.u32 %v7184_v55, 16 }
  0x38   : > { %1599 = vmatprep.subr.bf16.mxu0 %v6438_v48  ;;  %v750_v48 = vshrl.u32 %v373_v12, 16  ;;  %v773_v0 = vshll.u32 %v7175_v45, 16  ;;  %v278_v12 = vld [vmem:[%s7040_s29 + $0x58] sm:$0xf]  ;;  %v771_v36 = vshrl.u32 %v7175_v45, 16 }
  0x39   : > { %v7238_v41 = vcombine.low %v7203_v10, %v278_v12  ;;  %v9403_v45 = vshrl.u32 %v7225_v33, 16  ;;  %v6466_v10 = vld [vmem:[%s9391_s1 + $0x104] ss:$8 sps:$4 sm:$0xff]  }
  0x3a   : > { %v775_v46 = vrot.slane %v773_v0, 1  ;;  %v7255_v0 = vcombine.low %v278_v12, %v279_v13  ;;  %v911_v12 = vrot.slane %v7246_v54, 4 }
  0x3b   : > { %1600 = vmatpush1.bf16.msra.mxu0 %v6440_v53  ;;  %v535_v53 = vshrl.u32 %v7131_v8, 16  ;;  %v607_v13 = vshll.u32 %v7238_v41, 16  ;;  %v605_v19 = vshrl.u32 %v7238_v41, 16  ;;  %v6458_v41 = vld [vmem:[%s9391_s1 + $0xf0] ss:$8 sps:$4 sm:$0xff]  }
  0x3c   : > { %1601 = vmatprep.subr.bf16.mxu0 %v6441_v4  ;;  %v7196_v4 = vsel %vm936_vm0, %v7101_v50, %v896_v51  ;;  %v386_v51 = vrot.slane %v9398_v2, 1  ;;  %v776_v6 = vor.u32 %v775_v46, %v771_v36  ;;  %v551_v36 = vshll.u32 %v7255_v0, 16  ;;  %v6456_v46 = vld [vmem:[%s9391_s1 + $0xf4] ss:$8 sps:$4 sm:$0xff]  }
  0x3d   : > { %v7231_v38 = vor.u32 %v539_v61, %v535_v53  ;;  %v9397_v53 = vshll.u32 %v7225_v33, 16  ;;  %v546_v61 = vrot.slane %v544_v30, 1 }
  0x3e   : > { %v7235_v39 = vor.u32 %v386_v51, %v9399_v1  ;;  %v907_v51 = vrot.slane %v7222_v32, 4 }
  0x3f   : > { %1602 = vmatpush1.bf16.msra.mxu0 %v6443_v9  ;;  %v7200_v9 = vcombine.low %v7147_v17, %v7147_v17  ;;  %9469 = vst [vmem:[#allocation14_spill] sm:$0xff] %v7231_v38  ;;  %v393_v31 = vrot.slane %v9397_v53, 1  ;;  %v7270_v30 = vsel %vm936_vm0, %v7231_v38, %v906_v27  ;;  %v7288_v23 = vor.u32 %v546_v61, %v542_v60  ;;  %v289_v53 = vld [vmem:[%s7040_s29 + $0x84] sm:$0xf] }
  0x40   : > { %1603 = vmatprep.subr.bf16.mxu0 %v6444_v14  ;;  %v7207_v14 = vor.u32 %v444_v5, %v443_v11  ;;  %v6450_v5 = vld [vmem:[%s9391_s1 + $0xd4] ss:$8 sps:$4 sm:$0xff]   ;;  %v755_v11 = vor.u32 %v754_v59, %v750_v48  ;;  %v7243_v48 = vor.u32 %v602_v3, %v598_v62  ;;  %v7252_v59 = vsel %vm936_vm0, %v7209_v28, %v901_v37  ;;  %v7258_v62 = vld [vmem:[%s7040_s29 + $0x68] sm:$0xf]  ;;  %v283_v37 = vld [vmem:[%s7040_s29 + $0x6c] sm:$0xf] }
  0x41   : > { %9471 = vst [vmem:[#allocation16_spill] sm:$0xff] %v7258_v62  ;;  %v7283_v2 = vor.u32 %v393_v31, %v9403_v45  ;;  %v792_v1 = vshrl.u32 %v7235_v39, 16  ;;  %9472 = vst [vmem:[#allocation17_spill] sm:$0xff] %v7288_v23  ;;  %v7306_v60 = vcombine.low %v7246_v54, %v7246_v54  ;;  %v7314_v56 = vsel %vm936_vm0, %v776_v6, %v907_v51  ;;  %v7352_v38 = vld [vmem:[%s7040_s29 + $0x64] sm:$0xf] }
  0x42   : > { %v7261_v3 = vsel %vm936_vm0, %v755_v11, %v902_v44  ;;  %v285_v44 = vld [vmem:[%s7040_s29 + $0x74] sm:$0xf]  ;;  %v5491_v11 = vcombine.low %v7258_v62, %v283_v37  ;;  %v553_v61 = vrot.slane %v551_v36, 1  ;;  %v290_v62 = vld [vmem:[%s7040_s29 + $0x88] sm:$0xf]  ;;  %v7345_v29 = vcombine.low %v288_v25, %v289_v53  ;;  %9477 = vst [vmem:[#allocation21_spill] sm:$0xff] %v7352_v38 }
  0x43   : > { %1604 = vmatpush1.bf16.msra.mxu0 %v6446_v35  ;;  %v6452_v35 = vld [vmem:[%s9391_s1 + $0xd0] ss:$8 sps:$4 sm:$0xff]   ;;  %v6464_v36 = vld [vmem:[%s9391_s1 + $0x100] ss:$8 sps:$4 sm:$0xff]   ;;  %v293_v28 = vld [vmem:[%s7040_s29 + $0x94] sm:$0xf] }
  0x44   : > { %1605 = vmatprep.subr.bf16.mxu0 %v6447_v42  ;;  %v6453_v42 = vld [vmem:[%s9391_s1 + $0xe4] ss:$8 sps:$4 sm:$0xff]   ;;  %v612_v51 = vshrl.u32 %v5491_v11, 16  ;;  %9476 = vst [vmem:[#allocation20_spill] sm:$0xff] %v7345_v29  ;;  %v565_v49 = vshll.u32 %v7345_v29, 16 }
  0x47   : > { %1606 = vmatpush1.bf16.msra.mxu0 %v6449_v63  ;;  %v794_v63 = vshll.u32 %v7235_v39, 16  ;;  %v614_v39 = vshll.u32 %v5491_v11, 16 }
  0x48   : > { %1607 = vmatprep.subr.bf16.mxu0 %v6450_v5  ;;  %v284_v5 = vld [vmem:[%s7040_s29 + $0x70] sm:$0xf] }
  0x49   : > { %v7285_v27 = vcombine.low %v284_v5, %v285_v44  ;;  %v796_v31 = vrot.slane %v794_v63, 1  ;;  %v7299_v44 = vcombine.low %v283_v37, %v284_v5  ;;  %v7311_v63 = vld [vmem:[%s7040_s29 + $0x7c] sm:$0xf]  ;;  %v815_v37 = vshll.u32 %v7283_v2, 16 }
  0x4a   : > { %9474 = vst [vmem:[#allocation19_spill] sm:$0xff] %v7311_v63  ;;  %v7319_v5 = vcombine.low %v7292_v57, %v7292_v57  ;;  %v616_v57 = vrot.slane %v614_v39, 1  ;;  %v813_v39 = vshrl.u32 %v7283_v2, 16 }
  0x4b   : > { %1608 = vmatpush1.bf16.msra.mxu0 %v6452_v35  ;;  %v549_v35 = vshrl.u32 %v7255_v0, 16  ;;  %v9411_v45 = vshll.u32 %v7285_v27, 16  ;;  %v558_v54 = vshll.u32 %v7299_v44, 16  ;;  %v797_v11 = vor.u32 %v796_v31, %v792_v1 }
  0x4c   : > { %1609 = vmatprep.subr.bf16.mxu0 %v6453_v42  ;;  %v609_v42 = vrot.slane %v607_v13, 1  ;;  %v7326_v13 = vsel %vm936_vm0, %v7288_v23, %v911_v12  ;;  %v5492_v12 = vcombine.low %v7311_v63, %v288_v25  ;;  %v817_v63 = vrot.slane %v815_v37, 1 }
  0x4d   : > { %v400_v6 = vrot.slane %v9411_v45, 1  ;;  %v7356_v1 = vor.u32 %v553_v61, %v549_v35  ;;  %v7362_v2 = vor.u32 %v616_v57, %v612_v51  ;;  %v560_v37 = vrot.slane %v558_v54, 1 }
  0x4e   : > { %v7341_v45 = vor.u32 %v609_v42, %v605_v19  ;;  %v621_v31 = vshll.u32 %v5492_v12, 16  ;;  %v7360_v42 = vld [vmem:[%s7040_s29 + $0x90] sm:$0xf] }
  0x4f   : > { %1610 = vmatpush1.bf16.msra.mxu0 %v6455_v15  ;;  %v7335_v15 = vcombine.low %v289_v53, %v290_v62  ;;  %v6469_v62 = vld [vmem:[%s9391_s1 + $0x114] ss:$8 sps:$4 sm:$0xff]   ;;  %9478 = vst [vmem:[#allocation22_spill] sm:$0xff] %v7356_v1  ;;  %v556_v53 = vshrl.u32 %v7299_v44, 16  ;;  %9479 = vst [vmem:[#allocation23_spill] sm:$0xff] %v7360_v42 }
  0x50   : > { %1611 = vmatprep.subr.bf16.mxu0 %v6456_v46  ;;  %v9475_v46 = vshrl.u32 %v7285_v27, 16 }
  0x51   : > { %v9422_v19 = vshll.u32 %v7335_v15, 16  ;;  %v9481_v54 = vshrl.u32 %v7335_v15, 16 }
  0x52   : > { %v401_v23 = vor.u32 %v400_v6, %v9475_v46  ;;  %v619_v46 = vshrl.u32 %v5492_v12, 16  ;;  %v623_v12 = vrot.slane %v621_v31, 1  ;;  %v922_v31 = vrot.slane %v7362_v2, 4 }
  0x53   : > { %1612 = vmatpush1.bf16.msra.mxu0 %v6458_v41  ;;  %v407_v6 = vrot.slane %v9422_v19, 1  ;;  %v9480_v41 = vrot.slane %v7243_v48, 4  ;;  %v7379_v19 = vcombine.low %v294_v58, %v295_v24  ;;  %v6476_v24 = vld [vmem:[%s9391_s1 + $0x124] ss:$8 sps:$4 sm:$0xff]  }
  0x54   : > { %v836_v25 = vshll.u32 %v401_v23, 16  ;;  %1694 = vmatprep.subr.bf16.mxu0 %v6466_v10  ;;  %v834_v61 = vshrl.u32 %v401_v23, 16  ;;  %v5493_v10 = vcombine.low %v7360_v42, %v293_v28  ;;  %v6467_v23 = vld [vmem:[%s9391_s1 + $0x110] ss:$8 sps:$4 sm:$0xff]   ;;  %v567_v42 = vrot.slane %v565_v49, 1 }
  0x55   : > { %v7370_v35 = vsel %vm936_vm0, %v797_v11, %v9480_v41  ;;  %v408_v51 = vor.u32 %v407_v6, %v9481_v54  ;;  %v917_v11 = vrot.slane %v7341_v45, 4  ;;  %v7388_v41 = vsel %vm936_vm0, %v7356_v1, %v916_v26  ;;  %v6474_v26 = vld [vmem:[%s9391_s1 + $0x120] ss:$8 sps:$4 sm:$0xff]  }
  0x56   : > { %1614 = vmatmul.mubr.bf16.vlgmr.msra.gmra.mrb[0].mxu0 %v7196_v4  ;;  %v838_v57 = vrot.slane %v836_v25, 1  ;;  %v921_v4 = vrot.slane %v7352_v38, 4  ;;  %v628_v25 = vshll.u32 %v5493_v10, 16  ;;  %v7395_v6 = vor.u32 %v560_v37, %v556_v53 }
  0x57   : > { %1695 = vmatpush1.bf16.msra.mxu0 %v6464_v36  ;;  %1623 = vmatprep.mubr.bf16.mxu0 %v7261_v3  ;;  %v818_v36 = vor.u32 %v817_v63, %v813_v39  ;;  %v857_v3 = vshll.u32 %v408_v51, 16  ;;  %v563_v54 = vshrl.u32 %v7345_v29, 16  ;;  %v9430_v1 = vshll.u32 %v7379_v19, 16  ;;  %v7407_v63 = vld [vmem:[%s7040_s29 + $0x78] sm:$0xf] }
  0x58   : > { %1696 = vmatprep.subr.bf16.mxu0 %v6469_v62  ;;  %9482 = vst [vmem:[#allocation24_spill] sm:$0xff] %v7395_v6  ;;  %v7402_v62 = vcombine.low %v293_v28, %v294_v58  ;;  %v839_v50 = vor.u32 %v838_v57, %v834_v61  ;;  %v7404_v17 = vor.u32 %v623_v12, %v619_v46  ;;  %v9431_v39 = vshrl.u32 %v7379_v19, 16  ;;  %v6479_v58 = vld [vmem:[%s9391_s1 + $0x134] ss:$8 sps:$4 sm:$0xff]  }
  0x59   : > { %v626_v53 = vshrl.u32 %v5493_v10, 16  ;;  %v855_v37 = vshrl.u32 %v408_v51, 16  ;;  %v859_v34 = vrot.slane %v857_v3, 1  ;;  %v414_v29 = vrot.slane %v9430_v1, 1 }
  0x5a   : > { %v630_v49 = vrot.slane %v628_v25, 1  ;;  %v7417_v28 = vcombine.low %v7352_v38, %v7352_v38  ;;  %v7421_v46 = vcombine.low %v7407_v63, %v7407_v63  ;;  %v9483_v61 = vshrl.u32 %v7057_v21, 16 }
  0x5b   : > { %1697 = vmatpush1.bf16.msra.mxu0 %v6467_v23  ;;  %v9484_v57 = vshll.u32 %v7057_v21, 16  ;;  %v7428_v12 = vsel %vm936_vm0, %v818_v36, %v917_v11  ;;  %v7432_v23 = vsel %vm936_vm0, %v7395_v6, %v921_v4  ;;  %v7437_v3 = vor.u32 %v567_v42, %v563_v54  ;;  %v7444_v21 = vld [vmem:[%s7040_s29 + $0x8c] sm:$0xf]  ;;  %v6477_v4 = vld [vmem:[%s9391_s1 + $0x130] ss:$8 sps:$4 sm:$0xff]   ;;  %s6851_s29 = scalar_lea.vmem %s9350_s17, 128 }
  0x5c   : > { %1698 = vmatprep.subr.bf16.mxu0 %v6476_v24  ;;  %v640_v10 = vrot.slane %v9483_v61, 1  ;;  %v572_v24 = vshll.u32 %v7402_v62, 16  ;;  %v7441_v61 = vor.u32 %v414_v29, %v9431_v39  ;;  %v9485_v36 = vshrl.u32 %v7092_v43, 16  ;;  %p6852_p11 = scmp.ne.s32.totalorder %s9350_s17, %s6851_s29  ;;  %p6859_p1 = scmp.lt.s32.totalorder %s6857_s9, %s6851_s29 }
  0x5d   : > { %v641_v51 = vrot.slane %v9484_v57, 2  ;;  %v860_v42 = vor.u32 %v859_v34, %v855_v37  ;;  %v927_v29 = vrot.slane %v7404_v17, 4  ;;  %v7456_v54 = vor.u32 %v630_v49, %v626_v53  ;;  %v6484_v34 = vld [vmem:[%s9391_s1 + $0x140] ss:$8 sps:$4 sm:$0xff]  }
  0x5e   : > { %1624 = vmatmul.mubr.bf16.gmra.mrb[4].mxu0 %v7252_v59  ;;  %v643_v57 = vrot.slane %v9485_v36, 1  ;;  %v7453_v59 = vsel %vm936_vm0, %v839_v50, %v922_v31  ;;  %v448_v50 = vshrl.u32 %v7200_v9, 16  ;;  %v570_v31 = vshrl.u32 %v7402_v62, 16  ;;  %p6853_p12 = pnand %p6852_p11, %p6990_p5  ;;  %p6860_p2 = por %p6859_p1, %p6858_p0 }
  0x5f   : > { %v642_v11 = vor.u32 %v641_v51, %v640_v10  ;;  %1699 = vmatpush1.bf16.msra.mxu0 %v6474_v26  ;;  %1633 = vmatprep.mubr.bf16.mxu0 %v7314_v56  ;;  %v6486_v10 = vld [vmem:[%s9391_s1 + $0x144] ss:$8 sps:$4 sm:$0xff]   ;;  %v7463_v26 = vcombine.low %v7444_v21, %v7444_v21  ;;  %v9486_v56 = vshll.u32 %v7092_v43, 16  ;;  %v574_v53 = vrot.slane %v572_v24, 1 }
  0x60   : > { %1700 = vmatprep.subr.bf16.mxu0 %v6479_v58  ;;  %v6489_v58 = vld [vmem:[%s9391_s1 + $0x154] ss:$8 sps:$4 sm:$0xff]   ;;  %v878_v43 = vshll.u32 %v7441_v61, 16  ;;  %v9487_v25 = vshrl.u32 %v7129_v7, 16  ;;  %v7485_v24 = vsel %vm936_vm0, %v860_v42, %v927_v29  ;;  %v738_v37 = vshll.u32 %v7207_v14, 16  ;;  %p6854_p13 = pneg %p6853_p12 }
  0x61   : > { %v899_v51 = vrot.slane %v642_v11, 4  ;;  %v644_v36 = vrot.slane %v9486_v56, 2  ;;  %v9488_v39 = vshll.u32 %v7129_v7, 16  ;;  %v5502_v38 = vrot.slane %v7055_v20, 5 }
  0x62   : > { %v646_v1 = vrot.slane %v9487_v25, 1  ;;  %v876_v25 = vshrl.u32 %v7441_v61, 16  ;;  %v455_v42 = vshrl.u32 %v7213_v18, 16  ;;  %v9489_v29 = vshrl.u32 %v7178_v47, 16  ;;  %p6861_p3 = pnand %p6860_p2, %p6854_p13 }
  0x63   : > { %v7480_v11 = vsel %vm936_vm0, %v7088_v40, %v899_v51  ;;  %v645_v56 = vor.u32 %v644_v36, %v643_v57  ;;  %1701 = vmatpush1.bf16.msra.mxu0 %v6477_v4  ;;  %v647_v6 = vrot.slane %v9488_v39, 2  ;;  %v450_v51 = vrot.slane %v448_v50, 7 }
  0x64   : > { %1702 = vmatprep.subr.bf16.mxu0 %v6486_v10  ;;  %v451_v57 = vshll.u32 %v7200_v9, 16  ;;  %v649_v36 = vrot.slane %v9489_v29, 1  ;;  %v880_v49 = vrot.slane %v878_v43, 1  ;;  %v7498_v7 = vor.u32 %v574_v53, %v570_v31 }
  0x65   : > { %v904_v40 = vrot.slane %v645_v56, 4  ;;  %v648_v4 = vor.u32 %v647_v6, %v646_v1  ;;  %v9490_v10 = vshll.u32 %v7178_v47, 16  ;;  %v6487_v1 = vld [vmem:[%s9391_s1 + $0x150] ss:$8 sps:$4 sm:$0xff]   ;;  %v7510_v6 = vrot.slane %v738_v37, 1 }
  0x66   : > { %1634 = vmatmul.mubr.bf16.gmra.mrb[8].mxu0 %v7270_v30  ;;  %v462_v61 = vshrl.u32 %v7306_v60, 16  ;;  %v465_v50 = vshll.u32 %v7306_v60, 16  ;;  %v7517_v47 = vor.u32 %v451_v57, %v450_v51  ;;  %v9491_v53 = vshrl.u32 %v7225_v33, 16  ;;  %v6494_v37 = vld [vmem:[%s9391_s1 + $0x160] ss:$8 sps:$4 sm:$0xff]  }
  0x67   : > { %v7502_v39 = vsel %vm936_vm0, %v7144_v16, %v904_v40  ;;  %v650_v9 = vrot.slane %v9490_v10, 2  ;;  %1703 = vmatpush1.bf16.msra.mxu0 %v6484_v34  ;;  %1643 = vmatprep.mubr.bf16.mxu0 %v7370_v35  ;;  %v909_v30 = vrot.slane %v648_v4, 4  ;;  %v6496_v16 = vld [vmem:[%s9391_s1 + $0x164] ss:$8 sps:$4 sm:$0xff]   ;;  %v458_v43 = vshll.u32 %v7213_v18, 16 }
  0x68   : > { %1704 = vmatprep.subr.bf16.mxu0 %v6489_v58  ;;  %v652_v35 = vrot.slane %v9491_v53, 1  ;;  %v457_v58 = vrot.slane %v455_v42, 7  ;;  %v464_v56 = vrot.slane %v462_v61, 7  ;;  %v6499_v40 = vld [vmem:[%s9391_s1 + $0x174] ss:$8 sps:$4 sm:$0xff]   ;;  %v7533_v51 = vor.u32 %v880_v49, %v876_v25  ;;  %v9522_v34 = vld [vmem:[#allocation24_spill] sm:$0xff] }
  0x69   : > { %v651_v31 = vor.u32 %v650_v9, %v649_v36  ;;  %v7527_v60 = vsel %vm936_vm0, %v7222_v32, %v909_v30  ;;  %v9492_v4 = vshll.u32 %v7225_v33, 16  ;;  %v469_v36 = vshrl.u32 %v7319_v5, 16 }
  0x6a   : > { %v467_v10 = vor.u32 %v465_v50, %v464_v56  ;;  %v472_v18 = vshll.u32 %v7319_v5, 16  ;;  %v759_v9 = vshll.u32 %v7517_v47, 16  ;;  %v7549_v30 = vor.u32 %v458_v43, %v457_v58 }
  0x6b   : > { %v914_v57 = vrot.slane %v651_v31, 4  ;;  %v653_v29 = vrot.slane %v9492_v4, 2  ;;  %1705 = vmatpush1.bf16.msra.mxu0 %v6487_v1  ;;  %v471_v33 = vrot.slane %v469_v36, 7  ;;  %v6497_v1 = vld [vmem:[%s9391_s1 + $0x170] ss:$8 sps:$4 sm:$0xff]   ;;  %v9493_v50 = vshrl.u32 %v7285_v27, 16 }
  0x6c   : > { %1706 = vmatprep.subr.bf16.mxu0 %v6496_v16  ;;  %v799_v61 = vshrl.u32 %v467_v10, 16  ;;  %v801_v31 = vshll.u32 %v467_v10, 16  ;;  %v5505_v43 = vrot.slane %v7184_v55, 5  ;;  %v5506_v4 = vrot.slane %v7255_v0, 5 }
  0x6d   : > { %v7544_v49 = vsel %vm936_vm0, %v7243_v48, %v914_v57  ;;  %v654_v25 = vor.u32 %v653_v29, %v652_v35  ;;  %v655_v5 = vrot.slane %v9493_v50, 1  ;;  %v6506_v48 = vld [vmem:[%s9391_s1 + $0x184] ss:$8 sps:$4 sm:$0xff]   ;;  %v474_v53 = vor.u32 %v472_v18, %v471_v33 }
  0x6e   : > { %1644 = vmatmul.mubr.bf16.gmra.mrb[12].mxu0 %v7326_v13  ;;  %v9494_v35 = vshll.u32 %v7285_v27, 16  ;;  %v476_v57 = vshrl.u32 %v7417_v28, 16  ;;  %v803_v58 = vrot.slane %v801_v31, 1  ;;  %v479_v13 = vshll.u32 %v7417_v28, 16 }
  0x6f   : > { %v919_v16 = vrot.slane %v654_v25, 4  ;;  %1707 = vmatpush1.bf16.msra.mxu0 %v6494_v37  ;;  %1653 = vmatprep.mubr.bf16.mxu0 %v7428_v12  ;;  %v820_v36 = vshrl.u32 %v474_v53, 16  ;;  %v822_v27 = vshll.u32 %v474_v53, 16  ;;  %v6504_v37 = vld [vmem:[%s9391_s1 + $0x180] ss:$8 sps:$4 sm:$0xff]   ;;  %v9495_v55 = vshrl.u32 %v7335_v15, 16 }
  0x70   : > { %v656_v56 = vrot.slane %v9494_v35, 2  ;;  %1708 = vmatprep.subr.bf16.mxu0 %v6499_v40  ;;  %v804_v12 = vor.u32 %v803_v58, %v799_v61  ;;  %v478_v18 = vrot.slane %v476_v57, 7  ;;  %v9496_v0 = vshll.u32 %v7335_v15, 16 }
  0x71   : > { %v7566_v29 = vsel %vm936_vm0, %v7341_v45, %v919_v16  ;;  %v658_v25 = vrot.slane %v9495_v55, 1  ;;  %v6509_v45 = vld [vmem:[%s9391_s1 + $0x194] ss:$8 sps:$4 sm:$0xff]   ;;  %v824_v40 = vrot.slane %v822_v27, 1  ;;  %v483_v31 = vshrl.u32 %v7421_v46, 16 }
  0x72   : > { %v657_v10 = vor.u32 %v656_v56, %v655_v5  ;;  %v659_v28 = vrot.slane %v9496_v0, 2  ;;  %v486_v50 = vshll.u32 %v7421_v46, 16  ;;  %v7580_v5 = vrot.slane %v759_v9, 1  ;;  %v6507_v46 = vld [vmem:[%s9391_s1 + $0x190] ss:$8 sps:$4 sm:$0xff]  }
  0x73   : > { %1709 = vmatpush1.bf16.msra.mxu0 %v6497_v1  ;;  %v7583_v61 = vsel %vm936_vm0, %v804_v12, %v5505_v43  ;;  %v481_v16 = vor.u32 %v479_v13, %v478_v18  ;;  %v825_v15 = vor.u32 %v824_v40, %v820_v36  ;;  %v485_v56 = vrot.slane %v483_v31, 7  ;;  %v9500_v31 = vld [vmem:[#allocation20_spill] sm:$0xff] }
  0x74   : > { %v924_v33 = vrot.slane %v657_v10, 4  ;;  %v660_v53 = vor.u32 %v659_v28, %v658_v25  ;;  %1710 = vmatprep.subr.bf16.mxu0 %v6506_v48  ;;  %v9497_v57 = vshrl.u32 %v7379_v19, 16  ;;  %v9498_v13 = vshll.u32 %v7379_v19, 16 }
  0x75   : > { %v841_v9 = vshrl.u32 %v481_v16, 16  ;;  %v843_v1 = vshll.u32 %v481_v16, 16  ;;  %v7601_v48 = vsel %vm936_vm0, %v825_v15, %v5506_v4  ;;  %v488_v36 = vor.u32 %v486_v50, %v485_v56  ;;  %v9501_v16 = vld [vmem:[#allocation5_spill] sm:$0xff] }
  0x76   : > { %v7587_v35 = vsel %vm936_vm0, %v7362_v2, %v924_v33  ;;  %v661_v58 = vrot.slane %v9497_v57, 1  ;;  %v929_v43 = vrot.slane %v660_v53, 4  ;;  %v662_v27 = vrot.slane %v9498_v13, 2  ;;  %1654 = vmatmul.mubr.bf16.gmra.mrb[16].mxu0 %v7388_v41  ;;  %v6516_v2 = vld [vmem:[%s9391_s1 + $0x1a4] ss:$8 sps:$4 sm:$0xff]  }
  0x77   : > { %v490_v10 = vshrl.u32 %v7463_v26, 16  ;;  %v493_v12 = vshll.u32 %v7463_v26, 16  ;;  %1711 = vmatpush1.bf16.msra.mxu0 %v6504_v37  ;;  %1663 = vmatprep.mubr.bf16.mxu0 %v7453_v59  ;;  %v845_v18 = vrot.slane %v843_v1, 1  ;;  %v5507_v19 = vrot.slane %v7299_v44, 5  ;;  %v6514_v26 = vld [vmem:[%s9391_s1 + $0x1a0] ss:$8 sps:$4 sm:$0xff]  }
  0x78   : > { %v7609_v41 = vsel %vm936_vm0, %v7404_v17, %v929_v43  ;;  %v663_v55 = vor.u32 %v662_v27, %v661_v58  ;;  %1712 = vmatprep.subr.bf16.mxu0 %v6509_v45  ;;  %v780_v4 = vshll.u32 %v7549_v30, 16  ;;  %v862_v25 = vshrl.u32 %v488_v36, 16  ;;  %v9502_v53 = vld [vmem:[#allocation8_spill] sm:$0xff]  ;;  %v6519_v56 = vld [vmem:[%s9391_s1 + $0x1b4] ss:$8 sps:$4 sm:$0xff]  }
  0x79   : > { %v864_v0 = vshll.u32 %v488_v36, 16  ;;  %v492_v28 = vrot.slane %v490_v10, 7  ;;  %v846_v37 = vor.u32 %v845_v18, %v841_v9  ;;  %v673_v40 = vshrl.u32 %v7060_v22, 16  ;;  %v9503_v9 = vld [vmem:[#allocation6_spill] sm:$0xff]  ;;  %v9505_v43 = vld [vmem:[#allocation9_spill] sm:$0xff] }
  0x7a   : > { %v934_v59 = vrot.slane %v663_v55, 4  ;;  %v9499_v44 = vshll.u32 %v7060_v22, 16  ;;  %v5508_v50 = vrot.slane %v9500_v31, 5  ;;  %v7621_v15 = vcombine.low %v9502_v53, %v9501_v16  ;;  %v9509_v31 = vld [vmem:[#allocation14_spill] sm:$0xff]  ;;  %v9511_v53 = vld [vmem:[#allocation15_spill] sm:$0xff] }
  0x7b   : > { %v866_v17 = vrot.slane %v864_v0, 1  ;;  %v495_v45 = vor.u32 %v493_v12, %v492_v28  ;;  %1713 = vmatpush1.bf16.msra.mxu0 %v6507_v46  ;;  %v7627_v57 = vsel %vm936_vm0, %v846_v37, %v5507_v19  ;;  %v9504_v1 = vshrl.u32 %v9503_v9, 16  ;;  %v6517_v12 = vld [vmem:[%s9391_s1 + $0x1b0] ss:$8 sps:$4 sm:$0xff]   ;;  %v9506_v37 = vld [vmem:[#allocation7_spill] sm:$0xff] }
  0x7c   : > { %v677_v33 = vrot.slane %v9499_v44, 1  ;;  %v7631_v22 = vsel %vm936_vm0, %v7456_v54, %v934_v59  ;;  %1714 = vmatprep.subr.bf16.mxu0 %v6516_v2  ;;  %v7640_v18 = vrot.slane %v780_v4, 1  ;;  %v5509_v19 = vrot.slane %v7402_v62, 5  ;;  %v6526_v2 = vld [vmem:[%s9391_s1 + $0x1c4] ss:$8 sps:$4 sm:$0xff]   ;;  %v9508_v4 = vld [vmem:[#allocation13_spill] sm:$0xff] }
  0x7d   : > { %v748_v13 = vor.u32 %v9505_v43, %v9504_v1  ;;  %v867_v46 = vor.u32 %v866_v17, %v862_v25  ;;  %v883_v36 = vshrl.u32 %v495_v45, 16  ;;  %v885_v10 = vshll.u32 %v495_v45, 16  ;;  %v9507_v59 = vld [vmem:[#allocation11_spill] sm:$0xff]  ;;  %v9510_v16 = vld [vmem:[#allocation10_spill] sm:$0xff]  ;;  %v9513_v1 = vld [vmem:[#allocation17_spill] sm:$0xff] }
  0x7e   : > { %v678_v58 = vor.u32 %v677_v33, %v673_v40  ;;  %1664 = vmatmul.mubr.bf16.gmra.mrb[20].mxu0 %v7432_v23  ;;  %v682_v28 = vshll.u32 %v7621_v15, 16  ;;  %v7653_v40 = vcombine.low %v9507_v59, %v9506_v37  ;;  %v680_v23 = vshrl.u32 %v7621_v15, 16  ;;  %v6524_v9 = vld [vmem:[%s9391_s1 + $0x1c0] ss:$8 sps:$4 sm:$0xff]  }
  0x7f   : > { %v7648_v0 = vsel %vm936_vm0, %v867_v46, %v5508_v50  ;;  %v887_v25 = vrot.slane %v885_v10, 1  ;;  %1715 = vmatpush1.bf16.msra.mxu0 %v6514_v26  ;;  %1673 = vmatprep.mubr.bf16.mxu0 %v7485_v24  ;;  %v766_v33 = vshll.u32 %v9508_v4, 16  ;;  %v787_v45 = vshll.u32 %v9509_v31, 16 }
  0x80   : > { %v900_v55 = vrot.slane %v678_v58, 4  ;;  %1716 = vmatprep.subr.bf16.mxu0 %v6519_v56  ;;  %v5497_v26 = vcombine.low %v9511_v53, %v9510_v16  ;;  %v9512_v24 = vrot.slane %v7407_v63, 4  ;;  %v806_v43 = vshrl.u32 %v9513_v1, 16  ;;  %v9515_v53 = vld [vmem:[#allocation12_spill] sm:$0xff] }
  0x81   : > { %v888_v17 = vor.u32 %v887_v25, %v883_v36  ;;  %v808_v56 = vshll.u32 %v9513_v1, 16  ;;  %v9514_v46 = vrot.slane %v7444_v21, 4  ;;  %v689_v25 = vshll.u32 %v7653_v40, 16 }
  0x82   : > { %v7657_v62 = vsel %vm936_vm0, %v748_v13, %v900_v55  ;;  %v1052_v58 = vsel %vm936_vm0, %v7437_v3, %v9512_v24  ;;  %v6529_v13 = vld [vmem:[%s9391_s1 + $0x1d4] ss:$8 sps:$4 sm:$0xff]   ;;  %v684_v55 = vrot.slane %v682_v28, 1  ;;  %v694_v37 = vshrl.u32 %v5497_v26, 16  ;;  %v9519_v28 = vld [vmem:[#allocation16_spill] sm:$0xff] }
  0x83   : > { %v1071_v36 = vsel %vm936_vm0, %v7498_v7, %v9514_v46  ;;  %v7683_v10 = vsel %vm936_vm0, %v888_v17, %v5509_v19  ;;  %1717 = vmatpush1.bf16.msra.mxu0 %v6517_v12  ;;  %v696_v59 = vshll.u32 %v5497_v26, 16  ;;  %v810_v16 = vrot.slane %v808_v56, 1  ;;  %v9516_v24 = vld [vmem:[#allocation18_spill] sm:$0xff]  ;;  %v9520_v17 = vld [vmem:[#allocation21_spill] sm:$0xff] }
  0x84   : > { %v5498_v1 = vcombine.low %v9516_v24, %v9515_v53  ;;  %1718 = vmatprep.subr.bf16.mxu0 %v6526_v2  ;;  %v9517_v50 = vrot.slane %v7456_v54, 4  ;;  %v9518_v46 = vld [vmem:[#allocation22_spill] sm:$0xff]  ;;  %v5499_v27 = vcombine.low %v9520_v17, %v9519_v28  ;;  %v9521_v26 = vshrl.u32 %v7207_v14, 16 }
  0x85   : > { %v827_v42 = vshrl.u32 %v9518_v46, 16  ;;  %v829_v19 = vshll.u32 %v9518_v46, 16  ;;  %v6527_v12 = vld [vmem:[%s9391_s1 + $0x1d0] ss:$8 sps:$4 sm:$0xff]   ;;  %v687_v54 = vshrl.u32 %v7653_v40, 16  ;;  %v698_v56 = vrot.slane %v696_v59, 1 }
  0x86   : > { %v1075_v44 = vsel %vm936_vm0, %v7533_v51, %v9517_v50  ;;  %v7702_v2 = vor.u32 %v7510_v6, %v9521_v26  ;;  %v811_v51 = vor.u32 %v810_v16, %v806_v43  ;;  %1674 = vmatmul.mubr.bf16.gmra.mrb[24].mxu0 %v1052_v58  ;;  %v6536_v50 = vld [vmem:[%s9391_s1 + $0x1e4] ss:$8 sps:$4 sm:$0xff]   ;;  %v701_v53 = vshrl.u32 %v5498_v1, 16 }
  0x87   : > { %v703_v24 = vshll.u32 %v5498_v1, 16  ;;  %v831_v46 = vrot.slane %v829_v19, 1  ;;  %v708_v28 = vshrl.u32 %v5499_v27, 16  ;;  %1719 = vmatpush1.bf16.msra.mxu0 %v6524_v9  ;;  %1683 = vmatprep.mubr.bf16.mxu0 %v1075_v44  ;;  %v699_v17 = vor.u32 %v698_v56, %v694_v37  ;;  %v9523_v59 = vld [vmem:[#allocation19_spill] sm:$0xff] }
  0x88   : > { %v710_v14 = vshll.u32 %v5499_v27, 16  ;;  %v848_v6 = vshrl.u32 %v9522_v34, 16  ;;  %v850_v26 = vshll.u32 %v9522_v34, 16  ;;  %1720 = vmatprep.subr.bf16.mxu0 %v6529_v13  ;;  %v691_v40 = vrot.slane %v689_v25, 1  ;;  %v6534_v1 = vld [vmem:[%s9391_s1 + $0x1e0] ss:$8 sps:$4 sm:$0xff]  }
  0x89   : > { %v705_v43 = vrot.slane %v703_v24, 1  ;;  %v832_v58 = vor.u32 %v831_v46, %v827_v42  ;;  %v5500_v16 = vcombine.low %v7407_v63, %v9523_v59  ;;  %v915_v19 = vrot.slane %v699_v17, 4  ;;  %v6539_v34 = vld [vmem:[%s9391_s1 + $0x1f4] ss:$8 sps:$4 sm:$0xff]   ;;  %v9524_v46 = vld [vmem:[#allocation23_spill] sm:$0xff] }
  0x8a   : > { %v712_v9 = vrot.slane %v710_v14, 1  ;;  %v852_v44 = vrot.slane %v850_v26, 1  ;;  %v869_v27 = vshrl.u32 %v7437_v3, 16  ;;  %v871_v42 = vshll.u32 %v7437_v3, 16 }
  0x8b   : > { %v706_v13 = vor.u32 %v705_v43, %v701_v53  ;;  %v715_v25 = vshrl.u32 %v5500_v16, 16  ;;  %v717_v37 = vshll.u32 %v5500_v16, 16  ;;  %1721 = vmatpush1.bf16.msra.mxu0 %v6527_v12  ;;  %v7721_v63 = vsel %vm936_vm0, %v811_v51, %v915_v19  ;;  %v6537_v12 = vld [vmem:[%s9391_s1 + $0x1f0] ss:$8 sps:$4 sm:$0xff]  }
  0x8c   : > { %v713_v56 = vor.u32 %v712_v9, %v708_v28  ;;  %v853_v24 = vor.u32 %v852_v44, %v848_v6  ;;  %v5501_v17 = vcombine.low %v7444_v21, %v9524_v46  ;;  %1722 = vmatprep.subr.bf16.mxu0 %v6536_v50  ;;  %v873_v59 = vrot.slane %v871_v42, 1  ;;  %v6542_v21 = vld [vmem:[%s9391_s1 + $0x204] ss:$8 sps:$4 sm:$0xff]  }
  0x8d   : > { %v920_v14 = vrot.slane %v706_v13, 4  ;;  %v719_v26 = vrot.slane %v717_v37, 1  ;;  %v890_v32 = vshrl.u32 %v7498_v7, 16  ;;  %v892_v3 = vshll.u32 %v7498_v7, 16  ;;  %v6548_v13 = vld [vmem:[%s9391_s1 + $0x224] ss:$8 sps:$4 sm:$0xff]  }
  0x8e   : > { %v925_v53 = vrot.slane %v713_v56, 4  ;;  %v722_v43 = vshrl.u32 %v5501_v17, 16  ;;  %v724_v16 = vshll.u32 %v5501_v17, 16  ;;  %1684 = vmatmul.mubr.bf16.gmra.mrb[28].mxu0 %v1071_v36  ;;  %v7735_v51 = vor.u32 %v684_v55, %v680_v23  ;;  %v6540_v55 = vld [vmem:[%s9391_s1 + $0x200] ss:$8 sps:$4 sm:$0xff]  }
  0x8f   : > { %v7738_v50 = vsel %vm936_vm0, %v832_v58, %v920_v14  ;;  %v720_v28 = vor.u32 %v719_v26, %v715_v25  ;;  %v874_v6 = vor.u32 %v873_v59, %v869_v27  ;;  %1723 = vmatpush1.bf16.msra.mxu0 %v6534_v1  ;;  %1726 = vmatprep.mubr.bf16.mxu0 %v7480_v11  ;;  %v894_v9 = vrot.slane %v892_v3, 1  ;;  %v6545_v11 = vld [vmem:[%s9391_s1 + $0x214] ss:$8 sps:$4 sm:$0xff]   ;;  %v6561_v14 = vld [vmem:[%s9391_s1 + $0x270] ss:$8 sps:$4 sm:$0xff]   ;;  %v6579_v59 = vld [vmem:[%s9392_s2 + $0x60] sm:$0xff]  }
  0x90   : > { %v7741_v7 = vor.u32 %v691_v40, %v687_v54  ;;  %v7744_v36 = vsel %vm936_vm0, %v853_v24, %v925_v53  ;;  %v726_v19 = vrot.slane %v724_v16, 1  ;;  %1724 = vmatprep.subr.bf16.mxu0 %v6539_v34  ;;  %v7748_v15 = vrot.slane %v766_v33, 1  ;;  %v6543_v34 = vld [vmem:[%s9391_s1 + $0x210] ss:$8 sps:$4 sm:$0xff]   ;;  %v6551_v25 = vld [vmem:[%s9391_s1 + $0x234] ss:$8 sps:$4 sm:$0xff]  }
  0x91   : > { %v930_v23 = vrot.slane %v720_v28, 4  ;;  %v895_v1 = vor.u32 %v894_v9, %v890_v32  ;;  %v905_v54 = vrot.slane %v7735_v51, 4  ;;  %v7759_v40 = vrot.slane %v787_v45, 1  ;;  %v6557_v24 = vld [vmem:[%s9391_s1 + $0x254] ss:$8 sps:$4 sm:$0xff]   ;;  %v6580_v53 = vld [vmem:[%s9392_s2 + $0x20] sm:$0xff]  }
  0x92   : > { %v727_v58 = vor.u32 %v726_v19, %v722_v43  ;;  %v946_v44 = vsel %vm936_vm0, %v7702_v2, %v5502_v38  ;;  %v910_v32 = vrot.slane %v7741_v7, 4  ;;  %v9525_v20 = vshrl.u32 %v7517_v47, 16  ;;  %v6546_v2 = vld [vmem:[%s9391_s1 + $0x220] ss:$8 sps:$4 sm:$0xff]   ;;  %v6554_v47 = vld [vmem:[%s9391_s1 + $0x244] ss:$8 sps:$4 sm:$0xff]  }
  0x93   : > { %v7762_v33 = vsel %vm936_vm0, %v874_v6, %v930_v23  ;;  %1725 = vmatpush1.bf16.msra.mxu0 %v6537_v12  ;;  %v9526_v37 = vrot.slane %v7104_v52, 5  ;;  %v6552_v52 = vld [vmem:[%s9391_s1 + $0x240] ss:$8 sps:$4 sm:$0xff]   ;;  %v9528_v46 = vrot.slane %v7131_v8, 5  ;;  %v6578_v26 = vld [vmem:[%s9392_s2 + $0x18] sm:$0xff]   ;;  %v6583_v3 = vld [vmem:[%s9392_s2 + $0x70] sm:$0xff]   ;;  %v1171_v28 = vlaneseq }
  0x94   : > { %v935_v27 = vrot.slane %v727_v58, 4  ;;  %1807 = vmatprep.subr.bf16.mxu0 %v6542_v21  ;;  %v762_v38 = vor.u32 %v7580_v5, %v9525_v20  ;;  %v9527_v5 = vshrl.u32 %v7549_v30, 16  ;;  %v6560_v30 = vld [vmem:[%s9391_s1 + $0x264] ss:$8 sps:$4 sm:$0xff]   ;;  %v6558_v8 = vld [vmem:[%s9391_s1 + $0x260] ss:$8 sps:$4 sm:$0xff]  }
  0x95   : > { %v6581_v43 = vld [vmem:[%s9392_s2 + $0x68] sm:$0xff]   ;;  %v6584_v12 = vld [vmem:[%s9392_s2 + $0x30] sm:$0xff]   ;;  %v6585_v21 = vld [vmem:[%s9392_s2 + $0x78] sm:$0xff]   ;;  %v1172_v6 = vshrl.u32 %v1171_v28, 7 }
  0x96   : > { %v7773_v45 = vsel %vm936_vm0, %v895_v1, %v935_v27  ;;  %1727 = vmatmul.mubr.bf16.vlgmr.msra.gmra.mrb[0].mxu0 %v946_v44  ;;  %v965_v42 = vsel %vm936_vm0, %v762_v38, %v9526_v37  ;;  %v783_v56 = vor.u32 %v7640_v18, %v9527_v5  ;;  %v6563_v18 = vld [vmem:[%s9391_s1 + $0x274] ss:$8 sps:$4 sm:$0xff]   ;;  %v6582_v16 = vld [vmem:[%s9392_s2 + $0x28] sm:$0xff]  }
  0x97   : > { %1808 = vmatpush1.bf16.msra.mxu0 %v6540_v55  ;;  %1736 = vmatprep.mubr.bf16.mxu0 %v7502_v39  ;;  %v6549_v39 = vld [vmem:[%s9391_s1 + $0x230] ss:$8 sps:$4 sm:$0xff]   ;;  %v1173_v7 = vsub.s32 0, %v1172_v6  ;;  %v1177_v19 = vsub.s32 1, %v1172_v6 }
  0x98   : > { %1809 = vmatprep.subr.bf16.mxu0 %v6545_v11  ;;  %v984_v17 = vsel %vm936_vm0, %v783_v56, %v9528_v46  ;;  %v6586_v51 = vld [vmem:[%s9392_s2 + $0x38] sm:$0xff]  }
  0x9b   : > { %1810 = vmatpush1.bf16.msra.mxu0 %v6543_v34 }
  0x9c   : > { %1811 = vmatprep.subr.bf16.mxu0 %v6548_v13 }
  0x9e   : > { %1737 = vmatmul.mubr.bf16.gmra.mrb[4].mxu0 %v965_v42 }
  0x9f   : > { %1746 = vmatprep.mubr.bf16.mxu0 %v7527_v60  ;;  %1812 = vmatpush1.bf16.msra.mxu0 %v6546_v2  ;;  %v6555_v60 = vld [vmem:[%s9391_s1 + $0x250] ss:$8 sps:$4 sm:$0xff]  }
  0xa0   : > { %1813 = vmatprep.subr.bf16.mxu0 %v6551_v25 }
  0xa3   : > { %1814 = vmatpush1.bf16.msra.mxu0 %v6549_v39 }
  0xa4   : > { %1815 = vmatprep.subr.bf16.mxu0 %v6554_v47 }
  0xa6   : > { %1747 = vmatmul.mubr.bf16.gmra.mrb[8].mxu0 %v984_v17 }
  0xa7   : > { %1756 = vmatprep.mubr.bf16.mxu0 %v7544_v49  ;;  %1816 = vmatpush1.bf16.msra.mxu0 %v6552_v52  ;;  %v6915_v49 = vmov 0  }
  0xa8   : > { %1817 = vmatprep.subr.bf16.mxu0 %v6557_v24 }
  0xab   : > { %1818 = vmatpush1.bf16.msra.mxu0 %v6555_v60 }
  0xac   : > { %1819 = vmatprep.subr.bf16.mxu0 %v6560_v30 }
  0xae   : > { %1757 = vmatmul.mubr.bf16.gmra.mrb[12].mxu0 %v7583_v61 }
  0xaf   : > { %1766 = vmatprep.mubr.bf16.mxu0 %v7566_v29  ;;  %1820 = vmatpush1.bf16.msra.mxu0 %v6558_v8  ;;  %v9529_v29 = vshrl.u32 %v9508_v4, 16  ;;  %v6574_v4 = vld [vmem:[%s9392_s2 + $0x8] sm:$0xff]  }
  0xb0   : > { %1821 = vmatprep.subr.bf16.mxu0 %v6563_v18 }
  0xb1   : > { %v769_v61 = vor.u32 %v7748_v15, %v9529_v29 }
  0xb3   : > { %1822 = vmatpush1.bf16.msra.mxu0 %v6561_v14 }
  0xb6   : > { %1767 = vmatmul.mubr.bf16.gmra.mrb[16].mxu0 %v7601_v48  ;;  %v9530_v48 = vshrl.u32 %v9509_v31, 16  ;;  %v6575_v31 = vld [vmem:[%s9392_s2 + $0x50] sm:$0xff]  }
  0xb7   : > { %1776 = vmatprep.mubr.bf16.mxu0 %v7587_v35  ;;  %v973_v35 = vsel %vm936_vm0, %v769_v61, %v905_v54 }
  0xbe   : > { %1777 = vmatmul.mubr.bf16.gmra.mrb[20].mxu0 %v7627_v57 }
  0xbf   : > { %1786 = vmatprep.mubr.bf16.mxu0 %v7609_v41  ;;  %v790_v41 = vor.u32 %v7759_v40, %v9530_v48 }
  0xc1   : > { %v992_v57 = vsel %vm936_vm0, %v790_v41, %v910_v32 }
  0xc6   : > { %1787 = vmatmul.mubr.bf16.gmra.mrb[24].mxu0 %v7648_v0  ;;  %v6572_v0 = vld [vmem:[%s9392_s2] sm:$0xff]  }
  0xc7   : > { %1796 = vmatprep.mubr.bf16.mxu0 %v7631_v22  ;;  %v6571_v22 = vld [vmem:[%s9392_s2 + $0x40] sm:$0xff]  }
  0xc8   : > { %5870 = vmatprep.subr.bf16.mxu1 %v6571_v22 }
  0xc9   : > { %5871 = vmatpush3.bf16.msra.mxu1 %v6572_v0 }
  0xce   : > { %1797 = vmatmul.mubr.bf16.gmra.mrb[28].mxu0 %v7683_v10  ;;  %v6576_v10 = vld [vmem:[%s9392_s2 + $0x10] sm:$0xff]  }
  0xcf   : > { %1839 = vmatprep.mubr.bf16.mxu0 %v6915_v49 }
  0xd6   : > { %1840 = vmatmul.mubr.bf16.vlgmr.msra.gmra.mrb[0].mxu0 %v7657_v62  ;;  %v6573_v62 = vld [vmem:[%s9392_s2 + $0x48] sm:$0xff]  }
  0xd7   : > { %1849 = vmatprep.mubr.bf16.mxu0 %v6915_v49  ;;  %5872 = vmatprep.subr.bf16.mxu1 %v6573_v62 }
  0xd8   : > { %5873 = vmatpush3.bf16.msra.mxu1 %v6574_v4 }
  0xd9   : > { %5874 = vmatprep.subr.bf16.mxu1 %v6575_v31 }
  0xdc   : > { %5875 = vmatpush3.bf16.msra.mxu1 %v6576_v10 }
  0xde   : > { %1850 = vmatmul.mubr.bf16.gmra.mrb[4].mxu0 %v973_v35 }
  0xdf   : > { %1859 = vmatprep.mubr.bf16.mxu0 %v6915_v49 }
  0xe6   : > { %1860 = vmatmul.mubr.bf16.gmra.mrb[8].mxu0 %v992_v57 }
  0xe7   : > { %1869 = vmatprep.mubr.bf16.mxu0 %v6915_v49 }
  0xee   : > { %1870 = vmatmul.mubr.bf16.gmra.mrb[12].mxu0 %v7721_v63  ;;  %v6577_v63 = vld [vmem:[%s9392_s2 + $0x58] sm:$0xff]  }
  0xef   : > { %1879 = vmatprep.mubr.bf16.mxu0 %v6915_v49  ;;  %5876 = vmatprep.subr.bf16.mxu1 %v6577_v63 }
  0xf0   : > { %5877 = vmatpush3.bf16.msra.mxu1 %v6578_v26 }
  0xf1   : > { %5878 = vmatprep.subr.bf16.mxu1 %v6579_v59 }
  0xf4   : > { %5879 = vmatpush3.bf16.msra.mxu1 %v6580_v53 }
  0xf5   : > { %5880 = vmatprep.subr.bf16.mxu1 %v6581_v43 }
  0xf6   : > { %1880 = vmatmul.mubr.bf16.gmra.mrb[16].mxu0 %v7738_v50  ;;  %v6587_v50 = vld [vmem:[%s9392_s2 + $0xc0] sm:$0xff]  }
  0xf7   : > { %1889 = vmatprep.mubr.bf16.mxu0 %v6915_v49 }
  0xf8   : > { %5881 = vmatpush3.bf16.msra.mxu1 %v6582_v16 }
  0xf9   : > { %5882 = vmatprep.subr.bf16.mxu1 %v6583_v3 }
  0xfc   : > { %5883 = vmatpush3.bf16.msra.mxu1 %v6584_v12 }
  0xfd   : > { %5884 = vmatprep.subr.bf16.mxu1 %v6585_v21 }
  0xfe   : > { %1890 = vmatmul.mubr.bf16.gmra.mrb[20].mxu0 %v7744_v36  ;;  %v1169_v36 = vld [vmem:[%s9395_s5] ss:$8 sm:$0x3] }
  0xff   : > { %1899 = vmatprep.mubr.bf16.mxu0 %v6915_v49  ;;  %v7903_v9 = vrot.slane %v1169_v36, %v1173_v7  ;;  %v7905_v15 = vrot.slane %v1169_v36, %v1177_v19 }
 0x100   : > { %5885 = vmatpush3.bf16.msra.mxu1 %v6586_v51 }
 0x101   : > { %5910 = vmatprep.subr.bf16.mxu1 %v6587_v50 }
 0x106   : > { %1900 = vmatmul.mubr.bf16.gmra.mrb[24].mxu0 %v7762_v33 }
 0x107   : > { %1909 = vmatprep.mubr.bf16.mxu0 %v6915_v49 }
 0x10e   : > { %1910 = vmatmul.mubr.bf16.gmra.mrb[28].mxu0 %v7773_v45 }
 0x1a9   : > { %v1841_v23 = vpop.f32.mrb[0].mxu0 }
 0x1aa   : > { %v6274_v55 = vadd.f32 %v1841_v23, %v7903_v9  ;;  %v1843_v58 = vpop.f32.mrb[1].mxu0 }
 0x1ab   : > { %v6275_v1 = vadd.f32 %v1843_v58, %v7905_v15  ;;  %v1845_v11 = vpop.f32.mrb[2].mxu0 }
 0x1ac   : > { %v1920_v54 = vmul.f32 0.5, %v6274_v55  ;;  %v6276_v40 = vadd.f32 %v1845_v11, %v7903_v9  ;;  %v1847_v33 = vpop.f32.mrb[3].mxu0 }
 0x1ad   : > { %v1921_v44 = vmul.f32 0.5, %v6275_v1  ;;  %v6277_v32 = vadd.f32 %v1847_v33, %v7905_v15 }
 0x1ae   : > { %6755 = vtanh.f32 %v1920_v54  ;;  %v1922_v27 = vmul.f32 0.5, %v6276_v40 }
 0x1af   : > { %6757 = vtanh.f32 %v1921_v44  ;;  %v1923_v34 = vmul.f32 0.5, %v6277_v32 }
 0x1b0   : > { %6759 = vtanh.f32 %v1922_v27 }
 0x1b1   : > { %6761 = vtanh.f32 %v1923_v34  ;;  %v1851_v45 = vpop.f32.mrb[4].mxu0 }
 0x1b2   : > { %v6278_v13 = vadd.f32 %v1851_v45, %v7903_v9  ;;  %v1853_v20 = vpop.f32.mrb[5].mxu0 }
 0x1b3   : > { %v6279_v38 = vadd.f32 %v1853_v20, %v7905_v15  ;;  %v1855_v2 = vpop.f32.mrb[6].mxu0 }
 0x1b4   : > { %v1924_v25 = vmul.f32 0.5, %v6278_v13  ;;  %v6280_v37 = vadd.f32 %v1855_v2, %v7903_v9  ;;  %v1857_v42 = vpop.f32.mrb[7].mxu0 }
 0x1b5   : > { %v1925_v39 = vmul.f32 0.5, %v6279_v38  ;;  %v6281_v47 = vadd.f32 %v1857_v42, %v7905_v15 }
 0x1b6   : > { %6763 = vtanh.f32 %v1924_v25  ;;  %v1926_v5 = vmul.f32 0.5, %v6280_v37 }
 0x1b7   : > { %6765 = vtanh.f32 %v1925_v39  ;;  %v1927_v56 = vmul.f32 0.5, %v6281_v47 }
 0x1b8   : > { %v6756_v52 = vpop.eup %6755  ;;  %6767 = vtanh.f32 %v1926_v5 }
 0x1b9   : > { %v6758_v24 = vpop.eup %6757  ;;  %v1984_v46 = vmul.f32 0.5, %v6756_v52  ;;  %6769 = vtanh.f32 %v1927_v56  ;;  %v1861_v17 = vpop.f32.mrb[8].mxu0 }
 0x1ba   : > { %v6760_v60 = vpop.eup %6759  ;;  %v1985_v30 = vmul.f32 0.5, %v6758_v24  ;;  %v6282_v8 = vadd.f32 %v1861_v17, %v7903_v9  ;;  %v1863_v18 = vpop.f32.mrb[9].mxu0 }
 0x1bb   : > { %v6762_v14 = vpop.eup %6761  ;;  %v1986_v49 = vmul.f32 0.5, %v6760_v60  ;;  %v6283_v29 = vadd.f32 %v1863_v18, %v7905_v15  ;;  %v1865_v61 = vpop.f32.mrb[10].mxu0  ;;  %v2016_v22 = vadd.f32 0.5, %v1984_v46 }
 0x1bc   : > { %v1987_v35 = vmul.f32 0.5, %v6762_v14  ;;  %v1928_v48 = vmul.f32 0.5, %v6282_v8  ;;  %v6284_v41 = vadd.f32 %v1865_v61, %v7903_v9  ;;  %v1867_v57 = vpop.f32.mrb[11].mxu0  ;;  %v2017_v31 = vadd.f32 0.5, %v1985_v30 }
 0x1bd   : > { %v2018_v0 = vadd.f32 0.5, %v1986_v49  ;;  %v1929_v62 = vmul.f32 0.5, %v6283_v29  ;;  %v6285_v4 = vadd.f32 %v1867_v57, %v7905_v15 }
 0x1be   : > { %v2019_v10 = vadd.f32 0.5, %v1987_v35  ;;  %6771 = vtanh.f32 %v1928_v48  ;;  %v1930_v63 = vmul.f32 0.5, %v6284_v41 }
 0x1bf   : > { %v2048_v26 = vpack.c.bf16 %v2018_v0, %v2016_v22  ;;  %6773 = vtanh.f32 %v1929_v62  ;;  %v1931_v59 = vmul.f32 0.5, %v6285_v4 }
 0x1c0   : > { %v6764_v53 = vpop.eup %6763  ;;  %v2049_v43 = vpack.c.bf16 %v2019_v10, %v2017_v31  ;;  %6775 = vtanh.f32 %v1930_v63 }
 0x1c1   : > { %v6766_v16 = vpop.eup %6765  ;;  %v2065_v3 = vshrl.u32 %v2048_v26, 16  ;;  %v7919_v12 = vrot.slane %v2048_v26, 7  ;;  %v1988_v21 = vmul.f32 0.5, %v6764_v53  ;;  %v1871_v51 = vpop.f32.mrb[12].mxu0  ;;  %6777 = vtanh.f32 %v1931_v59 }
 0x1c2   : > { %v6768_v50 = vpop.eup %6767  ;;  %v2072_v28 = vshrl.u32 %v2049_v43, 16  ;;  %v1989_v6 = vmul.f32 0.5, %v6766_v16  ;;  %v1873_v7 = vpop.f32.mrb[13].mxu0  ;;  %v2068_v23 = vshll.u32 %v2048_v26, 16  ;;  %v2075_v55 = vshll.u32 %v2049_v43, 16 }
 0x1c3   : > { %v6770_v36 = vpop.eup %6769  ;;  %v2067_v19 = vrot.slane %v2065_v3, 7  ;;  %v1875_v58 = vpop.f32.mrb[14].mxu0  ;;  %v2319_v1 = vshll.u32 %v7919_v12, 16  ;;  %v1990_v54 = vmul.f32 0.5, %v6768_v50  ;;  %v2020_v44 = vadd.f32 0.5, %v1988_v21 }
 0x1c4   : > { %v2074_v11 = vrot.slane %v2072_v28, 7  ;;  %v1991_v40 = vmul.f32 0.5, %v6770_v36  ;;  %v1877_v33 = vpop.f32.mrb[15].mxu0  ;;  %v2021_v32 = vadd.f32 0.5, %v1989_v6  ;;  %v6286_v27 = vadd.f32 %v1871_v51, %v7903_v9 }
 0x1c5   : > { %v6287_v34 = vadd.f32 %v1873_v7, %v7905_v15  ;;  %v2022_v45 = vadd.f32 0.5, %v1990_v54  ;;  %v6288_v20 = vadd.f32 %v1875_v58, %v7903_v9  ;;  %v6289_v38 = vadd.f32 %v1877_v33, %v7905_v15 }
 0x1c6   : > { %v2023_v13 = vadd.f32 0.5, %v1991_v40  ;;  %v7926_v2 = vor.u32 %v2068_v23, %v2067_v19  ;;  %v1932_v25 = vmul.f32 0.5, %v6286_v27  ;;  %v7928_v37 = vor.u32 %v2075_v55, %v2074_v11 }
 0x1c7   : > { %v7930_v39 = vrot.slane %v2319_v1, 5  ;;  %v2050_v47 = vpack.c.bf16 %v2022_v45, %v2020_v44  ;;  %v1933_v56 = vmul.f32 0.5, %v6287_v34  ;;  %v1934_v17 = vmul.f32 0.5, %v6288_v20 }
 0x1c8   : > { %v6772_v42 = vpop.eup %6771  ;;  %v7932_v5 = vpack.c.bf16 %v2023_v13, %v2021_v32  ;;  %6779 = vtanh.f32 %v1932_v25  ;;  %v7940_v30 = vrot.slane %v2049_v43, 7  ;;  %v1935_v29 = vmul.f32 0.5, %v6289_v38 }
 0x1c9   : > { %v6774_v24 = vpop.eup %6773  ;;  %v1992_v46 = vmul.f32 0.5, %v6772_v42  ;;  %v1881_v60 = vpop.f32.mrb[16].mxu0  ;;  %v2079_v18 = vshrl.u32 %v2050_v47, 16  ;;  %v7942_v14 = vrot.slane %v2050_v47, 7  ;;  %v2228_v57 = vsel %vm7936_vm3, 0, %v7928_v37 }
 0x1ca   : > { %v6776_v8 = vpop.eup %6775  ;;  %v2086_v49 = vshrl.u32 %v7932_v5, 16  ;;  %v1883_v61 = vpop.f32.mrb[17].mxu0  ;;  %v1993_v35 = vmul.f32 0.5, %v6774_v24  ;;  %v2227_v22 = vsel %vm7936_vm3, 0, %v7926_v2  ;;  %v2082_v4 = vshll.u32 %v2050_v47, 16 }
 0x1cb   : > { %v1994_v48 = vmul.f32 0.5, %v6776_v8  ;;  %v1885_v41 = vpop.f32.mrb[18].mxu0  ;;  %v6778_v0 = vpop.eup %6777  ;;  %v2081_v62 = vrot.slane %v2079_v18, 7  ;;  %v2341_v31 = vshll.u32 %v7942_v14, 16  ;;  %v2024_v10 = vadd.f32 0.5, %v1992_v46 }
 0x1cc   : > { %v1887_v63 = vpop.f32.mrb[19].mxu0  ;;  %v2088_v26 = vrot.slane %v2086_v49, 7  ;;  %v1995_v53 = vmul.f32 0.5, %v6778_v0  ;;  %6781 = vtanh.f32 %v1933_v56  ;;  %v2089_v43 = vshll.u32 %v7932_v5, 16 }
 0x1cd   : > { %v2026_v59 = vadd.f32 0.5, %v1994_v48  ;;  %v2025_v16 = vadd.f32 0.5, %v1993_v35  ;;  %6783 = vtanh.f32 %v1934_v17  ;;  %v6290_v3 = vadd.f32 %v1881_v60, %v7903_v9 }
 0x1ce   : > { %v2027_v51 = vadd.f32 0.5, %v1995_v53  ;;  %6785 = vtanh.f32 %v1935_v29  ;;  %v6291_v50 = vadd.f32 %v1883_v61, %v7905_v15  ;;  %v7955_v28 = vor.u32 %v2082_v4, %v2081_v62 }
 0x1cf   : > { %v2052_v21 = vpack.c.bf16 %v2026_v59, %v2024_v10  ;;  %v1936_v6 = vmul.f32 0.5, %v6290_v3  ;;  %v6292_v7 = vadd.f32 %v1885_v41, %v7903_v9  ;;  %v6293_v36 = vadd.f32 %v1887_v63, %v7905_v15 }
 0x1d0   : > { %v7959_v19 = vrot.slane %v2341_v31, 5  ;;  %v2053_v55 = vpack.c.bf16 %v2027_v51, %v2025_v16  ;;  %v2091_v1 = vor.u32 %v2089_v43, %v2088_v26  ;;  %v1937_v11 = vmul.f32 0.5, %v6291_v50 }
 0x1d1   : > { %v2093_v23 = vshrl.u32 %v2052_v21, 16  ;;  %v1891_v58 = vpop.f32.mrb[20].mxu0  ;;  %6787 = vtanh.f32 %v1936_v6  ;;  %v1938_v54 = vmul.f32 0.5, %v6292_v7  ;;  %v1939_v40 = vmul.f32 0.5, %v6293_v36 }
 0x1d2   : > { %v1893_v33 = vpop.f32.mrb[21].mxu0  ;;  %v6780_v44 = vpop.eup %6779  ;;  %v2096_v27 = vshll.u32 %v2052_v21, 16  ;;  %v7961_v34 = vrot.slane %v2052_v21, 7  ;;  %v2100_v45 = vshrl.u32 %v2053_v55, 16  ;;  %v2103_v20 = vshll.u32 %v2053_v55, 16 }
 0x1d3   : > { %v2095_v32 = vrot.slane %v2093_v23, 7  ;;  %v1895_v13 = vpop.f32.mrb[22].mxu0  ;;  %6789 = vtanh.f32 %v1937_v11  ;;  %v6294_v38 = vadd.f32 %v1891_v58, %v7903_v9  ;;  %v6295_v25 = vadd.f32 %v1893_v33, %v7905_v15 }
 0x1d4   : > { %v1897_v42 = vpop.f32.mrb[23].mxu0  ;;  %v7965_v47 = vrot.slane %v2053_v55, 7  ;;  %v1996_v56 = vmul.f32 0.5, %v6780_v44  ;;  %6791 = vtanh.f32 %v1938_v54  ;;  %v6296_v24 = vadd.f32 %v1895_v13, %v7903_v9 }
 0x1d5   : > { %v7974_v17 = vor.u32 %v2096_v27, %v2095_v32  ;;  %6793 = vtanh.f32 %v1939_v40  ;;  %v1940_v60 = vmul.f32 0.5, %v6294_v38  ;;  %v1941_v8 = vmul.f32 0.5, %v6295_v25 }
 0x1d6   : > { %v6782_v18 = vpop.eup %6781  ;;  %v2102_v49 = vrot.slane %v2100_v45, 7  ;;  %v1942_v29 = vmul.f32 0.5, %v6296_v24  ;;  %v6297_v61 = vadd.f32 %v1897_v42, %v7905_v15  ;;  %v7978_v35 = vrot.slane %v7932_v5, 7 }
 0x1d7   : > { %v6784_v48 = vpop.eup %6783  ;;  %v1997_v41 = vmul.f32 0.5, %v6782_v18  ;;  %6795 = vtanh.f32 %v1940_v60  ;;  %v2230_v0 = vsel %vm7936_vm3, 0, %v2091_v1  ;;  %v2247_v62 = vsel %vm7970_vm6, %v2228_v57, 0 }
 0x1d8   : > { %v6786_v4 = vpop.eup %6785  ;;  %v1998_v31 = vmul.f32 0.5, %v6784_v48  ;;  %6797 = vtanh.f32 %v1941_v8  ;;  %v1943_v10 = vmul.f32 0.5, %v6297_v61  ;;  %v2249_v5 = vsel %vm7970_vm6, %v2230_v0, 0 }
 0x1d9   : > { %v1901_v63 = vpop.f32.mrb[24].mxu0  ;;  %v2028_v26 = vadd.f32 0.5, %v1996_v56  ;;  %v1999_v59 = vmul.f32 0.5, %v6786_v4  ;;  %6799 = vtanh.f32 %v1942_v29  ;;  %v7992_v53 = vsel %vm2243_vm4, %v2247_v62, %v7940_v30 }
 0x1da   : > { %v7994_v43 = vpop.f32.mrb[25].mxu0  ;;  %v7996_v37 = vor.u32 %v2103_v20, %v2102_v49  ;;  %v2030_v57 = vadd.f32 0.5, %v1998_v31  ;;  %6801 = vtanh.f32 %v1943_v10  ;;  %v8000_v16 = vsel %vm2243_vm4, %v2249_v5, %v7978_v35 }
 0x1db   : > { %v8002_v3 = vpop.f32.mrb[26].mxu0  ;;  %v6788_v21 = vpop.eup %6787  ;;  %v2029_v51 = vadd.f32 0.5, %v1997_v41  ;;  %v2031_v50 = vadd.f32 0.5, %v1999_v59  ;;  %v9441_v6 = vshrl.u32 %v7992_v53, 16  ;;  %v2326_v7 = vshll.u32 %v7992_v53, 16 }
 0x1dc   : > { %v8006_v36 = vpop.f32.mrb[27].mxu0  ;;  %v2054_v23 = vpack.c.bf16 %v2030_v57, %v2028_v26  ;;  %v2000_v55 = vmul.f32 0.5, %v6788_v21  ;;  %v5591_v58 = vcombine.low %v7992_v53, %v8000_v16  ;;  %v2229_v1 = vsel %vm7936_vm3, 0, %v7955_v28 }
 0x1dd   : > { %v6790_v11 = vpop.eup %6789  ;;  %v2055_v54 = vpack.c.bf16 %v2031_v50, %v2029_v51  ;;  %v2345_v40 = vshrl.u32 %v8000_v16, 16  ;;  %v2348_v33 = vshll.u32 %v8000_v16, 16  ;;  %v2246_v44 = vsel %vm7970_vm6, %v2227_v22, 0 }
 0x1de   : > { %v6792_v32 = vpop.eup %6791  ;;  %v2107_v27 = vshrl.u32 %v2054_v23, 16  ;;  %v2110_v45 = vshll.u32 %v2054_v23, 16  ;;  %3434 = vmatprep.mubr.bf16.mxu1 %v5591_v58  ;;  %v2248_v28 = vsel %vm7970_vm6, %v2229_v1, 0  ;;  %v8024_v13 = vadd.f32 %v1901_v63, %v7903_v9 }
 0x1df   : > { %v6794_v20 = vpop.eup %6793  ;;  %v8026_v38 = vrot.slane %v2054_v23, 7  ;;  %v2114_v25 = vshrl.u32 %v2055_v54, 16  ;;  %v2032_v42 = vadd.f32 0.5, %v2000_v55  ;;  %v2001_v56 = vmul.f32 0.5, %v6790_v11 }
 0x1e0   : > { %v2109_v2 = vrot.slane %v2107_v27, 7  ;;  %v2002_v24 = vmul.f32 0.5, %v6792_v32  ;;  %v2003_v60 = vmul.f32 0.5, %v6794_v20  ;;  %v8030_v22 = vsel %vm2243_vm4, %v2246_v44, %v7919_v12 }
 0x1e1   : > { %v8032_v8 = vpop.f32.mrb[28].mxu0  ;;  %v6796_v18 = vpop.eup %6795  ;;  %v2116_v49 = vrot.slane %v2114_v25, 7  ;;  %v2117_v29 = vshll.u32 %v2055_v54, 16  ;;  %v2033_v61 = vadd.f32 0.5, %v2001_v56  ;;  %v9435_v48 = vshrl.u32 %v8030_v22, 16 }
 0x1e2   : > { %v1913_v41 = vpop.f32.mrb[29].mxu0  ;;  %v6798_v0 = vpop.eup %6797  ;;  %v2034_v62 = vadd.f32 0.5, %v2002_v24  ;;  %v2035_v4 = vadd.f32 0.5, %v2003_v60  ;;  %v2004_v31 = vmul.f32 0.5, %v6796_v18  ;;  %v8037_v10 = vsel %vm2243_vm4, %v2248_v28, %v7942_v14 }
 0x1e3   : > { %v8039_v5 = vpop.f32.mrb[30].mxu0  ;;  %v6800_v63 = vpop.eup %6799  ;;  %v8041_v26 = vor.u32 %v2110_v45, %v2109_v2  ;;  %v8043_v59 = vrot.slane %v2055_v54, 7  ;;  %v2005_v57 = vmul.f32 0.5, %v6798_v0  ;;  %v2315_v21 = vshll.u32 %v8030_v22, 16 }
 0x1e4   : > { %v1917_v51 = vpop.f32.mrb[31].mxu0  ;;  %v6802_v50 = vpop.eup %6801  ;;  %v8046_v23 = vor.u32 %v2117_v29, %v2116_v49  ;;  %v2056_v55 = vpack.c.bf16 %v2034_v62, %v2032_v42  ;;  %v2057_v58 = vpack.c.bf16 %v2035_v4, %v2033_v61  ;;  %v2006_v1 = vmul.f32 0.5, %v6800_v63  ;;  %v6588_v4 = vld [vmem:[%s9392_s2 + $0x80] sm:$0xff]  }
 0x1e5   : > { %v2036_v11 = vadd.f32 0.5, %v2004_v31  ;;  %v2007_v44 = vmul.f32 0.5, %v6802_v50  ;;  %v8050_v32 = vrot.slane %v9435_v48, 4  ;;  %v9439_v27 = vshrl.u32 %v8037_v10, 16 }
 0x1e6   : > { %v2121_v54 = vshrl.u32 %v2056_v55, 16  ;;  %v2128_v45 = vshrl.u32 %v2057_v58, 16  ;;  %v2037_v28 = vadd.f32 0.5, %v2005_v57  ;;  %v8055_v20 = vrot.slane %v2315_v21, 5 }
 0x1e7   : > { %v2124_v25 = vshll.u32 %v2056_v55, 16  ;;  %v8057_v56 = vrot.slane %v2056_v55, 7  ;;  %v2038_v42 = vadd.f32 0.5, %v2006_v1  ;;  %v2039_v2 = vadd.f32 0.5, %v2007_v44  ;;  %v6589_v55 = vld [vmem:[%s9392_s2 + $0xc8] sm:$0xff]  }
 0x1e8   : > { %v2123_v24 = vrot.slane %v2121_v54, 7  ;;  %v2130_v60 = vrot.slane %v2128_v45, 7  ;;  %v2131_v18 = vshll.u32 %v2057_v58, 16  ;;  %v2337_v49 = vshll.u32 %v8037_v10, 16 }
 0x1e9   : > { %v8060_v29 = vrot.slane %v2057_v58, 7  ;;  %v2058_v61 = vpack.c.bf16 %v2038_v42, %v2036_v11  ;;  %v2059_v0 = vpack.c.bf16 %v2039_v2, %v2037_v28  ;;  %v8064_v62 = vrot.slane %v9439_v27, 4 }
 0x1ea   : > { %v8069_v31 = vor.u32 %v2124_v25, %v2123_v24  ;;  %v8071_v63 = vor.u32 %v2131_v18, %v2130_v60  ;;  %v8075_v57 = vrot.slane %v2337_v49, 5  ;;  %v5590_v50 = vcombine.low %v8030_v22, %v8037_v10  ;;  %v6590_v18 = vld [vmem:[%s9392_s2 + $0x88] sm:$0xff]  }
 0x1eb   : > { %v2135_v58 = vshrl.u32 %v2058_v61, 16  ;;  %v2138_v1 = vshll.u32 %v2058_v61, 16  ;;  %v8082_v11 = vrot.slane %v2058_v61, 7  ;;  %v2142_v44 = vshrl.u32 %v2059_v0, 16 }
 0x1ec   : > { %v2145_v54 = vshll.u32 %v2059_v0, 16  ;;  %v8084_v45 = vrot.slane %v2059_v0, 7  ;;  %3435 = vmatmul.mubr.bf16.vlgmr.msra.gmra.mrb[0].mxu1 %v5590_v50  ;;  %v1944_v28 = vmul.f32 0.5, %v8024_v13  ;;  %v6299_v25 = vadd.f32 %v7994_v43, %v7905_v15 }
 0x1ed   : > { %v2137_v42 = vrot.slane %v2135_v58, 7  ;;  %v2144_v2 = vrot.slane %v2142_v44, 7  ;;  %v6300_v24 = vadd.f32 %v8002_v3, %v7903_v9  ;;  %v6301_v60 = vadd.f32 %v8006_v36, %v7905_v15  ;;  %5911 = vmatpush3.bf16.msra.mxu1 %v6588_v4  ;;  %v6591_v3 = vld [vmem:[%s9392_s2 + $0xd0] sm:$0xff]  }
 0x1ee   : > { %6803 = vtanh.f32 %v1944_v28  ;;  %v1945_v61 = vmul.f32 0.5, %v6299_v25  ;;  %v6302_v13 = vadd.f32 %v8032_v8, %v7903_v9  ;;  %v6303_v43 = vadd.f32 %v1913_v41, %v7905_v15  ;;  %5912 = vmatprep.subr.bf16.mxu1 %v6589_v55 }
 0x1ef   : > { %v2140_v0 = vor.u32 %v2138_v1, %v2137_v42  ;;  %v2147_v50 = vor.u32 %v2145_v54, %v2144_v2  ;;  %v1946_v36 = vmul.f32 0.5, %v6300_v24  ;;  %v1947_v4 = vmul.f32 0.5, %v6301_v60  ;;  %v6592_v1 = vld [vmem:[%s9392_s2 + $0x90] sm:$0xff]  }
 0x1f0   : > { %6805 = vtanh.f32 %v1945_v61  ;;  %v1948_v58 = vmul.f32 0.5, %v6302_v13  ;;  %v1949_v44 = vmul.f32 0.5, %v6303_v43  ;;  %v6304_v28 = vadd.f32 %v8039_v5, %v7903_v9  ;;  %v6594_v13 = vld [vmem:[%s9392_s2 + $0x98] sm:$0xff]  }
 0x1f1   : > { %6807 = vtanh.f32 %v1946_v36  ;;  %v6305_v8 = vadd.f32 %v1917_v51, %v7905_v15  ;;  %v2232_v41 = vsel %vm7936_vm3, 0, %v7996_v37  ;;  %v2234_v55 = vsel %vm7936_vm3, 0, %v8046_v23  ;;  %5913 = vmatpush3.bf16.msra.mxu1 %v6590_v18  ;;  %v6593_v37 = vld [vmem:[%s9392_s2 + $0xd8] sm:$0xff]  }
 0x1f2   : > { %6809 = vtanh.f32 %v1947_v4  ;;  %v1950_v54 = vmul.f32 0.5, %v6304_v28  ;;  %v2251_v9 = vsel %vm7970_vm6, %v2232_v41, 0  ;;  %v2253_v15 = vsel %vm7970_vm6, %v2234_v55, 0  ;;  %5914 = vmatprep.subr.bf16.mxu1 %v6591_v3 }
 0x1f3   : > { %6811 = vtanh.f32 %v1948_v58  ;;  %v1951_v5 = vmul.f32 0.5, %v6305_v8  ;;  %v8123_v51 = vsel %vm2243_vm4, %v2251_v9, %v7965_v47  ;;  %v8127_v23 = vsel %vm2243_vm4, %v2253_v15, %v8043_v59 }
 0x1f4   : > { %6813 = vtanh.f32 %v1949_v44  ;;  %v5601_v25 = vcombine.low %v8123_v51, %v8127_v23  ;;  %v2231_v42 = vsel %vm7936_vm3, 0, %v7974_v17  ;;  %v2233_v2 = vsel %vm7936_vm3, 0, %v8041_v26 }
 0x1f5   : > { %6815 = vtanh.f32 %v1950_v54  ;;  %v2250_v24 = vsel %vm7970_vm6, %v2231_v42, 0  ;;  %v2252_v60 = vsel %vm7970_vm6, %v2233_v2, 0  ;;  %v2236_v18 = vsel %vm7936_vm3, 0, %v8071_v63  ;;  %5915 = vmatpush3.bf16.msra.mxu1 %v6592_v1 }
 0x1f6   : > { %6817 = vtanh.f32 %v1951_v5  ;;  %3442 = vmatprep.mubr.bf16.mxu1 %v5601_v25  ;;  %v8146_v17 = vsel %vm2243_vm4, %v2250_v24, %v7961_v34  ;;  %v8150_v26 = vsel %vm2243_vm4, %v2252_v60, %v8026_v38  ;;  %v2238_v61 = vsel %vm7936_vm3, 0, %v2147_v50  ;;  %5916 = vmatprep.subr.bf16.mxu1 %v6593_v37  ;;  %v6595_v50 = vld [vmem:[%s9392_s2 + $0xe0] sm:$0xff]   ;;  %v6597_v60 = vld [vmem:[%s9392_s2 + $0xe8] sm:$0xff]  }
 0x1f7   : > { %v5600_v63 = vcombine.low %v8146_v17, %v8150_v26  ;;  %v2255_v43 = vsel %vm7970_vm6, %v2236_v18, 0  ;;  %v2257_v3 = vsel %vm7970_vm6, %v2238_v61, 0  ;;  %v2235_v36 = vsel %vm7936_vm3, 0, %v8069_v31 }
 0x1f8   : > { %v6804_v4 = vpop.eup %6803  ;;  %v8171_v58 = vsel %vm2243_vm4, %v2255_v43, %v8060_v29  ;;  %v8175_v44 = vsel %vm2243_vm4, %v2257_v3, %v8084_v45  ;;  %v2237_v28 = vsel %vm7936_vm3, 0, %v2140_v0  ;;  %v2254_v8 = vsel %vm7970_vm6, %v2235_v36, 0  ;;  %v6596_v0 = vld [vmem:[%s9392_s2 + $0xa0] sm:$0xff]  }
 0x1f9   : > { %v2008_v31 = vmul.f32 0.5, %v6804_v4  ;;  %3443 = vmatmul.mubr.bf16.gmra.mrb[4].mxu1 %v5600_v63  ;;  %v5611_v41 = vcombine.low %v8171_v58, %v8175_v44  ;;  %v2256_v55 = vsel %vm7970_vm6, %v2237_v28, 0  ;;  %v8187_v1 = vsel %vm2243_vm4, %v2254_v8, %v8057_v56 }
 0x1fa   : > { %v6806_v54 = vpop.eup %6805  ;;  %v8191_v9 = vsel %vm2243_vm4, %v2256_v55, %v8082_v11  ;;  %5917 = vmatpush3.bf16.msra.mxu1 %v6594_v13  ;;  %v2325_v15 = vrot.slane %v9441_v6, 4  ;;  %v2328_v37 = vrot.slane %v2326_v7, 5  ;;  %v2330_v5 = vshll.u32 %v7940_v30, 16 }
 0x1fb   : > { %v6808_v25 = vpop.eup %6807  ;;  %v2040_v42 = vadd.f32 0.5, %v2008_v31  ;;  %v2009_v2 = vmul.f32 0.5, %v6806_v54  ;;  %3450 = vmatprep.mubr.bf16.mxu1 %v5611_v41  ;;  %v5610_v24 = vcombine.low %v8187_v1, %v8191_v9  ;;  %5918 = vmatprep.subr.bf16.mxu1 %v6595_v50  ;;  %v2347_v18 = vrot.slane %v2345_v40, 4  ;;  %v6598_v54 = vld [vmem:[%s9392_s2 + $0xa8] sm:$0xff]  }
 0x1fc   : > { %v6810_v61 = vpop.eup %6809  ;;  %v2010_v13 = vmul.f32 0.5, %v6808_v25  ;;  %v2329_v63 = vor.u32 %v2328_v37, %v2325_v15  ;;  %v2332_v43 = vrot.slane %v2330_v5, 5  ;;  %v2350_v3 = vrot.slane %v2348_v33, 5 }
 0x1fd   : > { %v6812_v36 = vpop.eup %6811  ;;  %v2041_v4 = vadd.f32 0.5, %v2009_v2  ;;  %v2011_v28 = vmul.f32 0.5, %v6810_v61  ;;  %v2352_v8 = vshll.u32 %v7978_v35, 16  ;;  %v2318_v50 = vor.u32 %v8055_v20, %v8050_v32  ;;  %v6599_v32 = vld [vmem:[%s9392_s2 + $0xf0] sm:$0xff]  }
 0x1fe   : > { %v6814_v31 = vpop.eup %6813  ;;  %v2042_v41 = vadd.f32 0.5, %v2010_v13  ;;  %v2012_v55 = vmul.f32 0.5, %v6812_v36  ;;  %5919 = vmatpush3.bf16.msra.mxu1 %v6596_v0  ;;  %v8217_v15 = vsel %vm2311_vm7, %v2329_v63, %v2332_v43  ;;  %v2351_v37 = vor.u32 %v2350_v3, %v2347_v18 }
 0x1ff   : > { %v6816_v5 = vpop.eup %6815  ;;  %v2043_v25 = vadd.f32 0.5, %v2011_v28  ;;  %v2013_v2 = vmul.f32 0.5, %v6814_v31  ;;  %5920 = vmatprep.subr.bf16.mxu1 %v6597_v60  ;;  %v2354_v20 = vrot.slane %v2352_v8, 5  ;;  %v8224_v0 = vsel %vm2311_vm7, %v2318_v50, %v7930_v39 }
 0x200   : > { %v6818_v61 = vpop.eup %6817  ;;  %v2060_v13 = vpack.c.bf16 %v2042_v41, %v2040_v42  ;;  %v2044_v36 = vadd.f32 0.5, %v2012_v55  ;;  %v2014_v48 = vmul.f32 0.5, %v6816_v5  ;;  %v2340_v18 = vor.u32 %v8075_v57, %v8064_v62  ;;  %v6600_v42 = vld [vmem:[%s9392_s2 + $0xb0] sm:$0xff]  }
 0x201   : > { %v2061_v63 = vpack.c.bf16 %v2043_v25, %v2041_v4  ;;  %v2045_v43 = vadd.f32 0.5, %v2013_v2  ;;  %v2015_v3 = vmul.f32 0.5, %v6818_v61  ;;  %3451 = vmatmul.mubr.bf16.gmra.mrb[8].mxu1 %v5610_v24  ;;  %v8229_v60 = vsel %vm2311_vm7, %v2351_v37, %v2354_v20  ;;  %v6601_v24 = vld [vmem:[%s9392_s2 + $0xf8] sm:$0xff]  }
 0x202   : > { %v2149_v28 = vshrl.u32 %v2060_v13, 16  ;;  %v2152_v8 = vshll.u32 %v2060_v13, 16  ;;  %v8231_v31 = vrot.slane %v2060_v13, 7  ;;  %v2046_v39 = vadd.f32 0.5, %v2014_v48  ;;  %5921 = vmatpush3.bf16.msra.mxu1 %v6598_v54 }
 0x203   : > { %v2156_v50 = vshrl.u32 %v2061_v63, 16  ;;  %v2159_v41 = vshll.u32 %v2061_v63, 16  ;;  %v8236_v62 = vrot.slane %v2061_v63, 7  ;;  %v2047_v57 = vadd.f32 0.5, %v2015_v3  ;;  %5922 = vmatprep.subr.bf16.mxu1 %v6599_v32 }
 0x204   : > { %v2151_v4 = vrot.slane %v2149_v28, 7  ;;  %v2062_v55 = vpack.c.bf16 %v2046_v39, %v2044_v36  ;;  %v5593_v48 = vcombine.low %v8217_v15, %v8229_v60  ;;  %v8245_v54 = vsel %vm2311_vm7, %v2340_v18, %v7959_v19  ;;  %v6602_v36 = vld [vmem:[%s9392_s2 + $0xb8] sm:$0xff]  }
 0x205   : > { %v2158_v37 = vrot.slane %v2156_v50, 7  ;;  %v2063_v5 = vpack.c.bf16 %v2047_v57, %v2045_v43  ;;  %v5592_v25 = vcombine.low %v8224_v0, %v8245_v54  ;;  %v9436_v2 = vshrl.u32 %v8123_v51, 16  ;;  %v6603_v43 = vld [vmem:[%s9392_s2 + $0x140] sm:$0xff]   ;;  %v6607_v54 = vld [vmem:[%s9392_s2 + $0x150] sm:$0xff]  }
 0x206   : > { %v2154_v32 = vor.u32 %v2152_v8, %v2151_v4  ;;  %v2163_v20 = vshrl.u32 %v2062_v55, 16  ;;  %v2166_v61 = vshll.u32 %v2062_v55, 16  ;;  %v8250_v13 = vrot.slane %v2062_v55, 7  ;;  %5923 = vmatpush3.bf16.msra.mxu1 %v6600_v42 }
 0x207   : > { %v2161_v63 = vor.u32 %v2159_v41, %v2158_v37  ;;  %v2170_v19 = vshrl.u32 %v2063_v5, 16  ;;  %v2173_v18 = vshll.u32 %v2063_v5, 16  ;;  %v8255_v3 = vrot.slane %v2063_v5, 7  ;;  %5924 = vmatprep.subr.bf16.mxu1 %v6601_v24 }
 0x208   : > { %v2165_v28 = vrot.slane %v2163_v20, 7  ;;  %v2239_v8 = vsel %vm7936_vm3, 0, %v2154_v32  ;;  %v2369_v39 = vrot.slane %v9436_v2, 4  ;;  %v9440_v42 = vshll.u32 %v8123_v51, 16 }
 0x209   : > { %v2172_v50 = vrot.slane %v2170_v19, 7  ;;  %v2240_v41 = vsel %vm7936_vm3, 0, %v2161_v63  ;;  %v2258_v57 = vsel %vm7970_vm6, %v2239_v8, 0  ;;  %v2374_v24 = vshll.u32 %v7965_v47, 16 }
 0x20a   : > { %v2168_v4 = vor.u32 %v2166_v61, %v2165_v28  ;;  %v2259_v55 = vsel %vm7970_vm6, %v2240_v41, 0  ;;  %v8274_v37 = vsel %vm2243_vm4, %v2258_v57, %v8231_v31  ;;  %5925 = vmatpush3.bf16.msra.mxu1 %v6602_v36  ;;  %v2372_v5 = vrot.slane %v9440_v42, 5 }
 0x20b   : > { %v2175_v32 = vor.u32 %v2173_v18, %v2172_v50  ;;  %v8280_v20 = vsel %vm2243_vm4, %v2259_v55, %v8236_v62  ;;  %5950 = vmatprep.subr.bf16.mxu1 %v6603_v43  ;;  %v2376_v63 = vrot.slane %v2374_v24, 5  ;;  %v9438_v61 = vshrl.u32 %v8127_v23, 16 }
 0x20c   : > { %v2241_v19 = vsel %vm7936_vm3, 0, %v2168_v4  ;;  %v2373_v28 = vor.u32 %v2372_v5, %v2369_v39  ;;  %v9457_v8 = vshll.u32 %v8127_v23, 16  ;;  %v2396_v36 = vshll.u32 %v8043_v59, 16 }
 0x20d   : > { %v2242_v41 = vsel %vm7936_vm3, 0, %v2175_v32  ;;  %v2260_v18 = vsel %vm7970_vm6, %v2241_v19, 0  ;;  %v2391_v43 = vrot.slane %v9438_v61, 4  ;;  %v9437_v50 = vshrl.u32 %v8146_v17, 16 }
 0x20e   : > { %v2261_v57 = vsel %vm7970_vm6, %v2242_v41, 0  ;;  %v8298_v39 = vsel %vm2243_vm4, %v2260_v18, %v8250_v13  ;;  %v2377_v24 = vsel %vm2311_vm7, %v2373_v28, %v2376_v63  ;;  %v2394_v52 = vrot.slane %v9457_v8, 5 }
 0x20f   : > { %v8305_v4 = vsel %vm2243_vm4, %v2261_v57, %v8255_v3  ;;  %v5620_v55 = vcombine.low %v8274_v37, %v8298_v39  ;;  %v2398_v5 = vrot.slane %v2396_v36, 5  ;;  %v2358_v46 = vrot.slane %v9437_v50, 4 }
 0x210   : > { %v5621_v32 = vcombine.low %v8280_v20, %v8305_v4  ;;  %v2395_v19 = vor.u32 %v2394_v52, %v2391_v43  ;;  %v9450_v63 = vshll.u32 %v8146_v17, 16  ;;  %v2363_v28 = vshll.u32 %v7961_v34, 16 }
 0x211   : > { %v9442_v41 = vshrl.u32 %v8150_v26, 16  ;;  %v9449_v18 = vshll.u32 %v8150_v26, 16  ;;  %v2385_v57 = vshll.u32 %v8026_v38, 16  ;;  %v9443_v2 = vshrl.u32 %v8171_v58, 16 }
 0x212   : > { %3458 = vmatprep.mubr.bf16.mxu1 %v5621_v32  ;;  %v2399_v36 = vsel %vm2311_vm7, %v2395_v19, %v2398_v5  ;;  %v2361_v50 = vrot.slane %v9450_v63, 5  ;;  %v2365_v61 = vrot.slane %v2363_v28, 5  ;;  %v9444_v43 = vshll.u32 %v8171_v58, 16 }
 0x213   : > { %3459 = vmatmul.mubr.bf16.gmra.mrb[12].mxu1 %v5620_v55  ;;  %v5603_v52 = vcombine.low %v2377_v24, %v2399_v36  ;;  %v2380_v27 = vrot.slane %v9442_v41, 4  ;;  %v2383_v42 = vrot.slane %v9449_v18, 5  ;;  %v2387_v6 = vrot.slane %v2385_v57, 5 }
 0x214   : > { %3499 = vmatprep.mubr.bf16.mxu1 %v5593_v48  ;;  %v2362_v5 = vor.u32 %v2361_v50, %v2358_v46  ;;  %v2413_v32 = vrot.slane %v9443_v2, 4  ;;  %v2416_v19 = vrot.slane %v9444_v43, 5  ;;  %v2418_v24 = vshll.u32 %v8060_v29, 16  ;;  %v6604_v2 = vld [vmem:[%s9392_s2 + $0x100] sm:$0xff]  }
 0x215   : > { %v2384_v55 = vor.u32 %v2383_v42, %v2380_v27  ;;  %v9446_v28 = vshrl.u32 %v8175_v44, 16  ;;  %v9448_v36 = vshll.u32 %v8175_v44, 16  ;;  %v2440_v57 = vshll.u32 %v8084_v45, 16 }
 0x216   : > { %v2366_v41 = vsel %vm2311_vm7, %v2362_v5, %v2365_v61  ;;  %v2417_v15 = vor.u32 %v2416_v19, %v2413_v32  ;;  %v2420_v60 = vrot.slane %v2418_v24, 5  ;;  %v9445_v48 = vshrl.u32 %v8187_v1, 16 }
 0x217   : > { %v2388_v50 = vsel %vm2311_vm7, %v2384_v55, %v2387_v6  ;;  %v2435_v46 = vrot.slane %v9446_v28, 4  ;;  %v2438_v27 = vrot.slane %v9448_v36, 5  ;;  %v2442_v42 = vrot.slane %v2440_v57, 5  ;;  %v6605_v6 = vld [vmem:[%s9392_s2 + $0x148] sm:$0xff]  }
 0x218   : > { %v5602_v43 = vcombine.low %v2366_v41, %v2388_v50  ;;  %v2421_v61 = vsel %vm2311_vm7, %v2417_v15, %v2420_v60  ;;  %v2402_v5 = vrot.slane %v9445_v48, 4  ;;  %v9447_v32 = vshll.u32 %v8187_v1, 16 }
 0x219   : > { %v2439_v19 = vor.u32 %v2438_v27, %v2435_v46  ;;  %v2407_v24 = vshll.u32 %v8057_v56, 16  ;;  %v9451_v55 = vshrl.u32 %v8191_v9, 16  ;;  %v9452_v57 = vshll.u32 %v8191_v9, 16 }
 0x21a   : > { %v2405_v41 = vrot.slane %v9447_v32, 5  ;;  %v2429_v15 = vshll.u32 %v8082_v11, 16  ;;  %v9455_v60 = vshrl.u32 %v8280_v20, 16  ;;  %v9456_v50 = vshll.u32 %v8280_v20, 16  ;;  %v6606_v32 = vld [vmem:[%s9392_s2 + $0x108] sm:$0xff]  }
 0x21b   : > { %3500 = vmatmul.mubr.bf16.vlgmr.msra.gmra.mrb[16].mxu1 %v5592_v25  ;;  %v2443_v46 = vsel %vm2311_vm7, %v2439_v19, %v2442_v42  ;;  %v2409_v27 = vrot.slane %v2407_v24, 5  ;;  %v2424_v48 = vrot.slane %v9451_v55, 4  ;;  %v2427_v28 = vrot.slane %v9452_v57, 5  ;;  %v6609_v57 = vld [vmem:[%s9392_s2 + $0x158] sm:$0xff]  }
 0x21c   : > { %3507 = vmatprep.mubr.bf16.mxu1 %v5603_v52  ;;  %5951 = vmatpush3.bf16.msra.mxu1 %v6604_v2  ;;  %v5613_v36 = vcombine.low %v2421_v61, %v2443_v46  ;;  %v2406_v18 = vor.u32 %v2405_v41, %v2402_v5  ;;  %v2431_v63 = vrot.slane %v2429_v15, 5  ;;  %v2457_v0 = vrot.slane %v9455_v60, 4 }
 0x21d   : > { %5952 = vmatprep.subr.bf16.mxu1 %v6605_v6  ;;  %v2428_v25 = vor.u32 %v2427_v28, %v2424_v48  ;;  %v2460_v52 = vrot.slane %v9456_v50, 5  ;;  %v2462_v2 = vshll.u32 %v8236_v62, 16  ;;  %v9453_v42 = vshrl.u32 %v8305_v4, 16  ;;  %v6608_v48 = vld [vmem:[%s9392_s2 + $0x110] sm:$0xff]  }
 0x21e   : > { %v2480_v61 = vshll.u32 %v8305_v4, 16  ;;  %v2484_v5 = vshll.u32 %v8255_v3, 16  ;;  %v9454_v19 = vshrl.u32 %v8274_v37, 16  ;;  %v2410_v6 = vsel %vm2311_vm7, %v2406_v18, %v2409_v27 }
 0x21f   : > { %v2432_v24 = vsel %vm2311_vm7, %v2428_v25, %v2431_v63  ;;  %v2479_v28 = vrot.slane %v9453_v42, 4  ;;  %v2461_v15 = vor.u32 %v2460_v52, %v2457_v0  ;;  %v2464_v46 = vrot.slane %v2462_v2, 5 }
 0x220   : > { %5953 = vmatpush3.bf16.msra.mxu1 %v6606_v32  ;;  %v5612_v41 = vcombine.low %v2410_v6, %v2432_v24  ;;  %v2482_v55 = vrot.slane %v2480_v61, 5  ;;  %v2486_v18 = vrot.slane %v2484_v5, 5  ;;  %v2446_v63 = vrot.slane %v9454_v19, 4  ;;  %v6610_v5 = vld [vmem:[%s9392_s2 + $0x118] sm:$0xff]  }
 0x221   : > { %5954 = vmatprep.subr.bf16.mxu1 %v6607_v54  ;;  %v2447_v27 = vshll.u32 %v8274_v37, 16  ;;  %v2466_v32 = vshrl.u32 %v8298_v39, 16  ;;  %v2451_v42 = vshll.u32 %v8231_v31, 16  ;;  %v2469_v0 = vshll.u32 %v8298_v39, 16 }
 0x222   : > { %v2483_v25 = vor.u32 %v2482_v55, %v2479_v28  ;;  %v2473_v52 = vshll.u32 %v8250_v13, 16  ;;  %v2465_v6 = vsel %vm2311_vm7, %v2461_v15, %v2464_v46  ;;  %v6611_v28 = vld [vmem:[%s9392_s2 + $0x160] sm:$0xff]   ;;  %v2490_v8 = vrot.slane %v2326_v7, 1 }
 0x223   : > { %3508 = vmatmul.mubr.bf16.gmra.mrb[20].mxu1 %v5602_v43  ;;  %v2449_v54 = vrot.slane %v2447_v27, 5  ;;  %v2468_v2 = vrot.slane %v2466_v32, 4  ;;  %v2471_v55 = vrot.slane %v2469_v0, 5  ;;  %v2492_v7 = vrot.slane %v2337_v49, 1 }
 0x224   : > { %3515 = vmatprep.mubr.bf16.mxu1 %v5613_v36  ;;  %5955 = vmatpush3.bf16.msra.mxu1 %v6608_v48  ;;  %v2487_v24 = vsel %vm2311_vm7, %v2483_v25, %v2486_v18  ;;  %v2494_v36 = vrot.slane %v2348_v33, 1  ;;  %v2453_v48 = vrot.slane %v2451_v42, 5  ;;  %v2475_v50 = vrot.slane %v2473_v52, 5  ;;  %v6613_v33 = vld [vmem:[%s9392_s2 + $0x168] sm:$0xff]  }
 0x225   : > { %5956 = vmatprep.subr.bf16.mxu1 %v6609_v57  ;;  %v5623_v19 = vcombine.low %v2465_v6, %v2487_v24  ;;  %v2450_v43 = vor.u32 %v2449_v54, %v2446_v63  ;;  %v2472_v60 = vor.u32 %v2471_v55, %v2468_v2  ;;  %v6612_v57 = vld [vmem:[%s9392_s2 + $0x120] sm:$0xff]   ;;  %v2488_v63 = vrot.slane %v2315_v21, 1  ;;  %v6615_v55 = vld [vmem:[%s9392_s2 + $0x170] sm:$0xff]  }
 0x226   : > { %v2495_v18 = vor.u32 %v2494_v36, %v2345_v40  ;;  %v9535_v25 = vshll.u32 %v8127_v23, 16  ;;  %v9537_v2 = vshll.u32 %v8123_v51, 16  ;;  %v9538_v40 = vshll.u32 %v8280_v20, 16 }
 0x227   : > { %v2454_v15 = vsel %vm2311_vm7, %v2450_v43, %v2453_v48  ;;  %v2476_v46 = vsel %vm2311_vm7, %v2472_v60, %v2475_v50  ;;  %v2538_v60 = vrot.slane %v7919_v12, 5  ;;  %v9536_v50 = vshrl.u32 %v7992_v53, 16  ;;  %v6614_v12 = vld [vmem:[%s9392_s2 + $0x128] sm:$0xff]  }
 0x228   : > { %5957 = vmatpush3.bf16.msra.mxu1 %v6610_v5  ;;  %v5622_v42 = vcombine.low %v2454_v15, %v2476_v46  ;;  %v2502_v52 = vrot.slane %v9535_v25, 1  ;;  %v2498_v5 = vrot.slane %v9537_v2, 1  ;;  %v2514_v6 = vrot.slane %v9538_v40, 1 }
 0x229   : > { %5958 = vmatprep.subr.bf16.mxu1 %v6611_v28  ;;  %v2491_v54 = vor.u32 %v2490_v8, %v9536_v50  ;;  %v2537_v49 = vrot.slane %v8030_v22, 5  ;;  %v2543_v21 = vrot.slane %v8037_v10, 5  ;;  %v2512_v24 = vrot.slane %v2447_v27, 1 }
 0x22a   : > { %v2544_v8 = vrot.slane %v7942_v14, 5  ;;  %v9539_v43 = vshrl.u32 %v8037_v10, 16  ;;  %v9540_v48 = vshrl.u32 %v8030_v22, 16  ;;  %v9542_v14 = vshrl.u32 %v8280_v20, 16 }
 0x22b   : > { %3516 = vmatmul.mubr.bf16.gmra.mrb[24].mxu1 %v5612_v41  ;;  %v2518_v41 = vrot.slane %v2480_v61, 1  ;;  %v5595_v28 = vcombine.low %v2491_v54, %v2495_v18  ;;  %v9541_v61 = vshrl.u32 %v8127_v23, 16  ;;  %v9543_v46 = vshrl.u32 %v8305_v4, 16  ;;  %v6616_v54 = vld [vmem:[%s9392_s2 + $0x130] sm:$0xff]  }
 0x22c   : > { %3523 = vmatprep.mubr.bf16.mxu1 %v5623_v19  ;;  %5959 = vmatpush3.bf16.msra.mxu1 %v6612_v57  ;;  %v8449_v36 = vor.u32 %v2492_v7, %v9539_v43  ;;  %v2516_v19 = vrot.slane %v2469_v0, 1  ;;  %v8453_v57 = vor.u32 %v2488_v63, %v9540_v48  ;;  %v8461_v15 = vor.u32 %v2514_v6, %v9542_v14 }
 0x22d   : > { %5960 = vmatprep.subr.bf16.mxu1 %v6613_v33  ;;  %v8457_v27 = vor.u32 %v2502_v52, %v9541_v61  ;;  %v8465_v33 = vor.u32 %v2518_v41, %v9543_v46  ;;  %v9544_v18 = vshrl.u32 %v8123_v51, 16  ;;  %v9545_v0 = vshll.u32 %v8146_v17, 16 }
 0x22e   : > { %v9546_v25 = vshrl.u32 %v8274_v37, 16  ;;  %v8479_v50 = vor.u32 %v2516_v19, %v2466_v32  ;;  %v9547_v2 = vshll.u32 %v8150_v26, 16  ;;  %v8491_v6 = vsel %vm2536_vm8, %v2537_v49, %v2538_v60  ;;  %v6617_v32 = vld [vmem:[%s9392_s2 + $0x178] sm:$0xff]  }
 0x22f   : > { %v8469_v7 = vor.u32 %v2498_v5, %v9544_v18  ;;  %v8473_v63 = vrot.slane %v9545_v0, 1  ;;  %v5625_v5 = vcombine.low %v8461_v15, %v8465_v33  ;;  %v8494_v41 = vsel %vm2536_vm8, %v2543_v21, %v2544_v8  ;;  %v6632_v15 = vld [vmem:[%s9392_s2 + $0x1b0] sm:$0xff]  }
 0x230   : > { %v8477_v52 = vor.u32 %v2512_v24, %v9546_v25  ;;  %5961 = vmatpush3.bf16.msra.mxu1 %v6614_v12  ;;  %v8486_v40 = vrot.slane %v9547_v2, 1  ;;  %v5594_v12 = vcombine.low %v8453_v57, %v8449_v36  ;;  %v5596_v43 = vcombine.low %v8491_v6, %v8494_v41  ;;  %v6640_v6 = vld [vmem:[%s9392_s2 + $0x210] sm:$0xff]   ;;  %v6641_v41 = vld [vmem:[%s9392_s2 + $0x258] sm:$0xff]  }
 0x231   : > { %5962 = vmatprep.subr.bf16.mxu1 %v6615_v55  ;;  %v2552_v60 = vrot.slane %v8123_v51, 5  ;;  %v5605_v49 = vcombine.low %v8469_v7, %v8457_v27  ;;  %v2553_v21 = vrot.slane %v7965_v47, 5  ;;  %v2558_v8 = vrot.slane %v8127_v23, 5  ;;  %v6618_v47 = vld [vmem:[%s9392_s2 + $0x138] sm:$0xff]  }
 0x232   : > { %v5624_v24 = vcombine.low %v8477_v52, %v8479_v50  ;;  %v2559_v55 = vrot.slane %v8043_v59, 5  ;;  %v9548_v36 = vshll.u32 %v8175_v44, 16  ;;  %v2549_v48 = vrot.slane %v8146_v17, 5  ;;  %v6637_v52 = vld [vmem:[%s9392_s2 + $0x248] sm:$0xff]  }
 0x233   : > { %3524 = vmatmul.mubr.bf16.gmra.mrb[28].mxu1 %v5622_v42  ;;  %v2550_v57 = vrot.slane %v7961_v34, 5  ;;  %v2555_v61 = vrot.slane %v8150_v26, 5  ;;  %v8520_v27 = vsel %vm2536_vm8, %v2552_v60, %v2553_v21  ;;  %v2556_v42 = vrot.slane %v8026_v38, 5  ;;  %v6619_v34 = vld [vmem:[%s9392_s2 + $0x1c0] sm:$0xff]   ;;  %v6638_v50 = vld [vmem:[%s9392_s2 + $0x208] sm:$0xff]  }
 0x234   : > { %v2510_v19 = vrot.slane %v9548_v36, 1  ;;  %5963 = vmatpush3.bf16.msra.mxu1 %v6616_v54  ;;  %3564 = vmatprep.mubr.bf16.mxu1 %v5595_v28  ;;  %v8523_v59 = vsel %vm2536_vm8, %v2558_v8, %v2559_v55  ;;  %v2564_v14 = vrot.slane %v8171_v58, 5  ;;  %v2565_v18 = vrot.slane %v8060_v29, 5  ;;  %v6620_v21 = vld [vmem:[%s9392_s2 + $0x180] sm:$0xff]  }
 0x235   : > { %5964 = vmatprep.subr.bf16.mxu1 %v6617_v32  ;;  %v5607_v28 = vcombine.low %v8520_v27, %v8523_v59  ;;  %v8533_v46 = vsel %vm2536_vm8, %v2549_v48, %v2550_v57  ;;  %v2570_v7 = vrot.slane %v8175_v44, 5  ;;  %v8538_v0 = vsel %vm2536_vm8, %v2555_v61, %v2556_v42  ;;  %v6643_v27 = vld [vmem:[%s9392_s2 + $0x260] sm:$0xff]  }
 0x236   : > { %v2571_v38 = vrot.slane %v8084_v45, 5  ;;  %v2561_v25 = vrot.slane %v8187_v1, 5  ;;  %v2562_v54 = vrot.slane %v8057_v56, 5  ;;  %v5606_v2 = vcombine.low %v8533_v46, %v8538_v0  ;;  %v6644_v59 = vld [vmem:[%s9392_s2 + $0x220] sm:$0xff]   ;;  %v6646_v46 = vld [vmem:[%s9392_s2 + $0x228] sm:$0xff]   ;;  %v6647_v0 = vld [vmem:[%s9392_s2 + $0x270] sm:$0xff]  }
 0x237   : > { %v8546_v32 = vsel %vm2536_vm8, %v2564_v14, %v2565_v18  ;;  %v2567_v60 = vrot.slane %v8191_v9, 5  ;;  %v2568_v29 = vrot.slane %v8082_v11, 5  ;;  %v2576_v8 = vrot.slane %v8280_v20, 5  ;;  %v6621_v11 = vld [vmem:[%s9392_s2 + $0x1c8] sm:$0xff]  }
 0x238   : > { %5965 = vmatpush3.bf16.msra.mxu1 %v6618_v47  ;;  %v8554_v45 = vsel %vm2536_vm8, %v2570_v7, %v2571_v38  ;;  %v8557_v56 = vsel %vm2536_vm8, %v2561_v25, %v2562_v54  ;;  %v2577_v55 = vrot.slane %v8236_v62, 5  ;;  %v2582_v57 = vrot.slane %v8305_v4, 5 }
 0x239   : > { %5990 = vmatprep.subr.bf16.mxu1 %v6619_v34  ;;  %v5617_v36 = vcombine.low %v8546_v32, %v8554_v45  ;;  %v8567_v48 = vsel %vm2536_vm8, %v2567_v60, %v2568_v29  ;;  %v2583_v61 = vrot.slane %v8255_v3, 5  ;;  %v2573_v42 = vrot.slane %v8274_v37, 5  ;;  %v6622_v3 = vld [vmem:[%s9392_s2 + $0x188] sm:$0xff]   ;;  %v6648_v32 = vld [vmem:[%s9392_s2 + $0x230] sm:$0xff]  }
 0x23a   : > { %v5616_v47 = vcombine.low %v8557_v56, %v8567_v48  ;;  %v8574_v62 = vsel %vm2536_vm8, %v2576_v8, %v2577_v55  ;;  %v2574_v14 = vrot.slane %v8231_v31, 5  ;;  %v2579_v18 = vrot.slane %v8298_v39, 5  ;;  %v6649_v56 = vld [vmem:[%s9392_s2 + $0x278] sm:$0xff]  }
 0x23b   : > { %3565 = vmatmul.mubr.bf16.vlgmr.msra.gmra.mrb[32].mxu1 %v5594_v12  ;;  %v8579_v34 = vsel %vm2536_vm8, %v2582_v57, %v2583_v61  ;;  %v2580_v7 = vrot.slane %v8250_v13, 5  ;;  %v9549_v38 = vshrl.u32 %v8150_v26, 16  ;;  %v9550_v31 = vshll.u32 %v8171_v58, 16  ;;  %v6623_v13 = vld [vmem:[%s9392_s2 + $0x1d0] sm:$0xff]  }
 0x23c   : > { %3572 = vmatprep.mubr.bf16.mxu1 %v5605_v49  ;;  %5991 = vmatpush3.bf16.msra.mxu1 %v6620_v21  ;;  %v5627_v54 = vcombine.low %v8574_v62, %v8579_v34  ;;  %v8594_v60 = vsel %vm2536_vm8, %v2573_v42, %v2574_v14  ;;  %v9551_v29 = vshrl.u32 %v8146_v17, 16  ;;  %v9552_v21 = vshrl.u32 %v8175_v44, 16  ;;  %v6624_v42 = vld [vmem:[%s9392_s2 + $0x190] sm:$0xff]  }
 0x23d   : > { %v2501_v25 = vor.u32 %v8486_v40, %v9549_v38  ;;  %v2506_v12 = vrot.slane %v9550_v31, 1  ;;  %5992 = vmatprep.subr.bf16.mxu1 %v6621_v11  ;;  %v8600_v49 = vsel %vm2536_vm8, %v2579_v18, %v2580_v7  ;;  %v9553_v11 = vshrl.u32 %v8171_v58, 16 }
 0x23e   : > { %v2497_v40 = vor.u32 %v8473_v63, %v9551_v29  ;;  %v2511_v8 = vor.u32 %v2510_v19, %v9552_v21  ;;  %v5626_v55 = vcombine.low %v8594_v60, %v8600_v49  ;;  %v9554_v14 = vshll.u32 %v8191_v9, 16  ;;  %v6625_v63 = vld [vmem:[%s9392_s2 + $0x1d8] sm:$0xff]  }
 0x23f   : > { %v2507_v61 = vor.u32 %v2506_v12, %v9553_v11  ;;  %v2598_v19 = vrot.slane %v8280_v20, 1  ;;  %v2600_v7 = vrot.slane %v8305_v4, 1  ;;  %v2599_v38 = vrot.slane %v8298_v39, 1  ;;  %v6626_v20 = vld [vmem:[%s9392_s2 + $0x198] sm:$0xff]   ;;  %v6627_v39 = vld [vmem:[%s9392_s2 + $0x1e0] sm:$0xff]   ;;  %v6629_v11 = vld [vmem:[%s9392_s2 + $0x1e8] sm:$0xff]  }
 0x240   : > { %5993 = vmatpush3.bf16.msra.mxu1 %v6622_v3  ;;  %v5604_v57 = vcombine.low %v2497_v40, %v2501_v25  ;;  %v2508_v18 = vrot.slane %v9554_v14, 1  ;;  %v2597_v3 = vrot.slane %v8274_v37, 1  ;;  %v9555_v31 = vshll.u32 %v8187_v1, 16  ;;  %v6631_v14 = vld [vmem:[%s9392_s2 + $0x1f0] sm:$0xff]  }
 0x241   : > { %5994 = vmatprep.subr.bf16.mxu1 %v6623_v13  ;;  %v5615_v25 = vcombine.low %v2507_v61, %v2511_v8  ;;  %v8625_v29 = vcombine.low %v2598_v19, %v2600_v7  ;;  %v9556_v37 = vshrl.u32 %v8191_v9, 16  ;;  %v9557_v40 = vshrl.u32 %v8187_v1, 16  ;;  %v6628_v8 = vld [vmem:[%s9392_s2 + $0x1a0] sm:$0xff]  }
 0x242   : > { %v2504_v12 = vrot.slane %v9555_v31, 1  ;;  %v8627_v13 = vcombine.low %v2597_v3, %v2599_v38  ;;  %v2546_v61 = vrot.slane %v8000_v16, 5  ;;  %v2541_v19 = vrot.slane %v7940_v30, 5  ;;  %v6634_v30 = vld [vmem:[%s9392_s2 + $0x1b8] sm:$0xff]   ;;  %v6636_v38 = vld [vmem:[%s9392_s2 + $0x200] sm:$0xff]  }
 0x243   : > { %3573 = vmatmul.mubr.bf16.gmra.mrb[36].mxu1 %v5604_v57  ;;  %v2509_v4 = vor.u32 %v2508_v18, %v9556_v37  ;;  %v2540_v18 = vrot.slane %v7992_v53, 5  ;;  %v2586_v45 = vrot.slane %v7992_v53, 1  ;;  %v2587_v48 = vrot.slane %v8037_v10, 1 }
 0x244   : > { %3580 = vmatprep.mubr.bf16.mxu1 %v5615_v25  ;;  %5995 = vmatpush3.bf16.msra.mxu1 %v6624_v42  ;;  %v2505_v21 = vor.u32 %v2504_v12, %v9557_v40  ;;  %v6630_v42 = vld [vmem:[%s9392_s2 + $0x1a8] sm:$0xff]   ;;  %v2592_v53 = vrot.slane %v8127_v23, 1  ;;  %v2590_v62 = vrot.slane %v8123_v51, 1  ;;  %v2591_v60 = vrot.slane %v8150_v26, 1 }
 0x245   : > { %5996 = vmatprep.subr.bf16.mxu1 %v6625_v63  ;;  %v2547_v63 = vrot.slane %v7978_v35, 5  ;;  %v2542_v33 = vsel %vm2536_vm8, %v2540_v18, %v2541_v19  ;;  %v6635_v35 = vld [vmem:[%s9392_s2 + $0x240] sm:$0xff]   ;;  %v2596_v49 = vrot.slane %v8175_v44, 1  ;;  %v2594_v25 = vrot.slane %v8171_v58, 1 }
 0x246   : > { %v5614_v57 = vcombine.low %v2505_v21, %v2509_v4  ;;  %v2593_v51 = vrot.slane %v8187_v1, 1 }
 0x247   : > { %v2548_v7 = vsel %vm2536_vm8, %v2546_v61, %v2547_v63  ;;  %v5619_v31 = vcombine.low %v2594_v25, %v2596_v49  ;;  %v6662_v49 = vld [vmem:[%s9393_s3 + $0x118] sm:$0xff]  }
 0x248   : > { %5997 = vmatpush3.bf16.msra.mxu1 %v6626_v20  ;;  %v5597_v3 = vcombine.low %v2542_v33, %v2548_v7  ;;  %v6651_v7 = vld [vmem:[%s9393_s3 + $0x40] sm:$0xff]  }
 0x249   : > { %5998 = vmatprep.subr.bf16.mxu1 %v6627_v39 }
 0x24b   : > { %3581 = vmatmul.mubr.bf16.gmra.mrb[40].mxu1 %v5614_v57 }
 0x24c   : > { %3588 = vmatprep.mubr.bf16.mxu1 %v5625_v5  ;;  %5999 = vmatpush3.bf16.msra.mxu1 %v6628_v8  ;;  %v6633_v5 = vld [vmem:[%s9392_s2 + $0x1f8] sm:$0xff]  }
 0x24d   : > { %6000 = vmatprep.subr.bf16.mxu1 %v6629_v11 }
 0x250   : > { %6001 = vmatpush3.bf16.msra.mxu1 %v6630_v42 }
 0x251   : > { %6002 = vmatprep.subr.bf16.mxu1 %v6631_v14 }
 0x253   : > { %3589 = vmatmul.mubr.bf16.gmra.mrb[44].mxu1 %v5624_v24  ;;  %v6639_v24 = vld [vmem:[%s9392_s2 + $0x250] sm:$0xff]  }
 0x254   : > { %6003 = vmatpush3.bf16.msra.mxu1 %v6632_v15  ;;  %3629 = vmatprep.mubr.bf16.mxu1 %v5597_v3  ;;  %v8767_v15 = vld [vmem:[%s9395_s5 + $0x1] ss:$0 sm:$0xff] }
 0x255   : > { %6004 = vmatprep.subr.bf16.mxu1 %v6633_v5 }
 0x258   : > { %6005 = vmatpush3.bf16.msra.mxu1 %v6634_v30 }
 0x259   : > { %6030 = vmatprep.subr.bf16.mxu1 %v6635_v35 }
 0x25b   : > { %3630 = vmatmul.mubr.bf16.vlgmr.msra.gmra.mrb[48].mxu1 %v5596_v43  ;;  %v6642_v43 = vld [vmem:[%s9392_s2 + $0x218] sm:$0xff]  }
 0x25c   : > { %3637 = vmatprep.mubr.bf16.mxu1 %v5607_v28  ;;  %6031 = vmatpush3.bf16.msra.mxu1 %v6636_v38  ;;  %v6645_v28 = vld [vmem:[%s9392_s2 + $0x268] sm:$0xff]  }
 0x25d   : > { %6032 = vmatprep.subr.bf16.mxu1 %v6637_v52 }
 0x260   : > { %6033 = vmatpush3.bf16.msra.mxu1 %v6638_v50 }
 0x261   : > { %6034 = vmatprep.subr.bf16.mxu1 %v6639_v24 }
 0x263   : > { %3638 = vmatmul.mubr.bf16.gmra.mrb[52].mxu1 %v5606_v2  ;;  %v2588_v2 = vrot.slane %v8000_v16, 1  ;;  %v6650_v16 = vld [vmem:[%s9392_s2 + $0x238] sm:$0xff]  }
 0x264   : > { %3645 = vmatprep.mubr.bf16.mxu1 %v5617_v36  ;;  %6035 = vmatpush3.bf16.msra.mxu1 %v6640_v6  ;;  %v6652_v6 = vld [vmem:[%s9393_s3] sm:$0xff]  }
 0x265   : > { %6036 = vmatprep.subr.bf16.mxu1 %v6641_v41  ;;  %v5599_v36 = vcombine.low %v2586_v45, %v2588_v2 }
 0x268   : > { %6037 = vmatpush3.bf16.msra.mxu1 %v6642_v43  ;;  %v6653_v43 = vld [vmem:[%s9393_s3 + $0x100] sm:$0xff]  }
 0x269   : > { %6038 = vmatprep.subr.bf16.mxu1 %v6643_v27  ;;  %v6654_v27 = vld [vmem:[%s9393_s3 + $0x48] sm:$0xff]   ;;  %6250 = vmatprep.subr.bf16.mxu0 %v6653_v43 }
 0x26a   : > { %6251 = vmatpush3.bf16.msra.mxu0 %v6653_v43 }
 0x26b   : > { %3646 = vmatmul.mubr.bf16.gmra.mrb[56].mxu1 %v5616_v47  ;;  %v2585_v47 = vrot.slane %v8030_v22, 1  ;;  %v2595_v22 = vrot.slane %v8191_v9, 1 }
 0x26c   : > { %3653 = vmatprep.mubr.bf16.mxu1 %v5627_v54  ;;  %6039 = vmatpush3.bf16.msra.mxu1 %v6644_v59  ;;  %v5609_v54 = vcombine.low %v2590_v62, %v2592_v53  ;;  %v6655_v59 = vld [vmem:[%s9393_s3 + $0x8] sm:$0xff]  }
 0x26d   : > { %6040 = vmatprep.subr.bf16.mxu1 %v6645_v28  ;;  %v5598_v34 = vcombine.low %v2585_v47, %v2587_v48  ;;  %v5618_v23 = vcombine.low %v2593_v51, %v2595_v22  ;;  %v6656_v28 = vld [vmem:[%s9393_s3 + $0x108] sm:$0xff]   ;;  %v6658_v47 = vld [vmem:[%s9393_s3 + $0x10] sm:$0xff]  }
 0x26e   : > { %6252 = vmatprep.subr.bf16.mxu0 %v6656_v28 }
 0x26f   : > { %6253 = vmatpush3.bf16.msra.mxu0 %v6656_v28 }
 0x270   : > { %6041 = vmatpush3.bf16.msra.mxu1 %v6646_v46  ;;  %v6657_v46 = vld [vmem:[%s9393_s3 + $0x50] sm:$0xff]  }
 0x271   : > { %6042 = vmatprep.subr.bf16.mxu1 %v6647_v0 }
 0x273   : > { %3654 = vmatmul.mubr.bf16.gmra.mrb[60].mxu1 %v5626_v55  ;;  %v2589_v55 = vrot.slane %v8146_v17, 1 }
 0x274   : > { %6043 = vmatpush3.bf16.msra.mxu1 %v6648_v32  ;;  %3694 = vmatprep.mubr.bf16.mxu1 %v5599_v36 }
 0x275   : > { %6044 = vmatprep.subr.bf16.mxu1 %v6649_v56  ;;  %v5608_v10 = vcombine.low %v2589_v55, %v2591_v60  ;;  %v6661_v60 = vld [vmem:[%s9393_s3 + $0x18] sm:$0xff]   ;;  %v6663_v55 = vld [vmem:[%s9393_s3 + $0x60] sm:$0xff]  }
 0x278   : > { %6045 = vmatpush3.bf16.msra.mxu1 %v6650_v16 }
 0x279   : > { %6070 = vmatprep.subr.bf16.mxu1 %v6651_v7  ;;  %v6673_v7 = vld [vmem:[%s9393_s3 + $0x38] sm:$0xff]  }
 0x27b   : > { %3695 = vmatmul.mubr.bf16.vlgmr.msra.gmra.mrb[64].mxu1 %v5598_v34  ;;  %v6659_v34 = vld [vmem:[%s9393_s3 + $0x110] sm:$0xff]  }
 0x27c   : > { %3702 = vmatprep.mubr.bf16.mxu1 %v5609_v54  ;;  %6071 = vmatpush3.bf16.msra.mxu1 %v6652_v6  ;;  %v6660_v54 = vld [vmem:[%s9393_s3 + $0x58] sm:$0xff]  }
 0x27d   : > { %6072 = vmatprep.subr.bf16.mxu1 %v6654_v27  ;;  %6254 = vmatprep.subr.bf16.mxu0 %v6659_v34 }
 0x27e   : > { %6255 = vmatpush3.bf16.msra.mxu0 %v6659_v34 }
 0x27f   : > { %6256 = vmatprep.subr.bf16.mxu0 %v6662_v49 }
 0x280   : > { %6073 = vmatpush3.bf16.msra.mxu1 %v6655_v59 }
 0x281   : > { %6074 = vmatprep.subr.bf16.mxu1 %v6657_v46 }
 0x282   : > { %6257 = vmatpush3.bf16.msra.mxu0 %v6662_v49 }
 0x283   : > { %3703 = vmatmul.mubr.bf16.gmra.mrb[68].mxu1 %v5608_v10 }
 0x284   : > { %3710 = vmatprep.mubr.bf16.mxu1 %v5619_v31  ;;  %6075 = vmatpush3.bf16.msra.mxu1 %v6658_v47 }
 0x285   : > { %6076 = vmatprep.subr.bf16.mxu1 %v6660_v54 }
 0x288   : > { %6077 = vmatpush3.bf16.msra.mxu1 %v6661_v60 }
 0x289   : > { %6078 = vmatprep.subr.bf16.mxu1 %v6663_v55 }
 0x28b   : > { %3711 = vmatmul.mubr.bf16.gmra.mrb[72].mxu1 %v5618_v23 }
 0x28c   : > { %3718 = vmatprep.mubr.bf16.mxu1 %v8625_v29 }
 0x293   : > { %3719 = vmatmul.mubr.bf16.gmra.mrb[76].mxu1 %v8627_v13 }
 0x2bf   : > { %v5886_v26 = vpop.f32.mrb[0].mxu1 }
 0x2c0   : > { %v5887_v44 = vpop.f32.mrb[1].mxu1 }
 0x2c1   : > { %v5888_v12 = vadd.f32 %v5887_v44, %v5886_v26  ;;  %v5889_v17 = vpop.f32.mrb[2].mxu1 }
 0x2c2   : > { %v5890_v20 = vpop.f32.mrb[3].mxu1 }
 0x2c3   : > { %v5891_v58 = vadd.f32 %v5890_v20, %v5889_v17  ;;  %v3437_v3 = vadd.f32 %v5888_v12, %v8767_v15  ;;  %v6664_v17 = vld [vmem:[%s9393_s3 + $0x20] sm:$0xff]  }
 0x2c4   : > { %6079 = vmatpush3.bf16.msra.mxu1 %v6664_v17 }
 0x2c5   : > { %v3440_v52 = vadd.f32 %v5891_v58, %v8767_v15  ;;  %v6665_v58 = vld [vmem:[%s9393_s3 + $0x120] sm:$0xff]  }
 0x2c6   : > { %6258 = vmatprep.subr.bf16.mxu0 %v6665_v58 }
 0x2c7   : > { %6259 = vmatpush3.bf16.msra.mxu0 %v6665_v58 }
 0x2cc   : > { %v5892_v37 = vpop.f32.mrb[4].mxu1 }
 0x2cd   : > { %v5893_v4 = vpop.f32.mrb[5].mxu1 }
 0x2ce   : > { %v5894_v39 = vadd.f32 %v5893_v4, %v5892_v37  ;;  %v5895_v40 = vpop.f32.mrb[6].mxu1  ;;  %v6666_v37 = vld [vmem:[%s9393_s3 + $0x68] sm:$0xff]  }
 0x2cf   : > { %v5896_v21 = vpop.f32.mrb[7].mxu1  ;;  %v6667_v4 = vld [vmem:[%s9393_s3 + $0x28] sm:$0xff]   ;;  %6080 = vmatprep.subr.bf16.mxu1 %v6666_v37 }
 0x2d0   : > { %v5897_v9 = vadd.f32 %v5896_v21, %v5895_v40  ;;  %v3445_v32 = vadd.f32 %v5894_v39, %v8767_v15  ;;  %v6668_v39 = vld [vmem:[%s9393_s3 + $0x128] sm:$0xff]   ;;  %v6669_v40 = vld [vmem:[%s9393_s3 + $0x70] sm:$0xff]   ;;  %6081 = vmatpush3.bf16.msra.mxu1 %v6667_v4 }
 0x2d1   : > { %6260 = vmatprep.subr.bf16.mxu0 %v6668_v39  ;;  %6082 = vmatprep.subr.bf16.mxu1 %v6669_v40 }
 0x2d2   : > { %v3448_v16 = vadd.f32 %v5897_v9, %v8767_v15  ;;  %6261 = vmatpush3.bf16.msra.mxu0 %v6668_v39 }
 0x2d4   : > { %v5898_v8 = vpop.f32.mrb[8].mxu1 }
 0x2d5   : > { %v5899_v1 = vpop.f32.mrb[9].mxu1 }
 0x2d6   : > { %v5900_v57 = vadd.f32 %v5899_v1, %v5898_v8  ;;  %v5901_v11 = vpop.f32.mrb[10].mxu1 }
 0x2d7   : > { %v5902_v61 = vpop.f32.mrb[11].mxu1 }
 0x2d8   : > { %v8755_v29 = vadd.f32 %v5902_v61, %v5901_v11  ;;  %v3453_v31 = vadd.f32 %v5900_v57, %v8767_v15  ;;  %v6670_v11 = vld [vmem:[%s9393_s3 + $0x30] sm:$0xff]  }
 0x2d9   : > { %v6671_v61 = vld [vmem:[%s9393_s3 + $0x130] sm:$0xff]   ;;  %6083 = vmatpush3.bf16.msra.mxu1 %v6670_v11 }
 0x2da   : > { %v3456_v26 = vadd.f32 %v8755_v29, %v8767_v15  ;;  %6262 = vmatprep.subr.bf16.mxu0 %v6671_v61 }
 0x2db   : > { %6263 = vmatpush3.bf16.msra.mxu0 %v6671_v61 }
 0x2e6   : > { %v5904_v13 = vpop.f32.mrb[12].mxu1 }
 0x2e7   : > { %v5905_v42 = vpop.f32.mrb[13].mxu1 }
 0x2e8   : > { %v8757_v14 = vadd.f32 %v5905_v42, %v5904_v13  ;;  %v5907_v18 = vpop.f32.mrb[14].mxu1  ;;  %v6672_v13 = vld [vmem:[%s9393_s3 + $0x78] sm:$0xff]  }
 0x2e9   : > { %v5908_v63 = vpop.f32.mrb[15].mxu1  ;;  %6084 = vmatprep.subr.bf16.mxu1 %v6672_v13 }
 0x2ea   : > { %v8759_v19 = vadd.f32 %v5908_v63, %v5907_v18  ;;  %v3461_v8 = vadd.f32 %v8757_v14, %v8767_v15  ;;  %6085 = vmatpush3.bf16.msra.mxu1 %v6673_v7 }
 0x2ec   : > { %v3464_v42 = vadd.f32 %v8759_v19, %v8767_v15 }
 0x2ee   : > { %v5926_v33 = vpop.f32.mrb[16].mxu1 }
 0x2ef   : > { %v5927_v5 = vpop.f32.mrb[17].mxu1 }
 0x2f0   : > { %v5928_v30 = vadd.f32 %v5927_v5, %v5926_v33  ;;  %v5929_v35 = vpop.f32.mrb[18].mxu1  ;;  %v6674_v33 = vld [vmem:[%s9393_s3 + $0x138] sm:$0xff]   ;;  %v6675_v5 = vld [vmem:[%s9393_s3 + $0xc0] sm:$0xff]  }
 0x2f1   : > { %v5930_v38 = vpop.f32.mrb[19].mxu1  ;;  %6264 = vmatprep.subr.bf16.mxu0 %v6674_v33  ;;  %6110 = vmatprep.subr.bf16.mxu1 %v6675_v5 }
 0x2f2   : > { %v8771_v50 = vadd.f32 %v5928_v30, %v3437_v3  ;;  %v5931_v24 = vadd.f32 %v5930_v38, %v5929_v35  ;;  %6265 = vmatpush3.bf16.msra.mxu0 %v6674_v33 }
 0x2f4   : > { %v8776_v41 = vadd.f32 %v5931_v24, %v3440_v52 }
 0x2f6   : > { %v5932_v0 = vpop.f32.mrb[20].mxu1 }
 0x2f7   : > { %v5933_v2 = vpop.f32.mrb[21].mxu1 }
 0x2f8   : > { %v5934_v45 = vadd.f32 %v5933_v2, %v5932_v0  ;;  %v5935_v56 = vpop.f32.mrb[22].mxu1 }
 0x2f9   : > { %v5936_v36 = vpop.f32.mrb[23].mxu1 }
 0x2fa   : > { %v8795_v48 = vadd.f32 %v5934_v45, %v3445_v32  ;;  %v5937_v53 = vadd.f32 %v5936_v36, %v5935_v56 }
 0x2fc   : > { %v8800_v62 = vadd.f32 %v5937_v53, %v3448_v16 }
 0x2fe   : > { %v5938_v25 = vpop.f32.mrb[24].mxu1 }
 0x2ff   : > { %v5939_v10 = vpop.f32.mrb[25].mxu1 }
 0x300   : > { %v5940_v22 = vadd.f32 %v5939_v10, %v5938_v25  ;;  %v5941_v51 = vpop.f32.mrb[26].mxu1 }
 0x301   : > { %v5942_v23 = vpop.f32.mrb[27].mxu1 }
 0x302   : > { %v8820_v44 = vadd.f32 %v5940_v22, %v3453_v31  ;;  %v5943_v12 = vadd.f32 %v5942_v23, %v5941_v51 }
 0x304   : > { %v3521_v20 = vadd.f32 %v5943_v12, %v3456_v26 }
 0x306   : > { %v5944_v21 = vpop.f32.mrb[28].mxu1 }
 0x307   : > { %v5945_v9 = vpop.f32.mrb[29].mxu1 }
 0x308   : > { %v5946_v1 = vadd.f32 %v5945_v9, %v5944_v21  ;;  %v5947_v57 = vpop.f32.mrb[30].mxu1 }
 0x309   : > { %v5948_v29 = vpop.f32.mrb[31].mxu1 }
 0x30a   : > { %v3526_v14 = vadd.f32 %v5946_v1, %v3461_v8  ;;  %v5949_v18 = vadd.f32 %v5948_v29, %v5947_v57 }
 0x30c   : > { %v3529_v63 = vadd.f32 %v5949_v18, %v3464_v42 }
 0x30e   : > { %v5966_v19 = vpop.f32.mrb[32].mxu1 }
 0x30f   : > { %v5967_v15 = vpop.f32.mrb[33].mxu1 }
 0x310   : > { %v5968_v3 = vadd.f32 %v5967_v15, %v5966_v19  ;;  %v5969_v30 = vpop.f32.mrb[34].mxu1 }
 0x311   : > { %v5970_v35 = vpop.f32.mrb[35].mxu1 }
 0x312   : > { %v3567_v38 = vadd.f32 %v5968_v3, %v8771_v50  ;;  %v5971_v52 = vadd.f32 %v5970_v35, %v5969_v30 }
 0x314   : > { %v3570_v24 = vadd.f32 %v5971_v52, %v8776_v41 }
 0x316   : > { %v5972_v6 = vpop.f32.mrb[36].mxu1 }
 0x317   : > { %v5973_v43 = vpop.f32.mrb[37].mxu1 }
 0x318   : > { %v5974_v27 = vadd.f32 %v5973_v43, %v5972_v6  ;;  %v5975_v59 = vpop.f32.mrb[38].mxu1 }
 0x319   : > { %v5976_v28 = vpop.f32.mrb[39].mxu1 }
 0x31a   : > { %v3575_v46 = vadd.f32 %v5974_v27, %v8795_v48  ;;  %v5977_v0 = vadd.f32 %v5976_v28, %v5975_v59 }
 0x31c   : > { %v3578_v2 = vadd.f32 %v5977_v0, %v8800_v62 }
 0x31e   : > { %v5978_v32 = vpop.f32.mrb[40].mxu1 }
 0x31f   : > { %v5979_v45 = vpop.f32.mrb[41].mxu1 }
 0x320   : > { %v5980_v56 = vadd.f32 %v5979_v45, %v5978_v32  ;;  %v5981_v36 = vpop.f32.mrb[42].mxu1 }
 0x321   : > { %v5982_v16 = vpop.f32.mrb[43].mxu1 }
 0x322   : > { %v3583_v50 = vadd.f32 %v5980_v56, %v8820_v44  ;;  %v5983_v53 = vadd.f32 %v5982_v16, %v5981_v36 }
 0x324   : > { %v3586_v47 = vadd.f32 %v5983_v53, %v3521_v20 }
 0x326   : > { %v5984_v41 = vpop.f32.mrb[44].mxu1 }
 0x327   : > { %v5985_v34 = vpop.f32.mrb[45].mxu1 }
 0x328   : > { %v5986_v54 = vadd.f32 %v5985_v34, %v5984_v41  ;;  %v5987_v60 = vpop.f32.mrb[46].mxu1 }
 0x329   : > { %v5988_v49 = vpop.f32.mrb[47].mxu1 }
 0x32a   : > { %v3591_v55 = vadd.f32 %v5986_v54, %v3526_v14  ;;  %v5989_v25 = vadd.f32 %v5988_v49, %v5987_v60 }
 0x32c   : > { %v3594_v48 = vadd.f32 %v5989_v25, %v3529_v63 }
 0x32e   : > { %v6006_v10 = vpop.f32.mrb[48].mxu1 }
 0x32f   : > { %v6007_v31 = vpop.f32.mrb[49].mxu1 }
 0x330   : > { %v6008_v62 = vadd.f32 %v6007_v31, %v6006_v10  ;;  %v6009_v22 = vpop.f32.mrb[50].mxu1 }
 0x331   : > { %v6010_v51 = vpop.f32.mrb[51].mxu1 }
 0x332   : > { %v3632_v23 = vadd.f32 %v6008_v62, %v3567_v38  ;;  %v6011_v26 = vadd.f32 %v6010_v51, %v6009_v22 }
 0x334   : > { %v3635_v12 = vadd.f32 %v6011_v26, %v3570_v24 }
 0x336   : > { %v6012_v17 = vpop.f32.mrb[52].mxu1 }
 0x337   : > { %v6013_v44 = vpop.f32.mrb[53].mxu1 }
 0x338   : > { %v6014_v58 = vadd.f32 %v6013_v44, %v6012_v17  ;;  %v6015_v20 = vpop.f32.mrb[54].mxu1 }
 0x339   : > { %v6016_v37 = vpop.f32.mrb[55].mxu1 }
 0x33a   : > { %v3640_v4 = vadd.f32 %v6014_v58, %v3575_v46  ;;  %v6017_v39 = vadd.f32 %v6016_v37, %v6015_v20 }
 0x33c   : > { %v3643_v40 = vadd.f32 %v6017_v39, %v3578_v2 }
 0x33e   : > { %v6018_v21 = vpop.f32.mrb[56].mxu1 }
 0x33f   : > { %v6019_v9 = vpop.f32.mrb[57].mxu1 }
 0x340   : > { %v6020_v8 = vadd.f32 %v6019_v9, %v6018_v21  ;;  %v6021_v1 = vpop.f32.mrb[58].mxu1 }
 0x341   : > { %v6022_v57 = vpop.f32.mrb[59].mxu1 }
 0x342   : > { %v3648_v11 = vadd.f32 %v6020_v8, %v3583_v50  ;;  %v6023_v61 = vadd.f32 %v6022_v57, %v6021_v1 }
 0x344   : > { %v3651_v29 = vadd.f32 %v6023_v61, %v3586_v47 }
 0x346   : > { %v6024_v13 = vpop.f32.mrb[60].mxu1 }
 0x347   : > { %v6025_v42 = vpop.f32.mrb[61].mxu1 }
 0x348   : > { %v6026_v14 = vadd.f32 %v6025_v42, %v6024_v13  ;;  %v6027_v18 = vpop.f32.mrb[62].mxu1 }
 0x349   : > { %v6028_v63 = vpop.f32.mrb[63].mxu1 }
 0x34a   : > { %v3656_v7 = vadd.f32 %v6026_v14, %v3591_v55  ;;  %v6029_v33 = vadd.f32 %v6028_v63, %v6027_v18 }
 0x34c   : > { %v8867_v5 = vadd.f32 %v6029_v33, %v3594_v48 }
 0x34e   : > { %v6046_v19 = vpop.f32.mrb[64].mxu1 }
 0x34f   : > { %v6047_v15 = vpop.f32.mrb[65].mxu1 }
 0x350   : > { %v6048_v3 = vadd.f32 %v6047_v15, %v6046_v19  ;;  %v6049_v30 = vpop.f32.mrb[66].mxu1 }
 0x351   : > { %v6050_v35 = vpop.f32.mrb[67].mxu1 }
 0x352   : > { %v3697_v38 = vadd.f32 %v6048_v3, %v3632_v23  ;;  %v6051_v52 = vadd.f32 %v6050_v35, %v6049_v30 }
 0x354   : > { %v3727_v24 = vmul.f32 0.5, %v3697_v38  ;;  %v3700_v6 = vadd.f32 %v6051_v52, %v3635_v12 }
 0x356   : > { %6819 = vtanh.f32 %v3727_v24  ;;  %v3728_v43 = vmul.f32 0.5, %v3700_v6  ;;  %v6052_v27 = vpop.f32.mrb[68].mxu1 }
 0x357   : > { %v6053_v59 = vpop.f32.mrb[69].mxu1 }
 0x358   : > { %6821 = vtanh.f32 %v3728_v43  ;;  %v6054_v28 = vadd.f32 %v6053_v59, %v6052_v27  ;;  %v6055_v46 = vpop.f32.mrb[70].mxu1 }
 0x359   : > { %v6056_v0 = vpop.f32.mrb[71].mxu1 }
 0x35a   : > { %v3705_v2 = vadd.f32 %v6054_v28, %v3640_v4  ;;  %v6057_v32 = vadd.f32 %v6056_v0, %v6055_v46 }
 0x35c   : > { %v3729_v45 = vmul.f32 0.5, %v3705_v2  ;;  %v3708_v56 = vadd.f32 %v6057_v32, %v3643_v40 }
 0x35e   : > { %6823 = vtanh.f32 %v3729_v45  ;;  %v3730_v36 = vmul.f32 0.5, %v3708_v56  ;;  %v6058_v16 = vpop.f32.mrb[72].mxu1 }
 0x35f   : > { %v6059_v50 = vpop.f32.mrb[73].mxu1 }
 0x360   : > { %v6820_v53 = vpop.eup %6819  ;;  %6825 = vtanh.f32 %v3730_v36  ;;  %v6060_v47 = vadd.f32 %v6059_v50, %v6058_v16  ;;  %v6061_v41 = vpop.f32.mrb[74].mxu1 }
 0x361   : > { %v3743_v34 = vmul.f32 0.5, %v6820_v53  ;;  %v6062_v54 = vpop.f32.mrb[75].mxu1 }
 0x362   : > { %v6822_v60 = vpop.eup %6821  ;;  %v3713_v49 = vadd.f32 %v6060_v47, %v3648_v11  ;;  %v6063_v55 = vadd.f32 %v6062_v54, %v6061_v41  ;;  %v6676_v54 = vld [vmem:[%s9393_s3 + $0x80] sm:$0xff]  }
 0x363   : > { %v3751_v25 = vadd.f32 0.5, %v3743_v34  ;;  %v3744_v48 = vmul.f32 0.5, %v6822_v60 }
 0x364   : > { %v3731_v10 = vmul.f32 0.5, %v3713_v49  ;;  %v3716_v31 = vadd.f32 %v6063_v55, %v3651_v29 }
 0x365   : > { %v5854_v62 = vpack.c.bf16 %v3751_v25, %v3751_v25  ;;  %v3752_v22 = vadd.f32 0.5, %v3744_v48 }
 0x366   : > { %6827 = vtanh.f32 %v3731_v10  ;;  %v3732_v51 = vmul.f32 0.5, %v3716_v31  ;;  %v6064_v23 = vpop.f32.mrb[76].mxu1  ;;  %v6677_v10 = vld [vmem:[%s9393_s3 + $0xc8] sm:$0xff]  }
 0x367   : > { %v3783_v26 = vrot.slane %v5854_v62, 7  ;;  %v5855_v12 = vpack.c.bf16 %v3752_v22, %v3752_v22  ;;  %v6065_v17 = vpop.f32.mrb[77].mxu1 }
 0x368   : > { %v6824_v44 = vpop.eup %6823  ;;  %6829 = vtanh.f32 %v3732_v51  ;;  %v6066_v58 = vadd.f32 %v6065_v17, %v6064_v23  ;;  %v6067_v20 = vpop.f32.mrb[78].mxu1 }
 0x369   : > { %v3794_v37 = vsel %vm2224_vm1, 0, %v3783_v26  ;;  %v3784_v4 = vrot.slane %v5855_v12, 7  ;;  %v3745_v39 = vmul.f32 0.5, %v6824_v44  ;;  %v6068_v40 = vpop.f32.mrb[79].mxu1 }
 0x36a   : > { %v6826_v21 = vpop.eup %6825  ;;  %v8871_v9 = vsel %vm2243_vm4, %v3794_v37, 0  ;;  %v3721_v8 = vadd.f32 %v6066_v58, %v3656_v7  ;;  %v6069_v1 = vadd.f32 %v6068_v40, %v6067_v20  ;;  %v6678_v20 = vld [vmem:[%s9393_s3 + $0x88] sm:$0xff]  }
 0x36b   : > { %v3796_v57 = vsel %vm2224_vm1, 0, %v3784_v4  ;;  %v3753_v11 = vadd.f32 0.5, %v3745_v39  ;;  %v3746_v61 = vmul.f32 0.5, %v6826_v21  ;;  %v3905_v29 = vrot.slane %v8871_v9, 2 }
 0x36c   : > { %v8876_v13 = vsel %vm2243_vm4, %v3796_v57, 0  ;;  %v3733_v42 = vmul.f32 0.5, %v3721_v8  ;;  %v3724_v14 = vadd.f32 %v6069_v1, %v8867_v5  ;;  %v3817_v18 = vshrl.u32 %v8871_v9, 16  ;;  %v6679_v57 = vld [vmem:[%s9393_s3 + $0xd0] sm:$0xff]  }
 0x36d   : > { %v5856_v63 = vpack.c.bf16 %v3753_v11, %v3753_v11  ;;  %v3754_v33 = vadd.f32 0.5, %v3746_v61  ;;  %v3906_v19 = vrot.slane %v8876_v13, 2  ;;  %v3819_v7 = vshll.u32 %v8871_v9, 16 }
 0x36e   : > { %6831 = vtanh.f32 %v3733_v42  ;;  %v3734_v15 = vmul.f32 0.5, %v3724_v14  ;;  %v3823_v3 = vshrl.u32 %v8876_v13, 16  ;;  %v3825_v30 = vshll.u32 %v8876_v13, 16 }
 0x36f   : > { %v3785_v35 = vrot.slane %v5856_v63, 7  ;;  %v5857_v38 = vpack.c.bf16 %v3754_v33, %v3754_v33  ;;  %v5722_v52 = vcombine.low %v3905_v29, %v3906_v19  ;;  %v3821_v24 = vrot.slane %v3819_v7, 1 }
 0x370   : > { %v6828_v6 = vpop.eup %6827  ;;  %6833 = vtanh.f32 %v3734_v15  ;;  %v3827_v5 = vrot.slane %v3825_v30, 1  ;;  %v5718_v43 = vcombine.low %v8871_v9, %v8876_v13  ;;  %v8886_v27 = vrot.slane %v3817_v18, 1  ;;  %v6680_v15 = vld [vmem:[%s9393_s3 + $0x90] sm:$0xff]  }
 0x371   : > { %v3798_v59 = vsel %vm2224_vm1, 0, %v3785_v35  ;;  %v3786_v28 = vrot.slane %v5857_v38, 7  ;;  %v3747_v46 = vmul.f32 0.5, %v6828_v6  ;;  %6266 = vmatprep.mubr.bf16.mxu0 %v5722_v52  ;;  %v3822_v0 = vor.u32 %v3821_v24, %v3817_v18  ;;  %v6681_v24 = vld [vmem:[%s9393_s3 + $0xd8] sm:$0xff]  }
 0x372   : > { %v6830_v2 = vpop.eup %6829  ;;  %v8890_v32 = vsel %vm2243_vm4, %v3798_v59, 0  ;;  %v3828_v45 = vor.u32 %v3827_v5, %v3823_v3  ;;  %v8892_v56 = vrot.slane %v3819_v7, 2  ;;  %v8894_v36 = vrot.slane %v3823_v3, 1 }
 0x373   : > { %v3800_v16 = vsel %vm2224_vm1, 0, %v3786_v28  ;;  %v3755_v50 = vadd.f32 0.5, %v3747_v46  ;;  %v3748_v53 = vmul.f32 0.5, %v6830_v2  ;;  %v3907_v47 = vrot.slane %v8890_v32, 2 }
 0x374   : > { %v8899_v41 = vsel %vm2243_vm4, %v3800_v16, 0  ;;  %v5719_v34 = vcombine.low %v3822_v0, %v3828_v45  ;;  %v3829_v60 = vshrl.u32 %v8890_v32, 16  ;;  %v3831_v49 = vshll.u32 %v8890_v32, 16  ;;  %v6682_v45 = vld [vmem:[%s9393_s3 + $0x98] sm:$0xff]  }
 0x375   : > { %v5858_v55 = vpack.c.bf16 %v3755_v50, %v3755_v50  ;;  %v3756_v25 = vadd.f32 0.5, %v3748_v53  ;;  %v3908_v48 = vrot.slane %v8899_v41, 2  ;;  %v3835_v31 = vshrl.u32 %v8899_v41, 16 }
 0x376   : > { %4346 = vmatprep.mubr.bf16.mxu1 %v5719_v34  ;;  %v3833_v62 = vrot.slane %v3831_v49, 1  ;;  %v3837_v22 = vshll.u32 %v8899_v41, 16  ;;  %v5723_v51 = vcombine.low %v8890_v32, %v8899_v41  ;;  %v3883_v23 = vor.u32 %v8892_v56, %v8886_v27  ;;  %v6683_v34 = vld [vmem:[%s9393_s3 + $0xe0] sm:$0xff]  }
 0x377   : > { %v3787_v26 = vrot.slane %v5858_v55, 7  ;;  %v5859_v12 = vpack.c.bf16 %v3756_v25, %v3756_v25  ;;  %4347 = vmatmul.mubr.bf16.vlgmr.msra.gmra.mrb[80].mxu1 %v5718_v43  ;;  %v5727_v17 = vcombine.low %v3907_v47, %v3908_v48  ;;  %v3885_v44 = vrot.slane %v3825_v30, 2 }
 0x378   : > { %v6832_v58 = vpop.eup %6831  ;;  %6111 = vmatpush3.bf16.msra.mxu1 %v6676_v54  ;;  %v3834_v37 = vor.u32 %v3833_v62, %v3829_v60  ;;  %v3839_v4 = vrot.slane %v3837_v22, 1  ;;  %v3873_v39 = vrot.slane %v8871_v9, 1  ;;  %v3874_v40 = vrot.slane %v8876_v13, 1 }
 0x379   : > { %v3802_v21 = vsel %vm2224_vm1, 0, %v3787_v26  ;;  %v3788_v8 = vrot.slane %v5859_v12, 7  ;;  %v3749_v1 = vmul.f32 0.5, %v6832_v58  ;;  %6267 = vmatmul.mubr.bf16.vlgmr.msra.gmra.mrb[32].mxu0 %v5727_v17  ;;  %6112 = vmatprep.subr.bf16.mxu1 %v6677_v10  ;;  %v3886_v11 = vor.u32 %v3885_v44, %v8894_v36  ;;  %v6684_v26 = vld [vmem:[%s9393_s3 + $0xa0] sm:$0xff]  }
 0x37a   : > { %v6834_v61 = vpop.eup %6833  ;;  %v8927_v29 = vsel %vm2243_vm4, %v3802_v21, 0  ;;  %v3840_v42 = vor.u32 %v3839_v4, %v3835_v31  ;;  %v8929_v9 = vcombine.low %v3873_v39, %v3874_v40  ;;  %v3887_v13 = vrot.slane %v3829_v60, 1 }
 0x37b   : > { %v3804_v14 = vsel %vm2224_vm1, 0, %v3788_v8  ;;  %v3757_v18 = vadd.f32 0.5, %v3749_v1  ;;  %v3750_v63 = vmul.f32 0.5, %v6834_v61  ;;  %v3909_v33 = vrot.slane %v8927_v29, 2 }
 0x37c   : > { %v8934_v19 = vsel %vm2243_vm4, %v3804_v14, 0  ;;  %6113 = vmatpush3.bf16.msra.mxu1 %v6678_v20  ;;  %v5724_v7 = vcombine.low %v3834_v37, %v3840_v42  ;;  %v3841_v3 = vshrl.u32 %v8927_v29, 16  ;;  %v3843_v30 = vshll.u32 %v8927_v29, 16 }
 0x37d   : > { %v5860_v35 = vpack.c.bf16 %v3757_v18, %v3757_v18  ;;  %v3758_v38 = vadd.f32 0.5, %v3750_v63  ;;  %6114 = vmatprep.subr.bf16.mxu1 %v6679_v57  ;;  %v3910_v52 = vrot.slane %v8934_v19, 2  ;;  %v3847_v6 = vshrl.u32 %v8934_v19, 16  ;;  %v6687_v63 = vld [vmem:[%s9393_s3 + $0xf0] sm:$0xff]  }
 0x37e   : > { %4354 = vmatprep.mubr.bf16.mxu1 %v5724_v7  ;;  %v3845_v5 = vrot.slane %v3843_v30, 1  ;;  %v3849_v43 = vshll.u32 %v8934_v19, 16  ;;  %v5728_v27 = vcombine.low %v8927_v29, %v8934_v19  ;;  %v8949_v59 = vcombine.low %v3883_v23, %v3886_v11  ;;  %v6686_v11 = vld [vmem:[%s9393_s3 + $0xa8] sm:$0xff]  }
 0x37f   : > { %v3789_v28 = vrot.slane %v5860_v35, 7  ;;  %v5861_v46 = vpack.c.bf16 %v3758_v38, %v3758_v38  ;;  %4355 = vmatmul.mubr.bf16.gmra.mrb[84].mxu1 %v5723_v51  ;;  %v5732_v0 = vcombine.low %v3909_v33, %v3910_v52  ;;  %v3888_v2 = vrot.slane %v3831_v49, 2 }
 0x380   : > { %6115 = vmatpush3.bf16.msra.mxu1 %v6680_v15  ;;  %v3846_v56 = vor.u32 %v3845_v5, %v3841_v3  ;;  %v3851_v36 = vrot.slane %v3849_v43, 1  ;;  %v3890_v16 = vrot.slane %v3835_v31, 1  ;;  %v3891_v50 = vrot.slane %v3837_v22, 2 }
 0x381   : > { %v3806_v53 = vsel %vm2224_vm1, 0, %v3789_v28  ;;  %v3790_v47 = vrot.slane %v5861_v46, 7  ;;  %6270 = vmatprep.mubr.bf16.mxu0 %v5732_v0  ;;  %6116 = vmatprep.subr.bf16.mxu1 %v6681_v24  ;;  %v3889_v54 = vor.u32 %v3888_v2, %v3887_v13  ;;  %v3875_v60 = vrot.slane %v8890_v32, 1  ;;  %v6690_v28 = vld [vmem:[%s9393_s3 + $0xb8] sm:$0xff]   ;;  %v6691_v46 = vld [vmem:[%s9394_s4 + $0x40] sm:$0xff]   ;;  %v6695_v2 = vld [vmem:[%s9394_s4 + $0x48] sm:$0xff]  }
 0x382   : > { %v3815_v49 = vsel %vm2243_vm4, %v3806_v53, 0  ;;  %v3852_v55 = vor.u32 %v3851_v36, %v3847_v6  ;;  %v3892_v25 = vor.u32 %v3891_v50, %v3890_v16  ;;  %v3876_v48 = vrot.slane %v8899_v41, 1  ;;  %v6685_v41 = vld [vmem:[%s9393_s3 + $0xe8] sm:$0xff]   ;;  %v6693_v0 = vld [vmem:[%s9394_s4] sm:$0xff]   ;;  %v6699_v16 = vld [vmem:[%s9394_s4 + $0x50] sm:$0xff]  }
 0x383   : > { %v3808_v10 = vsel %vm2224_vm1, 0, %v3790_v47  ;;  %v3911_v31 = vrot.slane %v3815_v49, 2  ;;  %v3853_v62 = vshrl.u32 %v3815_v49, 16  ;;  %v3855_v22 = vshll.u32 %v3815_v49, 16  ;;  %v6698_v36 = vld [vmem:[%s9394_s4 + $0x88] sm:$0xff]   ;;  %v6700_v50 = vld [vmem:[%s9394_s4 + $0xd0] sm:$0xff]  }
 0x384   : > { %v3816_v51 = vsel %vm2243_vm4, %v3808_v10, 0  ;;  %6117 = vmatpush3.bf16.msra.mxu1 %v6682_v45  ;;  %v5729_v23 = vcombine.low %v3846_v56, %v3852_v55  ;;  %v5726_v32 = vcombine.low %v3889_v54, %v3892_v25  ;;  %v5725_v12 = vcombine.low %v3875_v60, %v3876_v48  ;;  %v6696_v45 = vld [vmem:[%s9394_s4 + $0xc8] sm:$0xff]   ;;  %v6701_v53 = vld [vmem:[%s9394_s4 + $0x10] sm:$0xff]   ;;  %v6704_v54 = vld [vmem:[%s9394_s4 + $0xd8] sm:$0xff]  }
 0x385   : > { %6118 = vmatprep.subr.bf16.mxu1 %v6683_v34  ;;  %v3912_v17 = vrot.slane %v3816_v51, 2  ;;  %v3857_v44 = vrot.slane %v3855_v22, 1  ;;  %v3859_v58 = vshrl.u32 %v3816_v51, 16  ;;  %v3861_v20 = vshll.u32 %v3816_v51, 16  ;;  %v6697_v56 = vld [vmem:[%s9394_s4 + $0x8] sm:$0xff]   ;;  %v6702_v47 = vld [vmem:[%s9394_s4 + $0x90] sm:$0xff]  }
 0x386   : > { %4362 = vmatprep.mubr.bf16.mxu1 %v5729_v23  ;;  %v5733_v37 = vcombine.low %v3815_v49, %v3816_v51  ;;  %v3893_v4 = vrot.slane %v3841_v3, 1  ;;  %v3894_v39 = vrot.slane %v3843_v30, 2  ;;  %v3896_v40 = vrot.slane %v3847_v6, 1  ;;  %v6703_v34 = vld [vmem:[%s9394_s4 + $0x58] sm:$0xff]   ;;  %v6707_v55 = vld [vmem:[%s9394_s4 + $0x60] sm:$0xff]   ;;  %v6715_v23 = vld [vmem:[%s9394_s4 + $0x70] sm:$0xff]  }
 0x387   : > { %4363 = vmatmul.mubr.bf16.gmra.mrb[88].mxu1 %v5728_v27  ;;  %v5737_v21 = vcombine.low %v3911_v31, %v3912_v17  ;;  %v3858_v8 = vor.u32 %v3857_v44, %v3853_v62  ;;  %v3863_v1 = vrot.slane %v3861_v20, 1  ;;  %v3897_v57 = vrot.slane %v3849_v43, 2  ;;  %v6689_v43 = vld [vmem:[%s9393_s3 + $0xf8] sm:$0xff]   ;;  %v6708_v25 = vld [vmem:[%s9394_s4 + $0xe0] sm:$0xff]   ;;  %v6711_v31 = vld [vmem:[%s9394_s4 + $0x68] sm:$0xff]  }
 0x388   : > { %6119 = vmatpush3.bf16.msra.mxu1 %v6684_v26  ;;  %v3895_v61 = vor.u32 %v3894_v39, %v3893_v4  ;;  %v3877_v42 = vrot.slane %v8927_v29, 1  ;;  %v3878_v13 = vrot.slane %v8934_v19, 1  ;;  %v3899_v14 = vrot.slane %v3853_v62, 1  ;;  %v6688_v29 = vld [vmem:[%s9393_s3 + $0xb0] sm:$0xff]   ;;  %v6705_v60 = vld [vmem:[%s9394_s4 + $0x18] sm:$0xff]   ;;  %v6709_v48 = vld [vmem:[%s9394_s4 + $0x20] sm:$0xff]  }
 0x389   : > { %6271 = vmatmul.mubr.bf16.gmra.mrb[36].mxu0 %v5737_v21  ;;  %6120 = vmatprep.subr.bf16.mxu1 %v6685_v41  ;;  %v3864_v18 = vor.u32 %v3863_v1, %v3859_v58  ;;  %v3898_v33 = vor.u32 %v3897_v57, %v3896_v40  ;;  %v3900_v7 = vrot.slane %v3855_v22, 2  ;;  %v3902_v15 = vrot.slane %v3859_v58, 1  ;;  %v6710_v10 = vld [vmem:[%s9394_s4 + $0xa0] sm:$0xff]   ;;  %v6712_v62 = vld [vmem:[%s9394_s4 + $0xe8] sm:$0xff]   ;;  %v6716_v26 = vld [vmem:[%s9394_s4 + $0xf0] sm:$0xff]  }
 0x38a   : > { %v5730_v3 = vcombine.low %v3877_v42, %v3878_v13  ;;  %v3903_v30 = vrot.slane %v3861_v20, 2  ;;  %v3879_v35 = vrot.slane %v3815_v49, 1  ;;  %v3880_v38 = vrot.slane %v3816_v51, 1  ;;  %v6706_v49 = vld [vmem:[%s9394_s4 + $0x98] sm:$0xff]   ;;  %v6713_v22 = vld [vmem:[%s9394_s4 + $0x28] sm:$0xff]   ;;  %v6723_v20 = vld [vmem:[%s9394_s4 + $0x140] sm:$0xff]  }
 0x38b   : > { %v5734_v52 = vcombine.low %v3858_v8, %v3864_v18  ;;  %v5731_v24 = vcombine.low %v3895_v61, %v3898_v33  ;;  %v3901_v19 = vor.u32 %v3900_v7, %v3899_v14  ;;  %v6714_v51 = vld [vmem:[%s9394_s4 + $0xa8] sm:$0xff]   ;;  %v6719_v17 = vld [vmem:[%s9394_s4 + $0x78] sm:$0xff]  }
 0x38c   : > { %6121 = vmatpush3.bf16.msra.mxu1 %v6686_v11  ;;  %v3904_v6 = vor.u32 %v3903_v30, %v3902_v15  ;;  %v5735_v5 = vcombine.low %v3879_v35, %v3880_v38  ;;  %v6720_v41 = vld [vmem:[%s9394_s4 + $0xf8] sm:$0xff]  }
 0x38d   : > { %4370 = vmatprep.mubr.bf16.mxu1 %v5734_v52  ;;  %6122 = vmatprep.subr.bf16.mxu1 %v6687_v63  ;;  %v6721_v44 = vld [vmem:[%s9394_s4 + $0x38] sm:$0xff]  }
 0x38e   : > { %v5736_v27 = vcombine.low %v3901_v19, %v3904_v6  ;;  %v6722_v58 = vld [vmem:[%s9394_s4 + $0xb8] sm:$0xff]  }
 0x38f   : > { %4371 = vmatmul.mubr.bf16.gmra.mrb[92].mxu1 %v5733_v37  ;;  %v6724_v37 = vld [vmem:[%s9394_s4 + $0x1c0] sm:$0xff]  }
 0x390   : > { %6123 = vmatpush3.bf16.msra.mxu1 %v6688_v29  ;;  %4411 = vmatprep.mubr.bf16.mxu1 %v8949_v59  ;;  %v6692_v59 = vld [vmem:[%s9394_s4 + $0xc0] sm:$0xff]  }
 0x391   : > { %6124 = vmatprep.subr.bf16.mxu1 %v6689_v43  ;;  %6184 = vmatprep.subr.bf16.mxu0 %v6692_v59 }
 0x394   : > { %6125 = vmatpush3.bf16.msra.mxu1 %v6690_v28 }
 0x395   : > { %6162 = vmatprep.subr.bf16.mxu1 %v6691_v46 }
 0x397   : > { %4412 = vmatmul.mubr.bf16.vlgmr.msra.gmra.mrb[96].mxu1 %v8929_v9  ;;  %v6694_v9 = vld [vmem:[%s9394_s4 + $0x80] sm:$0xff]  }
 0x398   : > { %4419 = vmatprep.mubr.bf16.mxu1 %v5726_v32  ;;  %6163 = vmatpush3.bf16.msra.mxu1 %v6693_v0  ;;  %v6717_v32 = vld [vmem:[%s9394_s4 + $0x30] sm:$0xff]   ;;  %v9099_v0 = vld [vmem:[%s9395_s5 + $0x2] ss:$0 sm:$0xff] }
 0x399   : > { %6185 = vmatpush3.bf16.msra.mxu0 %v6694_v9  ;;  %6164 = vmatprep.subr.bf16.mxu1 %v6695_v2 }
 0x39a   : > { %6186 = vmatprep.subr.bf16.mxu0 %v6696_v45 }
 0x39c   : > { %6165 = vmatpush3.bf16.msra.mxu1 %v6697_v56 }
 0x39d   : > { %6187 = vmatpush3.bf16.msra.mxu0 %v6698_v36  ;;  %6166 = vmatprep.subr.bf16.mxu1 %v6699_v16 }
 0x39e   : > { %6188 = vmatprep.subr.bf16.mxu0 %v6700_v50 }
 0x39f   : > { %4420 = vmatmul.mubr.bf16.gmra.mrb[100].mxu1 %v5725_v12  ;;  %v6718_v12 = vld [vmem:[%s9394_s4 + $0xb0] sm:$0xff]  }
 0x3a0   : > { %4427 = vmatprep.mubr.bf16.mxu1 %v5731_v24  ;;  %6167 = vmatpush3.bf16.msra.mxu1 %v6701_v53 }
 0x3a1   : > { %6189 = vmatpush3.bf16.msra.mxu0 %v6702_v47  ;;  %6168 = vmatprep.subr.bf16.mxu1 %v6703_v34 }
 0x3a2   : > { %6190 = vmatprep.subr.bf16.mxu0 %v6704_v54 }
 0x3a4   : > { %6169 = vmatpush3.bf16.msra.mxu1 %v6705_v60 }
 0x3a5   : > { %6191 = vmatpush3.bf16.msra.mxu0 %v6706_v49  ;;  %6170 = vmatprep.subr.bf16.mxu1 %v6707_v55 }
 0x3a6   : > { %6192 = vmatprep.subr.bf16.mxu0 %v6708_v25 }
 0x3a7   : > { %4428 = vmatmul.mubr.bf16.gmra.mrb[104].mxu1 %v5730_v3 }
 0x3a8   : > { %4435 = vmatprep.mubr.bf16.mxu1 %v5736_v27  ;;  %6171 = vmatpush3.bf16.msra.mxu1 %v6709_v48 }
 0x3a9   : > { %6193 = vmatpush3.bf16.msra.mxu0 %v6710_v10  ;;  %6172 = vmatprep.subr.bf16.mxu1 %v6711_v31 }
 0x3aa   : > { %6194 = vmatprep.subr.bf16.mxu0 %v6712_v62 }
 0x3ac   : > { %6173 = vmatpush3.bf16.msra.mxu1 %v6713_v22 }
 0x3ad   : > { %6195 = vmatpush3.bf16.msra.mxu0 %v6714_v51  ;;  %6174 = vmatprep.subr.bf16.mxu1 %v6715_v23 }
 0x3ae   : > { %6196 = vmatprep.subr.bf16.mxu0 %v6716_v26 }
 0x3af   : > { %4436 = vmatmul.mubr.bf16.gmra.mrb[108].mxu1 %v5735_v5 }
 0x3b0   : > { %6175 = vmatpush3.bf16.msra.mxu1 %v6717_v32 }
 0x3b1   : > { %6197 = vmatpush3.bf16.msra.mxu0 %v6718_v12  ;;  %6176 = vmatprep.subr.bf16.mxu1 %v6719_v17 }
 0x3b2   : > { %6198 = vmatprep.subr.bf16.mxu0 %v6720_v41 }
 0x3b4   : > { %6177 = vmatpush3.bf16.msra.mxu1 %v6721_v44 }
 0x3b5   : > { %6199 = vmatpush3.bf16.msra.mxu0 %v6722_v58  ;;  %6206 = vmatprep.subr.bf16.mxu1 %v6723_v20 }
 0x3b6   : > { %6228 = vmatprep.subr.bf16.mxu0 %v6724_v37 }
 0x44a   : > { %v6086_v4 = vpop.f32.mrb[80].mxu1 }
 0x44b   : > { %v6087_v39 = vpop.f32.mrb[81].mxu1 }
 0x44c   : > { %v6088_v40 = vadd.f32 %v6087_v39, %v6086_v4  ;;  %v6089_v21 = vpop.f32.mrb[82].mxu1  ;;  %v6268_v8 = vpop.f32.mrb[32].mxu0 }
 0x44d   : > { %v6090_v1 = vpop.f32.mrb[83].mxu1  ;;  %v4478_v57 = vpop.f32.mrb[33].mxu0 }
 0x44e   : > { %v6091_v11 = vadd.f32 %v6090_v1, %v6089_v21  ;;  %v6269_v61 = vpop.f32.mrb[34].mxu0  ;;  %v4349_v45 = vadd.f32 %v6088_v40, %v9099_v0 }
 0x44f   : > { %v4481_v42 = vpop.f32.mrb[35].mxu0 }
 0x450   : > { %v4352_v50 = vadd.f32 %v6091_v11, %v9099_v0 }
 0x452   : > { %v6092_v13 = vpop.f32.mrb[84].mxu1 }
 0x453   : > { %v6093_v14 = vpop.f32.mrb[85].mxu1 }
 0x454   : > { %v6094_v18 = vadd.f32 %v6093_v14, %v6092_v13  ;;  %v6095_v63 = vpop.f32.mrb[86].mxu1 }
 0x455   : > { %v6096_v33 = vpop.f32.mrb[87].mxu1 }
 0x456   : > { %v6097_v7 = vadd.f32 %v6096_v33, %v6095_v63  ;;  %v4357_v48 = vadd.f32 %v6094_v18, %v9099_v0 }
 0x458   : > { %v4360_v51 = vadd.f32 %v6097_v7, %v9099_v0 }
 0x45a   : > { %v6098_v15 = vpop.f32.mrb[88].mxu1 }
 0x45b   : > { %v6099_v3 = vpop.f32.mrb[89].mxu1 }
 0x45c   : > { %v6100_v30 = vadd.f32 %v6099_v3, %v6098_v15  ;;  %v6101_v35 = vpop.f32.mrb[90].mxu1  ;;  %v9090_v38 = vpop.f32.mrb[36].mxu0 }
 0x45d   : > { %v6102_v52 = vpop.f32.mrb[91].mxu1  ;;  %v4494_v24 = vpop.f32.mrb[37].mxu0 }
 0x45e   : > { %v6103_v29 = vadd.f32 %v6102_v52, %v6101_v35  ;;  %v9092_v19 = vpop.f32.mrb[38].mxu0  ;;  %v4365_v20 = vadd.f32 %v6100_v30, %v9099_v0 }
 0x45f   : > { %v4497_v6 = vpop.f32.mrb[39].mxu0 }
 0x460   : > { %v4368_v1 = vadd.f32 %v6103_v29, %v9099_v0 }
 0x462   : > { %v6104_v5 = vpop.f32.mrb[92].mxu1 }
 0x463   : > { %v6105_v43 = vpop.f32.mrb[93].mxu1 }
 0x464   : > { %v6106_v27 = vadd.f32 %v6105_v43, %v6104_v5  ;;  %v6107_v28 = vpop.f32.mrb[94].mxu1 }
 0x465   : > { %v6108_v46 = vpop.f32.mrb[95].mxu1 }
 0x466   : > { %v9094_v59 = vadd.f32 %v6108_v46, %v6107_v28  ;;  %v4373_v35 = vadd.f32 %v6106_v27, %v9099_v0 }
 0x46a   : > { %v6126_v9 = vpop.f32.mrb[96].mxu1 }
 0x46b   : > { %v6127_v2 = vpop.f32.mrb[97].mxu1 }
 0x46c   : > { %v6128_v56 = vadd.f32 %v6127_v2, %v6126_v9  ;;  %v6129_v36 = vpop.f32.mrb[98].mxu1 }
 0x46d   : > { %v6130_v16 = vpop.f32.mrb[99].mxu1 }
 0x46e   : > { %v4414_v53 = vadd.f32 %v6128_v56, %v4349_v45  ;;  %v6131_v47 = vadd.f32 %v6130_v16, %v6129_v36 }
 0x470   : > { %v4479_v34 = vadd.f32 %v4478_v57, %v4414_v53  ;;  %v4417_v54 = vadd.f32 %v6131_v47, %v4352_v50 }
 0x472   : > { %v4509_v60 = vmul.f32 0.5, %v4479_v34  ;;  %v4482_v49 = vadd.f32 %v4481_v42, %v4417_v54  ;;  %v6132_v55 = vpop.f32.mrb[100].mxu1 }
 0x473   : > { %v6133_v25 = vpop.f32.mrb[101].mxu1 }
 0x474   : > { %6835 = vtanh.f32 %v4509_v60  ;;  %v4510_v10 = vmul.f32 0.5, %v4482_v49  ;;  %v6134_v31 = vadd.f32 %v6133_v25, %v6132_v55  ;;  %v6135_v62 = vpop.f32.mrb[102].mxu1 }
 0x475   : > { %v6136_v22 = vpop.f32.mrb[103].mxu1 }
 0x476   : > { %6837 = vtanh.f32 %v4510_v10  ;;  %v4422_v23 = vadd.f32 %v6134_v31, %v4357_v48  ;;  %v6137_v26 = vadd.f32 %v6136_v22, %v6135_v62 }
 0x478   : > { %v4487_v32 = vadd.f32 %v6268_v8, %v4422_v23  ;;  %v4425_v12 = vadd.f32 %v6137_v26, %v4360_v51 }
 0x47a   : > { %v4511_v17 = vmul.f32 0.5, %v4487_v32  ;;  %v4490_v41 = vadd.f32 %v6269_v61, %v4425_v12  ;;  %v6138_v44 = vpop.f32.mrb[104].mxu1 }
 0x47b   : > { %v6139_v58 = vpop.f32.mrb[105].mxu1 }
 0x47c   : > { %6839 = vtanh.f32 %v4511_v17  ;;  %v4512_v37 = vmul.f32 0.5, %v4490_v41  ;;  %v6140_v4 = vadd.f32 %v6139_v58, %v6138_v44  ;;  %v6141_v39 = vpop.f32.mrb[106].mxu1 }
 0x47d   : > { %v6142_v40 = vpop.f32.mrb[107].mxu1 }
 0x47e   : > { %v6836_v21 = vpop.eup %6835  ;;  %6841 = vtanh.f32 %v4512_v37  ;;  %v4430_v57 = vadd.f32 %v6140_v4, %v4365_v20  ;;  %v6143_v11 = vadd.f32 %v6142_v40, %v6141_v39 }
 0x47f   : > { %v4525_v42 = vmul.f32 0.5, %v6836_v21 }
 0x480   : > { %v6838_v8 = vpop.eup %6837  ;;  %v4495_v13 = vadd.f32 %v4494_v24, %v4430_v57  ;;  %v4433_v14 = vadd.f32 %v6143_v11, %v4368_v1 }
 0x481   : > { %v4533_v61 = vadd.f32 0.5, %v4525_v42  ;;  %v4526_v18 = vmul.f32 0.5, %v6838_v8 }
 0x482   : > { %v4513_v63 = vmul.f32 0.5, %v4495_v13  ;;  %v4498_v33 = vadd.f32 %v4497_v6, %v4433_v14  ;;  %v6144_v7 = vpop.f32.mrb[108].mxu1  ;;  %v4376_v6 = vadd.f32 %v9094_v59, %v9099_v0 }
 0x483   : > { %v5862_v15 = vpack.c.bf16 %v4533_v61, %v4533_v61  ;;  %v4534_v3 = vadd.f32 0.5, %v4526_v18  ;;  %v6145_v30 = vpop.f32.mrb[109].mxu1 }
 0x484   : > { %6843 = vtanh.f32 %v4513_v63  ;;  %v4514_v52 = vmul.f32 0.5, %v4498_v33  ;;  %v6146_v29 = vadd.f32 %v6145_v30, %v6144_v7  ;;  %v6147_v5 = vpop.f32.mrb[110].mxu1 }
 0x485   : > { %v9108_v43 = vunpack.c.l.b16 %v5862_v15  ;;  %v5863_v28 = vpack.c.bf16 %v4534_v3, %v4534_v3  ;;  %v6148_v46 = vpop.f32.mrb[111].mxu1 }
 0x486   : > { %v6840_v24 = vpop.eup %6839  ;;  %6845 = vtanh.f32 %v4514_v52  ;;  %v4438_v9 = vadd.f32 %v6146_v29, %v4373_v35  ;;  %v6149_v2 = vadd.f32 %v6148_v46, %v6147_v5 }
 0x487   : > { %v9112_v45 = vunpack.c.l.b16 %v5863_v28  ;;  %v4527_v27 = vmul.f32 0.5, %v6840_v24  ;;  %v4596_v56 = vrot.slane %v9108_v43, 1  ;;  %v4628_v36 = vrot.slane %v9108_v43, 3 }
 0x488   : > { %v6842_v16 = vpop.eup %6841  ;;  %v4503_v50 = vadd.f32 %v9090_v38, %v4438_v9  ;;  %v4441_v53 = vadd.f32 %v6149_v2, %v4376_v6  ;;  %v4612_v47 = vrot.slane %v9108_v43, 2  ;;  %v4660_v34 = vrot.slane %v9108_v43, 5 }
 0x489   : > { %v4535_v59 = vadd.f32 0.5, %v4527_v27  ;;  %v4528_v0 = vmul.f32 0.5, %v6842_v16  ;;  %v4597_v54 = vsel %vm4574_vm9, %v9112_v45, %v4596_v56  ;;  %v4629_v60 = vrot.slane %v9112_v45, 2 }
 0x48a   : > { %v4515_v49 = vmul.f32 0.5, %v4503_v50  ;;  %v4506_v55 = vadd.f32 %v9092_v19, %v4441_v53  ;;  %v4573_v25 = vrot.slane %v9112_v45, 7  ;;  %v4613_v38 = vrot.slane %v9112_v45, 1 }
 0x48b   : > { %v5864_v48 = vpack.c.bf16 %v4535_v59, %v4535_v59  ;;  %v4536_v10 = vadd.f32 0.5, %v4528_v0  ;;  %v4630_v31 = vsel %vm4574_vm9, %v4629_v60, %v4628_v36  ;;  %v4661_v62 = vrot.slane %v9112_v45, 4 }
 0x48c   : > { %6847 = vtanh.f32 %v4515_v49  ;;  %v4516_v22 = vmul.f32 0.5, %v4506_v55  ;;  %v4575_v51 = vsel %vm4574_vm9, %v4573_v25, %v9108_v43  ;;  %v4614_v23 = vsel %vm4574_vm9, %v4613_v38, %v4612_v47 }
 0x48d   : > { %v9130_v26 = vunpack.c.l.b16 %v5864_v48  ;;  %v5865_v19 = vpack.c.bf16 %v4536_v10, %v4536_v10  ;;  %v4662_v32 = vsel %vm4574_vm9, %v4661_v62, %v4660_v34  ;;  %v4692_v12 = vrot.slane %v9108_v43, 7 }
 0x48e   : > { %v6844_v17 = vpop.eup %6843  ;;  %6849 = vtanh.f32 %v4516_v22  ;;  %v4693_v41 = vrot.slane %v9112_v45, 6  ;;  %v4644_v44 = vrot.slane %v9108_v43, 4  ;;  %v4645_v58 = vrot.slane %v9112_v45, 3 }
 0x48f   : > { %v9137_v20 = vunpack.c.l.b16 %v5865_v19  ;;  %v4529_v37 = vmul.f32 0.5, %v6844_v17  ;;  %v4598_v4 = vrot.slane %v9130_v26, 7  ;;  %v4631_v39 = vrot.slane %v9130_v26, 1 }
 0x490   : > { %v6846_v40 = vpop.eup %6845  ;;  %v4576_v21 = vrot.slane %v9130_v26, 6  ;;  %v4615_v1 = vsel %vm4577_vm10, %v9130_v26, %v4614_v23  ;;  %v4663_v57 = vrot.slane %v9130_v26, 3  ;;  %v4694_v11 = vsel %vm4574_vm9, %v4693_v41, %v4692_v12 }
 0x491   : > { %v4537_v42 = vadd.f32 0.5, %v4529_v37  ;;  %v4530_v8 = vmul.f32 0.5, %v6846_v40  ;;  %v4599_v13 = vsel %vm4577_vm10, %v4598_v4, %v4597_v54  ;;  %v4600_v14 = vrot.slane %v9137_v20, 6 }
 0x492   : > { %v4632_v61 = vsel %vm4577_vm10, %v4631_v39, %v4630_v31  ;;  %v4578_v18 = vsel %vm4577_vm10, %v4576_v21, %v4575_v51  ;;  %v4579_v63 = vrot.slane %v9137_v20, 5  ;;  %v4616_v33 = vrot.slane %v9137_v20, 7 }
 0x493   : > { %v5866_v7 = vpack.c.bf16 %v4537_v42, %v4537_v42  ;;  %v4538_v15 = vadd.f32 0.5, %v4530_v8  ;;  %v4601_v3 = vsel %vm4580_vm11, %v4600_v14, %v4599_v13  ;;  %v4633_v30 = vsel %vm4580_vm11, %v9137_v20, %v4632_v61 }
 0x494   : > { %v4581_v35 = vsel %vm4580_vm11, %v4579_v63, %v4578_v18  ;;  %v4617_v52 = vsel %vm4580_vm11, %v4616_v33, %v4615_v1  ;;  %v4664_v29 = vsel %vm4577_vm10, %v4663_v57, %v4662_v32  ;;  %v4665_v5 = vrot.slane %v9137_v20, 2 }
 0x495   : > { %v9159_v28 = vunpack.c.l.b16 %v5866_v7  ;;  %v5867_v46 = vpack.c.bf16 %v4538_v15, %v4538_v15  ;;  %v4695_v24 = vrot.slane %v9130_v26, 5  ;;  %v4697_v6 = vrot.slane %v9137_v20, 4 }
 0x496   : > { %v6848_v9 = vpop.eup %6847  ;;  %v4666_v2 = vsel %vm4580_vm11, %v4665_v5, %v4664_v29  ;;  %v4646_v27 = vsel %vm4574_vm9, %v4645_v58, %v4644_v44  ;;  %v4647_v56 = vrot.slane %v9130_v26, 2  ;;  %v4649_v36 = vrot.slane %v9137_v20, 1 }
 0x497   : > { %v9167_v16 = vunpack.c.l.b16 %v5867_v46  ;;  %v4531_v50 = vmul.f32 0.5, %v6848_v9  ;;  %v4602_v53 = vrot.slane %v9159_v28, 5  ;;  %v4634_v47 = vrot.slane %v9159_v28, 7 }
 0x498   : > { %v6850_v34 = vpop.eup %6849  ;;  %v4582_v59 = vrot.slane %v9159_v28, 4  ;;  %v4618_v0 = vrot.slane %v9159_v28, 6  ;;  %v4667_v54 = vrot.slane %v9159_v28, 1  ;;  %v4696_v60 = vsel %vm4577_vm10, %v4695_v24, %v4694_v11 }
 0x499   : > { %v4539_v49 = vadd.f32 0.5, %v4531_v50  ;;  %v4532_v55 = vmul.f32 0.5, %v6850_v34  ;;  %v4603_v25 = vsel %vm4583_vm12, %v4602_v53, %v4601_v3  ;;  %v4604_v38 = vrot.slane %v9167_v16, 4  ;;  %v6726_v50 = vld [vmem:[%s9394_s4 + $0x180] sm:$0xff]  }
 0x49a   : > { %v4635_v48 = vsel %vm4583_vm12, %v4634_v47, %v4633_v30  ;;  %v4636_v10 = vrot.slane %v9167_v16, 6  ;;  %v4584_v31 = vsel %vm4583_vm12, %v4582_v59, %v4581_v35  ;;  %v4585_v62 = vrot.slane %v9167_v16, 3 }
 0x49b   : > { %v5868_v22 = vpack.c.bf16 %v4539_v49, %v4539_v49  ;;  %v4540_v51 = vadd.f32 0.5, %v4532_v55  ;;  %v4605_v23 = vsel %vm4586_vm13, %v4604_v38, %v4603_v25  ;;  %v4619_v19 = vsel %vm4583_vm12, %v4618_v0, %v4617_v52  ;;  %v6727_v0 = vld [vmem:[%s9394_s4 + $0x148] sm:$0xff]  }
 0x49c   : > { %v4637_v32 = vsel %vm4586_vm13, %v4636_v10, %v4635_v48  ;;  %v4587_v12 = vsel %vm4586_vm13, %v4585_v62, %v4584_v31  ;;  %v4620_v17 = vrot.slane %v9167_v16, 5  ;;  %v4668_v41 = vsel %vm4583_vm12, %v4667_v54, %v4666_v2  ;;  %v6728_v49 = vld [vmem:[%s9394_s4 + $0x1c8] sm:$0xff]  }
 0x49d   : > { %v9187_v44 = vunpack.c.l.b16 %v5868_v22  ;;  %v5869_v58 = vpack.c.bf16 %v4540_v51, %v4540_v51  ;;  %v4669_v37 = vsel %vm4586_vm13, %v9167_v16, %v4668_v41  ;;  %v4698_v4 = vsel %vm4580_vm11, %v4697_v6, %v4696_v60  ;;  %v6730_v22 = vld [vmem:[%s9394_s4 + $0x188] sm:$0xff]  }
 0x49e   : > { %v4621_v39 = vsel %vm4586_vm13, %v4620_v17, %v4619_v19  ;;  %v4699_v40 = vrot.slane %v9159_v28, 3  ;;  %v4701_v21 = vrot.slane %v9167_v16, 2  ;;  %v4648_v1 = vsel %vm4577_vm10, %v4647_v56, %v4646_v27  ;;  %v6725_v56 = vld [vmem:[%s9394_s4 + $0x100] sm:$0xff]  }
 0x49f   : > { %v9196_v57 = vunpack.c.l.b16 %v5869_v58  ;;  %v4606_v11 = vrot.slane %v9187_v44, 3  ;;  %v4638_v42 = vrot.slane %v9187_v44, 5  ;;  %v4588_v8 = vrot.slane %v9187_v44, 2 }
 0x4a0   : > { %v4622_v13 = vrot.slane %v9187_v44, 4  ;;  %v4670_v14 = vrot.slane %v9187_v44, 7  ;;  %v4700_v61 = vsel %vm4583_vm12, %v4699_v40, %v4698_v4  ;;  %v4703_v18 = vrot.slane %v9187_v44, 1 }
 0x4a1   : > { %v4607_v63 = vsel %vm4589_vm14, %v4606_v11, %v4605_v23  ;;  %v4608_v33 = vrot.slane %v9196_v57, 2  ;;  %v4639_v7 = vsel %vm4589_vm14, %v4638_v42, %v4637_v32  ;;  %v4640_v15 = vrot.slane %v9196_v57, 4  ;;  %v6731_v32 = vld [vmem:[%s9394_s4 + $0x150] sm:$0xff]  }
 0x4a2   : > { %v4590_v3 = vsel %vm4589_vm14, %v4588_v8, %v4587_v12  ;;  %v4591_v30 = vrot.slane %v9196_v57, 1  ;;  %v4623_v35 = vsel %vm4589_vm14, %v4622_v13, %v4621_v39  ;;  %v4624_v52 = vrot.slane %v9196_v57, 3  ;;  %v6732_v12 = vld [vmem:[%s9394_s4 + $0x1d0] sm:$0xff]   ;;  %v6738_v8 = vld [vmem:[%s9394_s4 + $0x198] sm:$0xff]  }
 0x4a3   : > { %v4609_v29 = vsel %vm4592_vm15, %v4608_v33, %v4607_v63  ;;  %v4641_v5 = vsel %vm4592_vm15, %v4640_v15, %v4639_v7  ;;  %v4671_v46 = vsel %vm4589_vm14, %v4670_v14, %v4669_v37  ;;  %v4672_v24 = vrot.slane %v9196_v57, 6  ;;  %v6739_v14 = vld [vmem:[%s9394_s4 + $0x160] sm:$0xff]   ;;  %v6743_v63 = vld [vmem:[%s9394_s4 + $0x168] sm:$0xff]  }
 0x4a4   : > { %v4610_v6 = vpack.c.b16 %v4609_v29, %v4609_v29  ;;  %v4642_v9 = vpack.c.b16 %v4641_v5, %v4641_v5  ;;  %v4593_v2 = vsel %vm4592_vm15, %v4591_v30, %v4590_v3  ;;  %v4625_v27 = vsel %vm4592_vm15, %v4624_v52, %v4623_v35  ;;  %v6744_v33 = vld [vmem:[%s9394_s4 + $0x1e8] sm:$0xff]   ;;  %v6747_v3 = vld [vmem:[%s9394_s4 + $0x170] sm:$0xff]   ;;  %v6751_v29 = vld [vmem:[%s9394_s4 + $0x178] sm:$0xff]  }
 0x4a5   : > { %v4594_v53 = vpack.c.b16 %v4593_v2, %v4593_v2  ;;  %v4626_v47 = vpack.c.b16 %v4625_v27, %v4625_v27  ;;  %v4673_v34 = vsel %vm4592_vm15, %v4672_v24, %v4671_v46  ;;  %v4702_v59 = vsel %vm4586_vm13, %v4701_v21, %v4700_v61  ;;  %v6736_v21 = vld [vmem:[%s9394_s4 + $0x1d8] sm:$0xff]   ;;  %v6741_v61 = vld [vmem:[%s9394_s4 + $0x120] sm:$0xff]   ;;  %v6745_v7 = vld [vmem:[%s9394_s4 + $0x128] sm:$0xff]  }
 0x4a6   : > { %5253 = vmatprep.mubr.bf16.mxu1 %v4610_v6  ;;  %5293 = vmatprep.mubr.bf16.mxu0 %v4642_v9  ;;  %v4674_v54 = vpack.c.b16 %v4673_v34, %v4673_v34  ;;  %v4704_v60 = vsel %vm4589_vm14, %v4703_v18, %v4702_v59  ;;  %v4650_v55 = vsel %vm4580_vm11, %v4649_v36, %v4648_v1  ;;  %v4652_v25 = vrot.slane %v9167_v16, 7  ;;  %v6729_v36 = vld [vmem:[%s9394_s4 + $0x108] sm:$0xff]   ;;  %v6742_v18 = vld [vmem:[%s9394_s4 + $0x1a0] sm:$0xff]   ;;  %v6748_v30 = vld [vmem:[%s9394_s4 + $0x1f0] sm:$0xff]  }
 0x4a7   : > { %5254 = vmatmul.mubr.bf16.vlgmr.msra.gmra.mrb[112].mxu1 %v4594_v53  ;;  %5294 = vmatmul.mubr.bf16.vlgmr.msra.gmra.mrb[40].mxu0 %v4626_v47  ;;  %v4705_v38 = vsel %vm4592_vm15, %v9196_v57, %v4704_v60  ;;  %v4651_v48 = vsel %vm4583_vm12, %v9159_v28, %v4650_v55  ;;  %v4654_v10 = vrot.slane %v9187_v44, 6  ;;  %v4656_v31 = vrot.slane %v9196_v57, 5  ;;  %v6746_v15 = vld [vmem:[%s9394_s4 + $0x1a8] sm:$0xff]   ;;  %v6749_v35 = vld [vmem:[%s9394_s4 + $0x130] sm:$0xff]   ;;  %v6752_v5 = vld [vmem:[%s9394_s4 + $0x1f8] sm:$0xff]  }
 0x4a8   : > { %6207 = vmatpush3.bf16.msra.mxu1 %v6725_v56  ;;  %6229 = vmatpush3.bf16.msra.mxu0 %v6726_v50  ;;  %v4706_v62 = vpack.c.b16 %v4705_v38, %v4705_v38  ;;  %v4653_v51 = vsel %vm4586_vm13, %v4652_v25, %v4651_v48  ;;  %v4676_v23 = vrot.slane %v9108_v43, 6  ;;  %v4677_v19 = vrot.slane %v9112_v45, 5  ;;  %v6750_v52 = vld [vmem:[%s9394_s4 + $0x1b0] sm:$0xff]   ;;  %v6753_v46 = vld [vmem:[%s9394_s4 + $0x138] sm:$0xff]   ;;  %v4836_v56 = vld [vmem:[%s9395_s5 + $0x3] ss:$0 sm:$0xff] }
 0x4a9   : > { %5333 = vmatprep.mubr.bf16.mxu1 %v4674_v54  ;;  %6208 = vmatprep.subr.bf16.mxu1 %v6727_v0  ;;  %v4655_v17 = vsel %vm4589_vm14, %v4654_v10, %v4653_v51  ;;  %v4679_v41 = vrot.slane %v9130_v26, 4  ;;  %v4681_v58 = vrot.slane %v9137_v20, 3  ;;  %v4683_v43 = vrot.slane %v9159_v28, 2  ;;  %v6733_v26 = vld [vmem:[%s9394_s4 + $0x110] sm:$0xff]   ;;  %v6754_v24 = vld [vmem:[%s9394_s4 + $0x1b8] sm:$0xff]  }
 0x4aa   : > { %5373 = vmatprep.mubr.bf16.mxu0 %v4706_v62  ;;  %6230 = vmatprep.subr.bf16.mxu0 %v6728_v49  ;;  %v4657_v45 = vsel %vm4592_vm15, %v4656_v31, %v4655_v17  ;;  %v4678_v37 = vsel %vm4574_vm9, %v4677_v19, %v4676_v23  ;;  %v4685_v4 = vrot.slane %v9167_v16, 1  ;;  %v6734_v20 = vld [vmem:[%s9394_s4 + $0x190] sm:$0xff]   ;;  %v4688_v40 = vrot.slane %v9196_v57, 7  ;;  %v6735_v16 = vld [vmem:[%s9394_s4 + $0x158] sm:$0xff]  }
 0x4ab   : > { %v4680_v39 = vsel %vm4577_vm10, %v4679_v41, %v4678_v37  ;;  %v6737_v57 = vld [vmem:[%s9394_s4 + $0x118] sm:$0xff]   ;;  %v4658_v6 = vpack.c.b16 %v4657_v45, %v4657_v45 }
 0x4ac   : > { %6209 = vmatpush3.bf16.msra.mxu1 %v6729_v36  ;;  %6231 = vmatpush3.bf16.msra.mxu0 %v6730_v22  ;;  %v4682_v28 = vsel %vm4580_vm11, %v4681_v58, %v4680_v39 }
 0x4ad   : > { %6210 = vmatprep.subr.bf16.mxu1 %v6731_v32  ;;  %6232 = vmatprep.subr.bf16.mxu0 %v6732_v12  ;;  %v4684_v1 = vsel %vm4583_vm12, %v4683_v43, %v4682_v28 }
 0x4ae   : > { %v4686_v11 = vsel %vm4586_vm13, %v4685_v4, %v4684_v1 }
 0x4af   : > { %v4687_v42 = vsel %vm4589_vm14, %v9187_v44, %v4686_v11  ;;  %v6740_v44 = vld [vmem:[%s9394_s4 + $0x1e0] sm:$0xff]  }
 0x4b0   : > { %6211 = vmatpush3.bf16.msra.mxu1 %v6733_v26  ;;  %6233 = vmatpush3.bf16.msra.mxu0 %v6734_v20  ;;  %v4689_v13 = vsel %vm4592_vm15, %v4688_v40, %v4687_v42 }
 0x4b1   : > { %6212 = vmatprep.subr.bf16.mxu1 %v6735_v16  ;;  %6234 = vmatprep.subr.bf16.mxu0 %v6736_v21  ;;  %v4690_v9 = vpack.c.b16 %v4689_v13, %v4689_v13 }
 0x4b4   : > { %6213 = vmatpush3.bf16.msra.mxu1 %v6737_v57  ;;  %6235 = vmatpush3.bf16.msra.mxu0 %v6738_v8 }
 0x4b5   : > { %6214 = vmatprep.subr.bf16.mxu1 %v6739_v14  ;;  %6236 = vmatprep.subr.bf16.mxu0 %v6740_v44 }
 0x4b8   : > { %6215 = vmatpush3.bf16.msra.mxu1 %v6741_v61  ;;  %6237 = vmatpush3.bf16.msra.mxu0 %v6742_v18 }
 0x4b9   : > { %6216 = vmatprep.subr.bf16.mxu1 %v6743_v63  ;;  %6238 = vmatprep.subr.bf16.mxu0 %v6744_v33 }
 0x4bc   : > { %6217 = vmatpush3.bf16.msra.mxu1 %v6745_v7  ;;  %6239 = vmatpush3.bf16.msra.mxu0 %v6746_v15 }
 0x4bd   : > { %6218 = vmatprep.subr.bf16.mxu1 %v6747_v3  ;;  %6240 = vmatprep.subr.bf16.mxu0 %v6748_v30 }
 0x4c0   : > { %6219 = vmatpush3.bf16.msra.mxu1 %v6749_v35  ;;  %6241 = vmatpush3.bf16.msra.mxu0 %v6750_v52 }
 0x4c1   : > { %6220 = vmatprep.subr.bf16.mxu1 %v6751_v29  ;;  %6242 = vmatprep.subr.bf16.mxu0 %v6752_v5 }
 0x4c4   : > { %6221 = vmatpush3.bf16.msra.mxu1 %v6753_v46  ;;  %6243 = vmatpush3.bf16.msra.mxu0 %v6754_v24 }
 0x4c7   : > { %5334 = vmatmul.mubr.bf16.vlgmr.msra.gmra.mrb[116].mxu1 %v4658_v6  ;;  %5374 = vmatmul.mubr.bf16.vlgmr.msra.gmra.mrb[44].mxu0 %v4690_v9 }
 0x57a   : > { %v6178_v2 = vpop.f32.mrb[112].mxu1  ;;  %v6200_v27 = vpop.f32.mrb[40].mxu0 }
 0x57b   : > { %v6179_v50 = vpop.f32.mrb[113].mxu1  ;;  %v6201_v53 = vpop.f32.mrb[41].mxu0 }
 0x57c   : > { %v6180_v47 = vadd.f32 %v6179_v50, %v6178_v2  ;;  %v6202_v34 = vadd.f32 %v6201_v53, %v6200_v27  ;;  %v6181_v59 = vpop.f32.mrb[114].mxu1  ;;  %v6203_v0 = vpop.f32.mrb[42].mxu0 }
 0x57d   : > { %v6182_v54 = vpop.f32.mrb[115].mxu1  ;;  %v6204_v60 = vpop.f32.mrb[43].mxu0 }
 0x57e   : > { %v5256_v49 = vadd.f32 %v6180_v47, %v4836_v56 }
 0x580   : > { %v5296_v55 = vadd.f32 %v6202_v34, %v5256_v49 }
 0x59a   : > { %v6222_v25 = vpop.f32.mrb[116].mxu1  ;;  %v6244_v38 = vpop.f32.mrb[44].mxu0 }
 0x59b   : > { %v6223_v48 = vpop.f32.mrb[117].mxu1  ;;  %v6245_v10 = vpop.f32.mrb[45].mxu0 }
 0x59c   : > { %v6224_v31 = vadd.f32 %v6223_v48, %v6222_v25  ;;  %v6246_v62 = vadd.f32 %v6245_v10, %v6244_v38  ;;  %v6225_v36 = vpop.f32.mrb[118].mxu1  ;;  %v6247_v22 = vpop.f32.mrb[46].mxu0 }
 0x59d   : > { %v6226_v51 = vpop.f32.mrb[119].mxu1  ;;  %v6248_v23 = vpop.f32.mrb[47].mxu0 }
 0x59e   : > { %v5336_v19 = vadd.f32 %v6224_v31, %v5296_v55 }
 0x5a0   : > { %v5376_v32 = vadd.f32 %v6246_v62, %v5336_v19 }
 0x5a2   : > { %5381 = vst [vmem:[%s247_s16] sm:$0xff] %v5376_v32 }
 0x5a3   : > { %6864 = shalt.err (!%p6861_p3)
}
 0x5a4   : > { %s6865_s10 = scalar_lea.hbm %s9348_s26, 128  ;;  %s6869_s13 = scalar_lea.hbm %s9396_s6, 256 }
 0x5a5   : > { %p6866_p4 = scmp.ne.s32.totalorder %s9348_s26, %s6865_s10  ;;  %p6870_p9 = scmp.lt.u32.totalorder %s9348_s26, %s9396_s6 }
 0x5a6   : > { %p6871_p10 = scmp.lt.u32.totalorder %s6869_s13, %s6865_s10  ;;  %p6873_p12 = scmp.lt.u32.totalorder %s6865_s10, %s9348_s26 }
 0x5a7   : > { %p6867_p7 = pnand %p6866_p4, %p6990_p5 }
 0x5a8   : > { %p6872_p11 = por %p6871_p10, %p6870_p9 }
 0x5a9   : > { %p6868_p8 = pneg %p6867_p7 }
 0x5aa   : > { %p6874_p13 = por %p6873_p12, %p6872_p11 }
 0x5ac   : > { %p6875_p0 = pnand %p6874_p13, %p6868_p8 }
 0x5ae   : > { %6878 = shalt.err (!%p6875_p0)
}
 0x5af   : > { %6371 = dma.vmem_to_hbm [thread:$0]  (%p6990_p5), %s9350_s17, 128, %s9348_s26, %s5383_s28  }
 0x5b0 PF: > { %p6377_p1 = scmp.ge.s32.totalorder %s6913_s24, 2  ;;  %s5408_s16 = sand.u32 1, %s6901_s21  }
 0x5b1   : > { %s5409_s18 = scalar_lea.sflag [#allocation3], %s5408_s16 }
 0x5b2   : > { %p6374_p2 = pnand %p6377_p1, %p6994_p6 }
 0x5b4   : > { %6896 = dma.done.wait (!%p6374_p2), %s5409_s18, 128  }
 0x5b5   : > { %6898 = vsyncadd (!%p6374_p2), %s5409_s18, 4294967168  ;;  %p16_p3 = scmp.ge.s32.totalorder %s6977_s27, 4   ;;  %s9558_s21 = smov %s6905_s22 }
 0x5b6   : > { %s9559_s22 = smov %s6909_s23  ;;  %s9560_s23 = smov %s6988_s30 }
 0x5b7   : > { %s9561_s24 = smov %s6977_s27  ;;  %18 = sbr.rel (!%p16_p3) target bundleno = 3 (0x3), region = 79 }
 0x5be   :  { %5414 = vsyncpa [#allocation3], 1 }
 0x5bf   :  { %5416 = vsyncpa [#allocation3 + $0x1], 1 }

</bundles_post_ra>
